<compile_context>
chip_gen: v6e
topology: v6e:2x2x1
jax: 0.10.0
libtpu: 0.0.40
codegen_flags: <defaults>
</compile_context>

<pallas_src>
import functools

import jax
import jax.numpy as jnp
from jax import lax
from jax.experimental import pallas as pl
from jax.experimental.pallas import tpu as pltpu

BN_EPS = 1e-5
LANE = 128                      # channel dims padded to multiples of the lane width


def _round_up(x, m):
    return (x + m - 1) // m * m


def _tpu_vmem_capacity_bytes():
    try:
        return int(pltpu.get_tpu_info().vmem_capacity_bytes)
    except Exception:            # CPU emulation / older API -> assume 128 MiB class
        return 128 * 1024 * 1024


_VMEM_CAP = _tpu_vmem_capacity_bytes()
# Leave ~16 MiB headroom for compiler scratch / double buffers:
#   v7x (64 MiB physical)  -> ~48 MiB;  v5e/v6e (128 MiB) -> ~112 MiB.
VMEM_LIMIT_BYTES = max(32 * 1024 * 1024,
                       min(_VMEM_CAP - 16 * 1024 * 1024, 112 * 1024 * 1024))
# Rows of the (N*OH*OW, C) GEMM per tile: bigger on 128-MiB-VMEM generations.
ROW_TILE_TARGET = 256 if _VMEM_CAP <= 80 * 1024 * 1024 else 512


# --------------------------- kernel A: conv + stats ---------------------------
def _conv_stats_kernel(x_ref, w_ref, y_ref, stat_ref, *, taps, num_row_tiles):
    """Conv as a single K-concatenated tap GEMM (bf16 MXU, f32 accum) + BN stats.

    x_ref   : (1, Hslab, Ws, Cinp)   bf16  phase-split padded image (per-image resident)
    w_ref   : (ntaps*Cinp, Coutp)    bf16  weights (resident across the whole grid)
    y_ref   : (1, TH, OW, Coutp)     bf16  conv output row-tile
    stat_ref: (1, 1, 2, Coutp)       f32   [channel sum ; channel sum of squares]
    """
    _, th, ow, coutp = y_ref.shape
    cinp = x_ref.shape[-1]
    m = th * ow

    if num_row_tiles == 1:
        oh0 = 0                                           # fully static slicing
    else:
        oh0 = pl.multiple_of(pl.program_id(1) * th, th)

    # Gather the kh*kw shifted windows straight from the VMEM-resident slab and
    # K-concatenate them: one (m, ntaps*Cinp) x (ntaps*Cinp, Coutp) MXU GEMM
    # instead of 9 dot+add (no register-accumulator spills, no extra VALU adds).
    windows = [
        x_ref[0, pl.ds(oh0 + row_off, th), pl.ds(col_off, ow), :].reshape(m, cinp)
        for (row_off, col_off) in taps
    ]
    lhs = jnp.concatenate(windows, axis=-1) if len(windows) > 1 else windows[0]
    acc = jnp.dot(lhs, w_ref[...], preferred_element_type=jnp.float32)

    # bf16 store of the intermediate activation; BN partial stats from f32 acc.
    y_ref[...] = acc.reshape(1, th, ow, coutp).astype(y_ref.dtype)
    s = jnp.sum(acc, axis=0, keepdims=True)               # (1, Coutp)
    q = jnp.sum(acc * acc, axis=0, keepdims=True)         # (1, Coutp)
    stat_ref[...] = jnp.concatenate([s, q], axis=0).reshape(1, 1, 2, coutp)


# ------------------- kernel B: folded BN affine + res + ReLU ------------------
def _bn_act_kernel(y_ref, scale_ref, shift_ref, *rest, relu, add_residual):
    """out = y*scale + shift (+ residual) (+ ReLU); lane-dense bf16 in/out."""
    if add_residual:
        res_ref, out_ref = rest
    else:
        (out_ref,) = rest
    coutp = y_ref.shape[-1]
    scale = scale_ref[...].reshape(1, 1, 1, coutp)
    shift = shift_ref[...].reshape(1, 1, 1, coutp)
    out = y_ref[...].astype(jnp.float32) * scale + shift
    if add_residual:
        out = out + res_ref[...].astype(jnp.float32)
    if relu:
        out = jnp.maximum(out, 0.0)
    out_ref[...] = out.astype(out_ref.dtype)


# ------------------------------ tiling helper ---------------------------------
def _pick_row_tile(oh, ow, target_rows):
    """Largest divisor of oh <= target_rows, preferring th*ow multiples of 256/128."""
    if oh <= target_rows:
        return oh
    divisors = [d for d in range(1, target_rows + 1) if oh % d == 0]
    for mult in (256, 128, 8):
        good = [d for d in divisors if (d * ow) % mult == 0]
        if good:
            return max(good)
    return max(divisors)


# ------------------------------ conv_layer stage ------------------------------
def conv_bn_act(x_int, w, gamma, beta, *, stride, padding, relu=True, residual=None):
    """Conv(bias=False) + BatchNorm(train batch stats) [+ residual] [+ ReLU].

    x_int: (N, H, W, Cinp) bf16, channel-padded NHWC (padded channels are zero).
    Returns (N, OH, OW, Coutp) bf16 in the same internal format.
    """
    n, h, w_in, cinp = x_int.shape
    kh, kw, cin, cout = w.shape
    coutp = _round_up(cout, LANE)
    s = stride
    oh = (h + 2 * padding - kh) // s + 1
    ow = (w_in + 2 * padding - kw) // s + 1

    # th divides oh  ->  no padded output rows, no trailing slice / residual pad.
    th = _pick_row_tile(oh, ow, max(1, ROW_TILE_TARGET // max(ow, 1)))
    n_tiles = oh // th
    ah_max = (kh - 1) // s
    aw_max = (kw - 1) // s

    # ---- wrapper glue: pad + phase split (one pass over x, no 9x im2col) -----
    xp = jnp.pad(x_int, ((0, 0), (padding, padding), (padding, padding), (0, 0)))
    hp, wp_ = xp.shape[1], xp.shape[2]
    hs = max(oh + ah_max, -(-hp // s))
    ws = max(ow + aw_max, -(-wp_ // s))
    slabs = []
    for ph in range(s):
        for pw in range(s):
            sl = xp[:, ph::s, pw::s, :]
            sl = jnp.pad(sl, ((0, 0), (0, hs - sl.shape[1]),
                              (0, ws - sl.shape[2]), (0, 0)))
            slabs.append(sl)
    xps = jnp.concatenate(slabs, axis=1) if len(slabs) > 1 else slabs[0]
    # tap (kh_,kw_) of the stride-s conv == stride-1 tap (kh_//s, kw_//s) of
    # phase slab (kh_%s, kw_%s); slabs are stacked along H, hence row offsets.
    taps = tuple((((kh_ % s) * s + (kw_ % s)) * hs + kh_ // s, kw_ // s)
                 for kh_ in range(kh) for kw_ in range(kw))
    ntaps = kh * kw

    # Weights / BN params padded to lane-dense channel counts; weights laid out
    # (tap-major, cin) x cout to match the in-kernel K-concatenation order.
    w_pad = jnp.zeros((kh, kw, cinp, coutp), jnp.float32)
    w_pad = w_pad.at[:, :, :cin, :cout].set(w)
    w_flat = w_pad.reshape(ntaps * cinp, coutp).astype(jnp.bfloat16)
    g_pad = jnp.zeros((coutp,), jnp.float32).at[:cout].set(gamma)
    b_pad = jnp.zeros((coutp,), jnp.float32).at[:cout].set(beta)

    grid = (n, n_tiles)
    flops = 2 * n * oh * ow * (ntaps * cinp) * coutp
    bytes_accessed = (xps.size * 2 + w_flat.size * 2
                      + n * oh * ow * coutp * 2 + n * n_tiles * 2 * coutp * 4)

    y, stats = pl.pallas_call(
        functools.partial(_conv_stats_kernel, taps=taps, num_row_tiles=n_tiles),
        out_shape=(
            jax.ShapeDtypeStruct((n, oh, ow, coutp), jnp.bfloat16),
            jax.ShapeDtypeStruct((n, n_tiles, 2, coutp), jnp.float32),
        ),
        grid_spec=pltpu.PrefetchScalarGridSpec(
            num_scalar_prefetch=0,
            grid=grid,
            in_specs=[
                # Padded image slab: resident across the row-tile axis (re-DMA'd
                # only when the image index changes).
                # TODO(synk): halo row-tile this slab ((th + (kh-1)//s) rows) to
                # shrink the VMEM footprint at 224x224-class images on v7x.
                pl.BlockSpec((1, xps.shape[1], ws, cinp), lambda i, j: (i, 0, 0, 0)),
                # Weights: resident across the whole grid.
                pl.BlockSpec((ntaps * cinp, coutp), lambda i, j: (0, 0)),
            ],
            out_specs=(
                pl.BlockSpec((1, th, ow, coutp), lambda i, j: (i, j, 0, 0)),
                pl.BlockSpec((1, 1, 2, coutp), lambda i, j: (i, j, 0, 0)),
            ),
        ),
        compiler_params=pltpu.CompilerParams(
            # batch axis "parallel" (v7x 2-TC sharding), row-tile axis "arbitrary"
            # so both cores never re-DMA the same per-image slab.
            dimension_semantics=("parallel", "arbitrary"),
            vmem_limit_bytes=VMEM_LIMIT_BYTES),
        cost_estimate=pl.CostEstimate(flops=flops, transcendentals=0,
                                      bytes_accessed=bytes_accessed),
    )(xps, w_flat)

    # ---- BN batch statistics -> folded per-channel scale/shift (tiny) --------
    # NOTE: E[x^2]-E[x]^2 combine in f32 (conv outputs are O(1), acceptable);
    # a mean-shifted / Welford combine would be the numerically robust fix.
    count = n * oh * ow           # padded channels contribute exact zeros
    mean = jnp.sum(stats[:, :, 0, :], axis=(0, 1)) / count
    ex2 = jnp.sum(stats[:, :, 1, :], axis=(0, 1)) / count
    var = jnp.maximum(ex2 - mean * mean, 0.0)
    scale_c = g_pad * lax.rsqrt(var + BN_EPS)
    shift_c = b_pad - mean * scale_c
    scale = scale_c.reshape(1, coutp)
    shift = shift_c.reshape(1, coutp)

    add_residual = residual is not None
    inputs = [y, scale, shift]
    in_specs = [
        pl.BlockSpec((1, th, ow, coutp), lambda i, j: (i, j, 0, 0)),
        pl.BlockSpec((1, coutp), lambda i, j: (0, 0)),
        pl.BlockSpec((1, coutp), lambda i, j: (0, 0)),
    ]
    if add_residual:
        inputs.append(residual)
        in_specs.append(pl.BlockSpec((1, th, ow, coutp), lambda i, j: (i, j, 0, 0)))

    out = pl.pallas_call(
        functools.partial(_bn_act_kernel, relu=relu, add_residual=add_residual),
        out_shape=jax.ShapeDtypeStruct((n, oh, ow, coutp), jnp.bfloat16),
        grid_spec=pltpu.PrefetchScalarGridSpec(
            num_scalar_prefetch=0,
            grid=grid,
            in_specs=in_specs,
            out_specs=pl.BlockSpec((1, th, ow, coutp), lambda i, j: (i, j, 0, 0)),
        ),
        compiler_params=pltpu.CompilerParams(
            dimension_semantics=("parallel", "arbitrary"),
            vmem_limit_bytes=VMEM_LIMIT_BYTES),
    )(*inputs)
    return out


# -------------------------------- ResBlock ------------------------------------
def init_resblock_params(key, in_channels, out_channels, k=3):
    ks = jax.random.split(key, 9)

    def conv_w(kk, cin, cout):
        fan_in = cin * k * k
        return jax.random.normal(kk, (k, k, cin, cout), jnp.float32) / jnp.sqrt(fan_in)

    def bn(kg, kb, c):
        return (1.0 + 0.1 * jax.random.normal(kg, (c,), jnp.float32),
                0.1 * jax.random.normal(kb, (c,), jnp.float32))

    g1, b1 = bn(ks[1], ks[2], out_channels)
    g2, b2 = bn(ks[4], ks[5], out_channels)
    gd, bd = bn(ks[7], ks[8], out_channels)
    return dict(w1=conv_w(ks[0], in_channels, out_channels), g1=g1, b1=b1,
                w2=conv_w(ks[3], out_channels, out_channels), g2=g2, b2=b2,
                wd=conv_w(ks[6], in_channels, out_channels), gd=gd, bd=bd)


def resblock_forward(x_nchw, params, *, stride=1, kernel_size=3, padding=1):
    cout = params["w1"].shape[3]
    x = jnp.transpose(x_nchw, (0, 2, 3, 1))               # NCHW -> NHWC
    cin = x.shape[-1]
    cinp = _round_up(cin, LANE)
    x_int = jnp.pad(x, ((0, 0), (0, 0), (0, 0), (0, cinp - cin))).astype(jnp.bfloat16)

    if stride != 1:
        # downsample: conv(k, stride=2, auto_pad -> pad=k//2) + BN + ReLU
        residual = conv_bn_act(x_int, params["wd"], params["gd"], params["bd"],
                               stride=2, padding=kernel_size // 2, relu=True)
    else:
        # identity residual (requires in_channels == out_channels, exactly as the
        # PyTorch module would for `out += residual` to be shape-valid).
        residual = x_int

    out = conv_bn_act(x_int, params["w1"], params["g1"], params["b1"],
                      stride=stride, padding=padding, relu=True)
    # layer2 (activation='none') fused with "out += residual" and the final ReLU.
    out = conv_bn_act(out, params["w2"], params["g2"], params["b2"],
                      stride=1, padding=padding, relu=True, residual=residual)

    out = out[..., :cout].astype(jnp.float32)
    return jnp.transpose(out, (0, 3, 1, 2))                # NHWC -> NCHW


# ----------------- precision-matched pure-JAX reference (check) ---------------
def _ref_conv_bn(x_bf, w, g, b, stride, padding, relu):
    y = lax.conv_general_dilated(
        x_bf, w.astype(jnp.bfloat16),
        window_strides=(stride, stride),
        padding=[(padding, padding), (padding, padding)],
        dimension_numbers=("NHWC", "HWIO", "NHWC"),
        preferred_element_type=jnp.float32)
    mean = jnp.mean(y, axis=(0, 1, 2), keepdims=True)
    var = jnp.mean(jnp.square(y - mean), axis=(0, 1, 2), keepdims=True)
    # precision-match the kernel: intermediate conv output is stored bf16,
    # BN statistics are taken from the f32 accumulator.
    y_bf = y.astype(jnp.bfloat16).astype(jnp.float32)
    scale = g * lax.rsqrt(var + BN_EPS)
    yb = y_bf * scale + (b - mean * scale)
    return jnp.maximum(yb, 0.0) if relu else yb


def ref_forward(x_nchw, params, *, stride=1, kernel_size=3, padding=1):
    xb = jnp.transpose(x_nchw, (0, 2, 3, 1)).astype(jnp.bfloat16)
    if stride != 1:
        r = _ref_conv_bn(xb, params["wd"], params["gd"], params["bd"],
                         2, kernel_size // 2, True).astype(jnp.bfloat16)
    else:
        r = xb
    o1 = _ref_conv_bn(xb, params["w1"], params["g1"], params["b1"],
                      stride, padding, True).astype(jnp.bfloat16)
    y2 = _ref_conv_bn(o1, params["w2"], params["g2"], params["b2"],
                      1, padding, False)
    out = jnp.maximum(y2 + r.astype(jnp.float32), 0.0)
    out = out.astype(jnp.bfloat16).astype(jnp.float32)
    return jnp.transpose(out, (0, 3, 1, 2))


if __name__ == "__main__":
    key = jax.random.PRNGKey(0)
    kx, kp1, kp2 = jax.random.split(key, 3)

    N, C, H, W = 2, 4, 16, 16
    x = jax.random.normal(kx, (N, C, H, W), jnp.float32)

    # --- stride=1, identity residual (in_channels == out_channels) -----------
    params1 = init_resblock_params(kp1, C, C)
    fwd1 = jax.jit(functools.partial(resblock_forward, stride=1))
    out1 = jax.block_until_ready(fwd1(x, params1))
    ref1 = ref_forward(x, params1, stride=1)
    assert out1.shape == (N, C, H, W), out1.shape
    assert jnp.allclose(out1, ref1, atol=2e-2, rtol=2e-2), \
        float(jnp.max(jnp.abs(out1 - ref1)))

    # --- stride=2, channel change, exercises the downsample conv path --------
    C2 = 8
    params2 = init_resblock_params(kp2, C, C2)
    fwd2 = jax.jit(functools.partial(resblock_forward, stride=2))
    out2 = jax.block_until_ready(fwd2(x, params2))
    ref2 = ref_forward(x, params2, stride=2)
    assert out2.shape == (N, C2, 8, 8), out2.shape
    assert jnp.allclose(out2, ref2, atol=2e-2, rtol=2e-2), \
        float(jnp.max(jnp.abs(out2 - ref2)))

    print("KERNEL_OK")
</pallas_src>

<mosaic_0001>
module attributes {stable_mosaic.version = 11 : i64} {
  func.func @_conv_stats_kernel(%arg0: i32, %arg1: i32, %arg2: memref<1x18x18x128xbf16, #tpu.memory_space<vmem>>, %arg3: memref<1152x128xbf16, #tpu.memory_space<vmem>>, %arg4: memref<1x16x16x128xbf16, #tpu.memory_space<vmem>>, %arg5: memref<1x1x2x128xf32, #tpu.memory_space<vmem>>) attributes {dimension_semantics = [#tpu.dimension_semantics<parallel>, #tpu.dimension_semantics<arbitrary>], iteration_bounds = array<i64: 2, 1>, scalar_prefetch = 0 : i64, scratch_operands = 0 : i64, tpu.core_type = #tpu.core_type<tc>, window_params = [{transform_indices = @transform_0, window_bounds = array<i64: 1, 18, 18, 128>}, {pipeline_mode = #tpu.pipeline_mode<synchronous>, transform_indices = @transform_1, window_bounds = array<i64: 1152, 128>}, {transform_indices = @transform_2, window_bounds = array<i64: 1, 16, 16, 128>}, {transform_indices = @transform_3, window_bounds = array<i64: 1, 1, 2, 128>}]} {
    %c0 = arith.constant 0 : index
    %c0_0 = arith.constant 0 : index
    %c0_1 = arith.constant 0 : index
    %c0_2 = arith.constant 0 : index
    %0 = vector.load %arg2[%c0, %c0_0, %c0_1, %c0_2] : memref<1x18x18x128xbf16, #tpu.memory_space<vmem>>, vector<1x16x16x128xbf16>
    %1 = vector.shape_cast %0 : vector<1x16x16x128xbf16> to vector<16x16x128xbf16>
    %2 = vector.shape_cast %1 : vector<16x16x128xbf16> to vector<256x128xbf16>
    %c0_3 = arith.constant 0 : index
    %c0_4 = arith.constant 0 : index
    %c1 = arith.constant 1 : index
    %c0_5 = arith.constant 0 : index
    %3 = vector.load %arg2[%c0_3, %c0_4, %c1, %c0_5] : memref<1x18x18x128xbf16, #tpu.memory_space<vmem>>, vector<1x16x16x128xbf16>
    %4 = vector.shape_cast %3 : vector<1x16x16x128xbf16> to vector<16x16x128xbf16>
    %5 = vector.shape_cast %4 : vector<16x16x128xbf16> to vector<256x128xbf16>
    %c0_6 = arith.constant 0 : index
    %c0_7 = arith.constant 0 : index
    %c2 = arith.constant 2 : index
    %c0_8 = arith.constant 0 : index
    %6 = vector.load %arg2[%c0_6, %c0_7, %c2, %c0_8] : memref<1x18x18x128xbf16, #tpu.memory_space<vmem>>, vector<1x16x16x128xbf16>
    %7 = vector.shape_cast %6 : vector<1x16x16x128xbf16> to vector<16x16x128xbf16>
    %8 = vector.shape_cast %7 : vector<16x16x128xbf16> to vector<256x128xbf16>
    %c0_9 = arith.constant 0 : index
    %c1_10 = arith.constant 1 : index
    %c0_11 = arith.constant 0 : index
    %c0_12 = arith.constant 0 : index
    %9 = vector.load %arg2[%c0_9, %c1_10, %c0_11, %c0_12] : memref<1x18x18x128xbf16, #tpu.memory_space<vmem>>, vector<1x16x16x128xbf16>
    %10 = vector.shape_cast %9 : vector<1x16x16x128xbf16> to vector<16x16x128xbf16>
    %11 = vector.shape_cast %10 : vector<16x16x128xbf16> to vector<256x128xbf16>
    %c0_13 = arith.constant 0 : index
    %c1_14 = arith.constant 1 : index
    %c1_15 = arith.constant 1 : index
    %c0_16 = arith.constant 0 : index
    %12 = vector.load %arg2[%c0_13, %c1_14, %c1_15, %c0_16] : memref<1x18x18x128xbf16, #tpu.memory_space<vmem>>, vector<1x16x16x128xbf16>
    %13 = vector.shape_cast %12 : vector<1x16x16x128xbf16> to vector<16x16x128xbf16>
    %14 = vector.shape_cast %13 : vector<16x16x128xbf16> to vector<256x128xbf16>
    %c0_17 = arith.constant 0 : index
    %c1_18 = arith.constant 1 : index
    %c2_19 = arith.constant 2 : index
    %c0_20 = arith.constant 0 : index
    %15 = vector.load %arg2[%c0_17, %c1_18, %c2_19, %c0_20] : memref<1x18x18x128xbf16, #tpu.memory_space<vmem>>, vector<1x16x16x128xbf16>
    %16 = vector.shape_cast %15 : vector<1x16x16x128xbf16> to vector<16x16x128xbf16>
    %17 = vector.shape_cast %16 : vector<16x16x128xbf16> to vector<256x128xbf16>
    %c0_21 = arith.constant 0 : index
    %c2_22 = arith.constant 2 : index
    %c0_23 = arith.constant 0 : index
    %c0_24 = arith.constant 0 : index
    %18 = vector.load %arg2[%c0_21, %c2_22, %c0_23, %c0_24] : memref<1x18x18x128xbf16, #tpu.memory_space<vmem>>, vector<1x16x16x128xbf16>
    %19 = vector.shape_cast %18 : vector<1x16x16x128xbf16> to vector<16x16x128xbf16>
    %20 = vector.shape_cast %19 : vector<16x16x128xbf16> to vector<256x128xbf16>
    %c0_25 = arith.constant 0 : index
    %c2_26 = arith.constant 2 : index
    %c1_27 = arith.constant 1 : index
    %c0_28 = arith.constant 0 : index
    %21 = vector.load %arg2[%c0_25, %c2_26, %c1_27, %c0_28] : memref<1x18x18x128xbf16, #tpu.memory_space<vmem>>, vector<1x16x16x128xbf16>
    %22 = vector.shape_cast %21 : vector<1x16x16x128xbf16> to vector<16x16x128xbf16>
    %23 = vector.shape_cast %22 : vector<16x16x128xbf16> to vector<256x128xbf16>
    %c0_29 = arith.constant 0 : index
    %c2_30 = arith.constant 2 : index
    %c2_31 = arith.constant 2 : index
    %c0_32 = arith.constant 0 : index
    %24 = vector.load %arg2[%c0_29, %c2_30, %c2_31, %c0_32] : memref<1x18x18x128xbf16, #tpu.memory_space<vmem>>, vector<1x16x16x128xbf16>
    %25 = vector.shape_cast %24 : vector<1x16x16x128xbf16> to vector<16x16x128xbf16>
    %26 = vector.shape_cast %25 : vector<16x16x128xbf16> to vector<256x128xbf16>
    %27 = tpu.concatenate %2, %5, %8, %11, %14, %17, %20, %23, %26 in 1 : vector<256x128xbf16>, vector<256x128xbf16>, vector<256x128xbf16>, vector<256x128xbf16>, vector<256x128xbf16>, vector<256x128xbf16>, vector<256x128xbf16>, vector<256x128xbf16>, vector<256x128xbf16> -> vector<256x1152xbf16>
    %c0_33 = arith.constant 0 : index
    %c0_34 = arith.constant 0 : index
    %28 = vector.load %arg3[%c0_33, %c0_34] : memref<1152x128xbf16, #tpu.memory_space<vmem>>, vector<1152x128xbf16>
    %cst = arith.constant dense<0.000000e+00> : vector<256x128xf32>
    %29 = tpu.matmul %27, %28, %cst {dimension_numbers = #tpu.dot_dimension_numbers<[1], [0], [0], [1], [0, 0, 1, 1], [], []>} : vector<256x1152xbf16>, vector<1152x128xbf16>, vector<256x128xf32> -> vector<256x128xf32>
    %30 = vector.shape_cast %29 : vector<256x128xf32> to vector<1x16x16x128xf32>
    %31 = arith.truncf %30 : vector<1x16x16x128xf32> to vector<1x16x16x128xbf16>
    %c0_35 = arith.constant 0 : index
    %c0_36 = arith.constant 0 : index
    %c0_37 = arith.constant 0 : index
    %c0_38 = arith.constant 0 : index
    %32 = vector.load %arg4[%c0_35, %c0_36, %c0_37, %c0_38] : memref<1x16x16x128xbf16, #tpu.memory_space<vmem>>, vector<1x16x16x128xbf16>
    tpu.vector_store %arg4[%c0_35, %c0_36, %c0_37, %c0_38], %31 {strides = array<i32>} : memref<1x16x16x128xbf16, #tpu.memory_space<vmem>>, vector<1x16x16x128xbf16>,
    %cst_39 = arith.constant dense<0.000000e+00> : vector<128xf32>
    %33 = vector.multi_reduction <add>, %29, %cst_39 [0] : vector<256x128xf32> to vector<128xf32>
    %34 = vector.shape_cast %33 : vector<128xf32> to vector<1x128xf32>
    %35 = arith.mulf %29, %29 : vector<256x128xf32>
    %cst_40 = arith.constant dense<0.000000e+00> : vector<128xf32>
    %36 = vector.multi_reduction <add>, %35, %cst_40 [0] : vector<256x128xf32> to vector<128xf32>
    %37 = vector.shape_cast %36 : vector<128xf32> to vector<1x128xf32>
    %38 = tpu.concatenate %34, %37 in 0 : vector<1x128xf32>, vector<1x128xf32> -> vector<2x128xf32>
    %39 = vector.shape_cast %38 : vector<2x128xf32> to vector<1x1x2x128xf32>
    %c0_41 = arith.constant 0 : index
    %c0_42 = arith.constant 0 : index
    %c0_43 = arith.constant 0 : index
    %c0_44 = arith.constant 0 : index
    %40 = vector.load %arg5[%c0_41, %c0_42, %c0_43, %c0_44] : memref<1x1x2x128xf32, #tpu.memory_space<vmem>>, vector<1x1x2x128xf32>
    tpu.vector_store %arg5[%c0_41, %c0_42, %c0_43, %c0_44], %39 {strides = array<i32>} : memref<1x1x2x128xf32, #tpu.memory_space<vmem>>, vector<1x1x2x128xf32>,
    return
  }
  func.func @transform_0(%arg0: i32, %arg1: i32) -> (i32, i32, i32, i32) {
    %c0_i32 = arith.constant 0 : i32
    %c0_i32_0 = arith.constant 0 : i32
    %c0_i32_1 = arith.constant 0 : i32
    %c0_i32_2 = arith.constant 0 : i32
    return %arg0, %c0_i32, %c0_i32_0, %c0_i32_1 : i32, i32, i32, i32
  }
  func.func @transform_1(%arg0: i32, %arg1: i32) -> (i32, i32) {
    %c0_i32 = arith.constant 0 : i32
    %c0_i32_0 = arith.constant 0 : i32
    %c0_i32_1 = arith.constant 0 : i32
    return %c0_i32, %c0_i32_0 : i32, i32
  }
  func.func @transform_2(%arg0: i32, %arg1: i32) -> (i32, i32, i32, i32) {
    %c0_i32 = arith.constant 0 : i32
    %c0_i32_0 = arith.constant 0 : i32
    %c0_i32_1 = arith.constant 0 : i32
    return %arg0, %arg1, %c0_i32, %c0_i32_0 : i32, i32, i32, i32
  }
  func.func @transform_3(%arg0: i32, %arg1: i32) -> (i32, i32, i32, i32) {
    %c0_i32 = arith.constant 0 : i32
    %c0_i32_0 = arith.constant 0 : i32
    %c0_i32_1 = arith.constant 0 : i32
    return %arg0, %arg1, %c0_i32, %c0_i32_0 : i32, i32, i32, i32
  }
}

module attributes {stable_mosaic.version = 11 : i64} {
  func.func @_bn_act_kernel(%arg0: i32, %arg1: i32, %arg2: memref<1x16x16x128xbf16, #tpu.memory_space<vmem>>, %arg3: memref<1x128xf32, #tpu.memory_space<vmem>>, %arg4: memref<1x128xf32, #tpu.memory_space<vmem>>, %arg5: memref<1x16x16x128xbf16, #tpu.memory_space<vmem>>) attributes {dimension_semantics = [#tpu.dimension_semantics<parallel>, #tpu.dimension_semantics<arbitrary>], iteration_bounds = array<i64: 2, 1>, scalar_prefetch = 0 : i64, scratch_operands = 0 : i64, tpu.core_type = #tpu.core_type<tc>, window_params = [{transform_indices = @transform_0, window_bounds = array<i64: 1, 16, 16, 128>}, {pipeline_mode = #tpu.pipeline_mode<synchronous>, transform_indices = @transform_1, window_bounds = array<i64: 1, 128>}, {pipeline_mode = #tpu.pipeline_mode<synchronous>, transform_indices = @transform_2, window_bounds = array<i64: 1, 128>}, {transform_indices = @transform_3, window_bounds = array<i64: 1, 16, 16, 128>}]} {
    %c0 = arith.constant 0 : index
    %c0_0 = arith.constant 0 : index
    %0 = vector.load %arg3[%c0, %c0_0] : memref<1x128xf32, #tpu.memory_space<vmem>>, vector<1x128xf32>
    %1 = vector.shape_cast %0 : vector<1x128xf32> to vector<1x1x1x128xf32>
    %c0_1 = arith.constant 0 : index
    %c0_2 = arith.constant 0 : index
    %2 = vector.load %arg4[%c0_1, %c0_2] : memref<1x128xf32, #tpu.memory_space<vmem>>, vector<1x128xf32>
    %3 = vector.shape_cast %2 : vector<1x128xf32> to vector<1x1x1x128xf32>
    %c0_3 = arith.constant 0 : index
    %c0_4 = arith.constant 0 : index
    %c0_5 = arith.constant 0 : index
    %c0_6 = arith.constant 0 : index
    %4 = vector.load %arg2[%c0_3, %c0_4, %c0_5, %c0_6] : memref<1x16x16x128xbf16, #tpu.memory_space<vmem>>, vector<1x16x16x128xbf16>
    %5 = arith.extf %4 : vector<1x16x16x128xbf16> to vector<1x16x16x128xf32>
    %6 = vector.broadcast %1 : vector<1x1x1x128xf32> to vector<1x16x16x128xf32>
    %7 = arith.mulf %5, %6 : vector<1x16x16x128xf32>
    %8 = vector.broadcast %3 : vector<1x1x1x128xf32> to vector<1x16x16x128xf32>
    %9 = arith.addf %7, %8 : vector<1x16x16x128xf32>
    %cst = arith.constant 0.000000e+00 : f32
    %10 = vector.broadcast %cst : f32 to vector<1x16x16x128xf32>
    %11 = arith.maximumf %9, %10 : vector<1x16x16x128xf32>
    %12 = arith.truncf %11 : vector<1x16x16x128xf32> to vector<1x16x16x128xbf16>
    %c0_7 = arith.constant 0 : index
    %c0_8 = arith.constant 0 : index
    %c0_9 = arith.constant 0 : index
    %c0_10 = arith.constant 0 : index
    %13 = vector.load %arg5[%c0_7, %c0_8, %c0_9, %c0_10] : memref<1x16x16x128xbf16, #tpu.memory_space<vmem>>, vector<1x16x16x128xbf16>
    tpu.vector_store %arg5[%c0_7, %c0_8, %c0_9, %c0_10], %12 {strides = array<i32>} : memref<1x16x16x128xbf16, #tpu.memory_space<vmem>>, vector<1x16x16x128xbf16>,
    return
  }
  func.func @transform_0(%arg0: i32, %arg1: i32) -> (i32, i32, i32, i32) {
    %c0_i32 = arith.constant 0 : i32
    %c0_i32_0 = arith.constant 0 : i32
    %c0_i32_1 = arith.constant 0 : i32
    return %arg0, %arg1, %c0_i32, %c0_i32_0 : i32, i32, i32, i32
  }
  func.func @transform_1(%arg0: i32, %arg1: i32) -> (i32, i32) {
    %c0_i32 = arith.constant 0 : i32
    %c0_i32_0 = arith.constant 0 : i32
    %c0_i32_1 = arith.constant 0 : i32
    return %c0_i32, %c0_i32_0 : i32, i32
  }
  func.func @transform_2(%arg0: i32, %arg1: i32) -> (i32, i32) {
    %c0_i32 = arith.constant 0 : i32
    %c0_i32_0 = arith.constant 0 : i32
    %c0_i32_1 = arith.constant 0 : i32
    return %c0_i32, %c0_i32_0 : i32, i32
  }
  func.func @transform_3(%arg0: i32, %arg1: i32) -> (i32, i32, i32, i32) {
    %c0_i32 = arith.constant 0 : i32
    %c0_i32_0 = arith.constant 0 : i32
    %c0_i32_1 = arith.constant 0 : i32
    return %arg0, %arg1, %c0_i32, %c0_i32_0 : i32, i32, i32, i32
  }
}

module attributes {stable_mosaic.version = 11 : i64} {
  func.func @_bn_act_kernel(%arg0: i32, %arg1: i32, %arg2: memref<1x16x16x128xbf16, #tpu.memory_space<vmem>>, %arg3: memref<1x128xf32, #tpu.memory_space<vmem>>, %arg4: memref<1x128xf32, #tpu.memory_space<vmem>>, %arg5: memref<1x16x16x128xbf16, #tpu.memory_space<vmem>>, %arg6: memref<1x16x16x128xbf16, #tpu.memory_space<vmem>>) attributes {dimension_semantics = [#tpu.dimension_semantics<parallel>, #tpu.dimension_semantics<arbitrary>], iteration_bounds = array<i64: 2, 1>, scalar_prefetch = 0 : i64, scratch_operands = 0 : i64, tpu.core_type = #tpu.core_type<tc>, window_params = [{transform_indices = @transform_0, window_bounds = array<i64: 1, 16, 16, 128>}, {pipeline_mode = #tpu.pipeline_mode<synchronous>, transform_indices = @transform_1, window_bounds = array<i64: 1, 128>}, {pipeline_mode = #tpu.pipeline_mode<synchronous>, transform_indices = @transform_2, window_bounds = array<i64: 1, 128>}, {transform_indices = @transform_3, window_bounds = array<i64: 1, 16, 16, 128>}, {transform_indices = @transform_4, window_bounds = array<i64: 1, 16, 16, 128>}]} {
    %c0 = arith.constant 0 : index
    %c0_0 = arith.constant 0 : index
    %0 = vector.load %arg3[%c0, %c0_0] : memref<1x128xf32, #tpu.memory_space<vmem>>, vector<1x128xf32>
    %1 = vector.shape_cast %0 : vector<1x128xf32> to vector<1x1x1x128xf32>
    %c0_1 = arith.constant 0 : index
    %c0_2 = arith.constant 0 : index
    %2 = vector.load %arg4[%c0_1, %c0_2] : memref<1x128xf32, #tpu.memory_space<vmem>>, vector<1x128xf32>
    %3 = vector.shape_cast %2 : vector<1x128xf32> to vector<1x1x1x128xf32>
    %c0_3 = arith.constant 0 : index
    %c0_4 = arith.constant 0 : index
    %c0_5 = arith.constant 0 : index
    %c0_6 = arith.constant 0 : index
    %4 = vector.load %arg2[%c0_3, %c0_4, %c0_5, %c0_6] : memref<1x16x16x128xbf16, #tpu.memory_space<vmem>>, vector<1x16x16x128xbf16>
    %5 = arith.extf %4 : vector<1x16x16x128xbf16> to vector<1x16x16x128xf32>
    %6 = vector.broadcast %1 : vector<1x1x1x128xf32> to vector<1x16x16x128xf32>
    %7 = arith.mulf %5, %6 : vector<1x16x16x128xf32>
    %8 = vector.broadcast %3 : vector<1x1x1x128xf32> to vector<1x16x16x128xf32>
    %9 = arith.addf %7, %8 : vector<1x16x16x128xf32>
    %c0_7 = arith.constant 0 : index
    %c0_8 = arith.constant 0 : index
    %c0_9 = arith.constant 0 : index
    %c0_10 = arith.constant 0 : index
    %10 = vector.load %arg5[%c0_7, %c0_8, %c0_9, %c0_10] : memref<1x16x16x128xbf16, #tpu.memory_space<vmem>>, vector<1x16x16x128xbf16>
    %11 = arith.extf %10 : vector<1x16x16x128xbf16> to vector<1x16x16x128xf32>
    %12 = arith.addf %9, %11 : vector<1x16x16x128xf32>
    %cst = arith.constant 0.000000e+00 : f32
    %13 = vector.broadcast %cst : f32 to vector<1x16x16x128xf32>
    %14 = arith.maximumf %12, %13 : vector<1x16x16x128xf32>
    %15 = arith.truncf %14 : vector<1x16x16x128xf32> to vector<1x16x16x128xbf16>
    %c0_11 = arith.constant 0 : index
    %c0_12 = arith.constant 0 : index
    %c0_13 = arith.constant 0 : index
    %c0_14 = arith.constant 0 : index
    %16 = vector.load %arg6[%c0_11, %c0_12, %c0_13, %c0_14] : memref<1x16x16x128xbf16, #tpu.memory_space<vmem>>, vector<1x16x16x128xbf16>
    tpu.vector_store %arg6[%c0_11, %c0_12, %c0_13, %c0_14], %15 {strides = array<i32>} : memref<1x16x16x128xbf16, #tpu.memory_space<vmem>>, vector<1x16x16x128xbf16>,
    return
  }
  func.func @transform_0(%arg0: i32, %arg1: i32) -> (i32, i32, i32, i32) {
    %c0_i32 = arith.constant 0 : i32
    %c0_i32_0 = arith.constant 0 : i32
    %c0_i32_1 = arith.constant 0 : i32
    return %arg0, %arg1, %c0_i32, %c0_i32_0 : i32, i32, i32, i32
  }
  func.func @transform_1(%arg0: i32, %arg1: i32) -> (i32, i32) {
    %c0_i32 = arith.constant 0 : i32
    %c0_i32_0 = arith.constant 0 : i32
    %c0_i32_1 = arith.constant 0 : i32
    return %c0_i32, %c0_i32_0 : i32, i32
  }
  func.func @transform_2(%arg0: i32, %arg1: i32) -> (i32, i32) {
    %c0_i32 = arith.constant 0 : i32
    %c0_i32_0 = arith.constant 0 : i32
    %c0_i32_1 = arith.constant 0 : i32
    return %c0_i32, %c0_i32_0 : i32, i32
  }
  func.func @transform_3(%arg0: i32, %arg1: i32) -> (i32, i32, i32, i32) {
    %c0_i32 = arith.constant 0 : i32
    %c0_i32_0 = arith.constant 0 : i32
    %c0_i32_1 = arith.constant 0 : i32
    return %arg0, %arg1, %c0_i32, %c0_i32_0 : i32, i32, i32, i32
  }
  func.func @transform_4(%arg0: i32, %arg1: i32) -> (i32, i32, i32, i32) {
    %c0_i32 = arith.constant 0 : i32
    %c0_i32_0 = arith.constant 0 : i32
    %c0_i32_1 = arith.constant 0 : i32
    return %arg0, %arg1, %c0_i32, %c0_i32_0 : i32, i32, i32, i32
  }
}

</mosaic_0001>

<bundles_post_ra>
// kernel: resblock_forward.7
= control target key start
LH: loop header
LB: loop body
LE: loop exit
PB: predicated region body
PF: predicated region fallthrough
CT: control target
= control target key end

     0   :  { %s1236_s15 = smov 0   ;;  %s1238_s16 = smov 0   ;;  %s1405_s0 = inlined_call_operand.vmem [shape: bf16[2,16,16,128], index: 0, kind: input, shape index: {}]   ;;  %s1406_s1 = inlined_call_operand.vmem [shape: f32[1,128], index: 1, kind: input, shape index: {}]   ;;  %s1407_s2 = inlined_call_operand.vmem [shape: f32[1,128], index: 2, kind: input, shape index: {}]   ;;  %s1408_s3 = inlined_call_operand.vmem [shape: bf16[2,16,16,128], index: 3, kind: input, shape index: {}]   ;;  %s1409_s4 = inlined_call_operand.vmem [shape: bf16[2,16,16,128], index: 4, kind: output, shape index: {}]  }
   0x1   :  { %s1240_s17 = smov 0  }
   0x2 LB: > { %s26_s18 = sadd.s32 1, %s1205_s16  ;;  %p832_p0 = scmp.ge.s32.totalorder %s1209_s17, 1  ;;  %s1209_s17 = sphi %s1240_s17, %s14_s17   ;;  %s1205_s16 = sphi %s1238_s16, %s1411_s16   ;;  %s1201_s15 = sphi %s1236_s15, %s1410_s15  }
   0x3   : > { %p28_p1 = scmp.ge.s32.totalorder %s26_s18, 2  ;;  %p202_p2 = scmp.lt.s32.totalorder %s1209_s17, 3 }
   0x5   : > { %s1413_s18 = smov (%p28_p1, %s26_s18), 0  ;;  %p203_p3 = pnand %p832_p0, %p202_p2 }
   0x6   : > { %p249_p4 = scmp.lt.s32.totalorder (!%p203_p3), %s1201_s15, 1 }
   0x7   : > { %206 = sbr.rel (%p203_p3) target bundleno = 75 (0x4b), region = 36 }
   0xc   : > { %s1415_s15 = smov (!%p249_p4, %s1201_s15), 1  ;;  %v1271_v0 = vld [vmem:[%s1406_s1] ss:$0 sm:$0xff] }
   0xd   : > { %s1254_s19 = sshll.u32 %s1415_s15, 7  ;;  %v1282_v11 = vld [vmem:[%s1407_s2] ss:$0 sm:$0xff] }
   0xe   : > { %s1260_s22 = scalar_lea.vmem %s1405_s0, %s1254_s19  ;;  %s1266_s25 = scalar_lea.vmem %s1408_s3, %s1254_s19 }
   0xf   : > { %v911_v1 = vld [vmem:[%s1260_s22] sm:$0xff]   ;;  %v1118_v3 = vld [vmem:[%s1260_s22 + $0x8] sm:$0xff]   ;;  %v1119_v9 = vld [vmem:[%s1260_s22 + $0x10] sm:$0xff]   ;;  %s1305_s6 = scalar_lea.vmem %s1409_s4, %s1254_s19 }
  0x10   : > { %v975_v2 = vld [vmem:[%s1266_s25] sm:$0xff]   ;;  %v912_v4 = vunpack.c.l.bf16 %v911_v1  ;;  %v913_v5 = vunpack.c.h.bf16 %v911_v1  ;;  %v1133_v8 = vld [vmem:[%s1266_s25 + $0x8] sm:$0xff]   ;;  %v1134_v10 = vld [vmem:[%s1266_s25 + $0x10] sm:$0xff]   ;;  %v916_v12 = vunpack.c.l.bf16 %v1118_v3  ;;  %v917_v13 = vunpack.c.h.bf16 %v1118_v3 }
  0x11   : > { %v976_v6 = vunpack.c.l.bf16 %v975_v2  ;;  %v977_v7 = vunpack.c.h.bf16 %v975_v2  ;;  %v980_v14 = vunpack.c.l.bf16 %v1133_v8  ;;  %v981_v15 = vunpack.c.h.bf16 %v1133_v8  ;;  %v1120_v20 = vld [vmem:[%s1260_s22 + $0x18] sm:$0xff]   ;;  %v1121_v46 = vld [vmem:[%s1260_s22 + $0x20] sm:$0xff]   ;;  %v1122_v56 = vld [vmem:[%s1260_s22 + $0x28] sm:$0xff]  }
  0x12   : > { %v353_v16 = vmul.f32 %v912_v4, %v1271_v0  ;;  %v354_v17 = vmul.f32 %v913_v5, %v1271_v0  ;;  %v920_v18 = vunpack.c.l.bf16 %v1119_v9  ;;  %v921_v19 = vunpack.c.h.bf16 %v1119_v9  ;;  %v1135_v41 = vld [vmem:[%s1266_s25 + $0x18] sm:$0xff]   ;;  %v1136_v51 = vld [vmem:[%s1266_s25 + $0x20] sm:$0xff]   ;;  %v1137_v61 = vld [vmem:[%s1266_s25 + $0x28] sm:$0xff]  }
  0x13   : > { %v355_v21 = vmul.f32 %v916_v12, %v1271_v0  ;;  %v356_v22 = vmul.f32 %v917_v13, %v1271_v0  ;;  %v984_v23 = vunpack.c.l.bf16 %v1134_v10  ;;  %v985_v24 = vunpack.c.h.bf16 %v1134_v10  ;;  %v1138_v8 = vld [vmem:[%s1266_s25 + $0x30] sm:$0xff]  }
  0x14   : > { %v391_v25 = vadd.f32 %v1282_v11, %v353_v16  ;;  %v392_v26 = vadd.f32 %v1282_v11, %v354_v17  ;;  %v357_v27 = vmul.f32 %v920_v18, %v1271_v0  ;;  %v358_v28 = vmul.f32 %v921_v19, %v1271_v0 }
  0x15   : > { %v393_v29 = vadd.f32 %v1282_v11, %v355_v21  ;;  %v394_v30 = vadd.f32 %v1282_v11, %v356_v22  ;;  %v924_v31 = vunpack.c.l.bf16 %v1120_v20  ;;  %v925_v32 = vunpack.c.h.bf16 %v1120_v20  ;;  %v1124_v22 = vld [vmem:[%s1260_s22 + $0x38] sm:$0xff]  }
  0x16   : > { %v487_v33 = vadd.f32 %v976_v6, %v391_v25  ;;  %v488_v34 = vadd.f32 %v977_v7, %v392_v26  ;;  %v395_v35 = vadd.f32 %v1282_v11, %v357_v27  ;;  %v396_v36 = vadd.f32 %v1282_v11, %v358_v28  ;;  %v1123_v7 = vld [vmem:[%s1260_s22 + $0x30] sm:$0xff]  }
  0x17   : > { %v489_v37 = vadd.f32 %v980_v14, %v393_v29  ;;  %v490_v38 = vadd.f32 %v981_v15, %v394_v30  ;;  %v359_v39 = vmul.f32 %v924_v31, %v1271_v0  ;;  %v360_v40 = vmul.f32 %v925_v32, %v1271_v0  ;;  %v1139_v31 = vld [vmem:[%s1266_s25 + $0x38] sm:$0xff]  }
  0x18   : > { %v519_v42 = vmax.f32 %v487_v33, 0.0  ;;  %v520_v43 = vmax.f32 %v488_v34, 0.0  ;;  %v491_v44 = vadd.f32 %v984_v23, %v395_v35  ;;  %v492_v45 = vadd.f32 %v985_v24, %v396_v36 }
  0x19   : > { %v521_v47 = vmax.f32 %v489_v37, 0.0  ;;  %v522_v48 = vmax.f32 %v490_v38, 0.0  ;;  %v397_v49 = vadd.f32 %v1282_v11, %v359_v39  ;;  %v398_v50 = vadd.f32 %v1282_v11, %v360_v40  ;;  %v1125_v40 = vld [vmem:[%s1260_s22 + $0x40] sm:$0xff]  }
  0x1a   : > { %v1041_v52 = vpack.c.bf16 %v520_v43, %v519_v42  ;;  %v523_v53 = vmax.f32 %v491_v44, 0.0  ;;  %v524_v54 = vmax.f32 %v492_v45, 0.0  ;;  %v988_v55 = vunpack.c.l.bf16 %v1135_v41 }
  0x1b   : > { %v1046_v57 = vpack.c.bf16 %v522_v48, %v521_v47  ;;  %v989_v58 = vunpack.c.h.bf16 %v1135_v41  ;;  %v928_v59 = vunpack.c.l.bf16 %v1121_v46  ;;  %v929_v60 = vunpack.c.h.bf16 %v1121_v46 }
  0x1c   : > { %1042 = vst [vmem:[%s1305_s6] sm:$0xff] %v1041_v52   ;;  %v1051_v62 = vpack.c.bf16 %v524_v54, %v523_v53  ;;  %v493_v63 = vadd.f32 %v988_v55, %v397_v49  ;;  %v992_v1 = vunpack.c.l.bf16 %v1136_v51  ;;  %v993_v2 = vunpack.c.h.bf16 %v1136_v51  ;;  %v1140_v49 = vld [vmem:[%s1266_s25 + $0x40] sm:$0xff]   ;;  %v1126_v54 = vld [vmem:[%s1260_s22 + $0x48] sm:$0xff]  }
  0x1d   : > { %1148 = vst [vmem:[%s1305_s6 + $0x8] sm:$0xff] %v1046_v57   ;;  %v494_v3 = vadd.f32 %v989_v58, %v398_v50  ;;  %v361_v4 = vmul.f32 %v928_v59, %v1271_v0  ;;  %v362_v5 = vmul.f32 %v929_v60, %v1271_v0  ;;  %v932_v6 = vunpack.c.l.bf16 %v1122_v56 }
  0x1e   : > { %1149 = vst [vmem:[%s1305_s6 + $0x10] sm:$0xff] %v1051_v62   ;;  %v525_v9 = vmax.f32 %v493_v63, 0.0  ;;  %v933_v10 = vunpack.c.h.bf16 %v1122_v56  ;;  %v996_v12 = vunpack.c.l.bf16 %v1137_v61  ;;  %v997_v13 = vunpack.c.h.bf16 %v1137_v61  ;;  %v1141_v63 = vld [vmem:[%s1266_s25 + $0x48] sm:$0xff]  }
  0x1f   : > { %v526_v14 = vmax.f32 %v494_v3, 0.0  ;;  %v399_v15 = vadd.f32 %v1282_v11, %v361_v4  ;;  %v400_v16 = vadd.f32 %v1282_v11, %v362_v5  ;;  %v363_v17 = vmul.f32 %v932_v6, %v1271_v0  ;;  %v1127_v5 = vld [vmem:[%s1260_s22 + $0x50] sm:$0xff]  }
  0x20   : > { %v364_v18 = vmul.f32 %v933_v10, %v1271_v0  ;;  %v936_v19 = vunpack.c.l.bf16 %v1123_v7  ;;  %v937_v20 = vunpack.c.h.bf16 %v1123_v7  ;;  %v1000_v21 = vunpack.c.l.bf16 %v1138_v8  ;;  %v1142_v10 = vld [vmem:[%s1266_s25 + $0x50] sm:$0xff]  }
  0x21   : > { %v1056_v23 = vpack.c.bf16 %v526_v14, %v525_v9  ;;  %v495_v24 = vadd.f32 %v992_v1, %v399_v15  ;;  %v496_v25 = vadd.f32 %v993_v2, %v400_v16  ;;  %v401_v26 = vadd.f32 %v1282_v11, %v363_v17 }
  0x22   : > { %v402_v27 = vadd.f32 %v1282_v11, %v364_v18  ;;  %v365_v28 = vmul.f32 %v936_v19, %v1271_v0  ;;  %v366_v29 = vmul.f32 %v937_v20, %v1271_v0  ;;  %v1001_v30 = vunpack.c.h.bf16 %v1138_v8  ;;  %v1128_v20 = vld [vmem:[%s1260_s22 + $0x58] sm:$0xff]  }
  0x23   : > { %1150 = vst [vmem:[%s1305_s6 + $0x18] sm:$0xff] %v1056_v23   ;;  %v527_v32 = vmax.f32 %v495_v24, 0.0  ;;  %v528_v33 = vmax.f32 %v496_v25, 0.0  ;;  %v497_v34 = vadd.f32 %v996_v12, %v401_v26  ;;  %v940_v35 = vunpack.c.l.bf16 %v1124_v22 }
  0x24   : > { %v498_v36 = vadd.f32 %v997_v13, %v402_v27  ;;  %v403_v37 = vadd.f32 %v1282_v11, %v365_v28  ;;  %v404_v38 = vadd.f32 %v1282_v11, %v366_v29  ;;  %v941_v39 = vunpack.c.h.bf16 %v1124_v22  ;;  %v1143_v29 = vld [vmem:[%s1266_s25 + $0x58] sm:$0xff]  }
  0x25   : > { %v1061_v41 = vpack.c.bf16 %v528_v33, %v527_v32  ;;  %v529_v42 = vmax.f32 %v497_v34, 0.0  ;;  %v367_v43 = vmul.f32 %v940_v35, %v1271_v0  ;;  %v1004_v44 = vunpack.c.l.bf16 %v1139_v31 }
  0x26   : > { %v530_v45 = vmax.f32 %v498_v36, 0.0  ;;  %v499_v46 = vadd.f32 %v1000_v21, %v403_v37  ;;  %v500_v47 = vadd.f32 %v1001_v30, %v404_v38  ;;  %v368_v48 = vmul.f32 %v941_v39, %v1271_v0  ;;  %v1129_v38 = vld [vmem:[%s1260_s22 + $0x60] sm:$0xff]  }
  0x27   : > { %1151 = vst [vmem:[%s1305_s6 + $0x20] sm:$0xff] %v1061_v41   ;;  %v405_v50 = vadd.f32 %v1282_v11, %v367_v43  ;;  %v1005_v51 = vunpack.c.h.bf16 %v1139_v31  ;;  %v944_v52 = vunpack.c.l.bf16 %v1125_v40  ;;  %v945_v53 = vunpack.c.h.bf16 %v1125_v40  ;;  %v1144_v43 = vld [vmem:[%s1266_s25 + $0x60] sm:$0xff]  }
  0x28   : > { %v1066_v55 = vpack.c.bf16 %v530_v45, %v529_v42  ;;  %v531_v56 = vmax.f32 %v499_v46, 0.0  ;;  %v532_v57 = vmax.f32 %v500_v47, 0.0  ;;  %v406_v58 = vadd.f32 %v1282_v11, %v368_v48 }
  0x29   : > { %v501_v59 = vadd.f32 %v1004_v44, %v405_v50  ;;  %v369_v60 = vmul.f32 %v944_v52, %v1271_v0  ;;  %v370_v61 = vmul.f32 %v945_v53, %v1271_v0  ;;  %v1008_v62 = vunpack.c.l.bf16 %v1140_v49  ;;  %v1130_v52 = vld [vmem:[%s1260_s22 + $0x68] sm:$0xff]  }
  0x2a   : > { %1152 = vst [vmem:[%s1305_s6 + $0x28] sm:$0xff] %v1066_v55   ;;  %v1071_v1 = vpack.c.bf16 %v532_v57, %v531_v56  ;;  %v502_v2 = vadd.f32 %v1005_v51, %v406_v58  ;;  %v1009_v3 = vunpack.c.h.bf16 %v1140_v49  ;;  %v948_v4 = vunpack.c.l.bf16 %v1126_v54 }
  0x2b   : > { %v533_v6 = vmax.f32 %v501_v59, 0.0  ;;  %v407_v7 = vadd.f32 %v1282_v11, %v369_v60  ;;  %v408_v8 = vadd.f32 %v1282_v11, %v370_v61  ;;  %v949_v9 = vunpack.c.h.bf16 %v1126_v54  ;;  %v1145_v61 = vld [vmem:[%s1266_s25 + $0x68] sm:$0xff]  }
  0x2c   : > { %1153 = vst [vmem:[%s1305_s6 + $0x30] sm:$0xff] %v1071_v1   ;;  %v534_v12 = vmax.f32 %v502_v2, 0.0  ;;  %v371_v13 = vmul.f32 %v948_v4, %v1271_v0  ;;  %v1012_v14 = vunpack.c.l.bf16 %v1141_v63  ;;  %v1013_v15 = vunpack.c.h.bf16 %v1141_v63 }
  0x2d   : > { %v503_v16 = vadd.f32 %v1008_v62, %v407_v7  ;;  %v504_v17 = vadd.f32 %v1009_v3, %v408_v8  ;;  %v372_v18 = vmul.f32 %v949_v9, %v1271_v0  ;;  %v952_v19 = vunpack.c.l.bf16 %v1127_v5  ;;  %v1131_v3 = vld [vmem:[%s1260_s22 + $0x70] sm:$0xff]  }
  0x2e   : > { %v1076_v21 = vpack.c.bf16 %v534_v12, %v533_v6  ;;  %v409_v22 = vadd.f32 %v1282_v11, %v371_v13  ;;  %v953_v23 = vunpack.c.h.bf16 %v1127_v5  ;;  %v1016_v24 = vunpack.c.l.bf16 %v1142_v10  ;;  %v1146_v13 = vld [vmem:[%s1266_s25 + $0x70] sm:$0xff]  }
  0x2f   : > { %v535_v25 = vmax.f32 %v503_v16, 0.0  ;;  %v536_v26 = vmax.f32 %v504_v17, 0.0  ;;  %v410_v27 = vadd.f32 %v1282_v11, %v372_v18  ;;  %v373_v28 = vmul.f32 %v952_v19, %v1271_v0 }
  0x30   : > { %1154 = vst [vmem:[%s1305_s6 + $0x38] sm:$0xff] %v1076_v21   ;;  %v505_v30 = vadd.f32 %v1012_v14, %v409_v22  ;;  %v374_v31 = vmul.f32 %v953_v23, %v1271_v0  ;;  %v1017_v32 = vunpack.c.h.bf16 %v1142_v10  ;;  %v956_v33 = vunpack.c.l.bf16 %v1128_v20  ;;  %v1132_v22 = vld [vmem:[%s1260_s22 + $0x78] sm:$0xff]  }
  0x31   : > { %v1081_v34 = vpack.c.bf16 %v536_v26, %v535_v25  ;;  %v506_v35 = vadd.f32 %v1013_v15, %v410_v27  ;;  %v411_v36 = vadd.f32 %v1282_v11, %v373_v28  ;;  %v957_v37 = vunpack.c.h.bf16 %v1128_v20  ;;  %v1147_v27 = vld [vmem:[%s1266_s25 + $0x78] sm:$0xff]  }
  0x32   : > { %v537_v39 = vmax.f32 %v505_v30, 0.0  ;;  %v412_v40 = vadd.f32 %v1282_v11, %v374_v31  ;;  %v375_v41 = vmul.f32 %v956_v33, %v1271_v0  ;;  %v1020_v42 = vunpack.c.l.bf16 %v1143_v29 }
  0x33   : > { %1155 = vst [vmem:[%s1305_s6 + $0x40] sm:$0xff] %v1081_v34   ;;  %v538_v44 = vmax.f32 %v506_v35, 0.0  ;;  %v507_v45 = vadd.f32 %v1016_v24, %v411_v36  ;;  %v376_v46 = vmul.f32 %v957_v37, %v1271_v0  ;;  %v1021_v47 = vunpack.c.h.bf16 %v1143_v29 }
  0x34   : > { %v508_v48 = vadd.f32 %v1017_v32, %v412_v40  ;;  %v413_v49 = vadd.f32 %v1282_v11, %v375_v41  ;;  %v960_v50 = vunpack.c.l.bf16 %v1129_v38  ;;  %v961_v51 = vunpack.c.h.bf16 %v1129_v38 }
  0x35   : > { %v1086_v53 = vpack.c.bf16 %v538_v44, %v537_v39  ;;  %v539_v54 = vmax.f32 %v507_v45, 0.0  ;;  %v414_v55 = vadd.f32 %v1282_v11, %v376_v46  ;;  %v1024_v56 = vunpack.c.l.bf16 %v1144_v43 }
  0x36   : > { %v540_v57 = vmax.f32 %v508_v48, 0.0  ;;  %v509_v58 = vadd.f32 %v1020_v42, %v413_v49  ;;  %v377_v59 = vmul.f32 %v960_v50, %v1271_v0  ;;  %v378_v60 = vmul.f32 %v961_v51, %v1271_v0 }
  0x37   : > { %1156 = vst [vmem:[%s1305_s6 + $0x48] sm:$0xff] %v1086_v53   ;;  %v510_v62 = vadd.f32 %v1021_v47, %v414_v55  ;;  %v1025_v63 = vunpack.c.h.bf16 %v1144_v43  ;;  %v964_v1 = vunpack.c.l.bf16 %v1130_v52  ;;  %v965_v2 = vunpack.c.h.bf16 %v1130_v52 }
  0x38   : > { %v1091_v4 = vpack.c.bf16 %v540_v57, %v539_v54  ;;  %v541_v5 = vmax.f32 %v509_v58, 0.0  ;;  %v415_v6 = vadd.f32 %v1282_v11, %v377_v59  ;;  %v416_v7 = vadd.f32 %v1282_v11, %v378_v60 }
  0x39   : > { %v542_v8 = vmax.f32 %v510_v62, 0.0  ;;  %v379_v9 = vmul.f32 %v964_v1, %v1271_v0  ;;  %v380_v10 = vmul.f32 %v965_v2, %v1271_v0  ;;  %v1028_v12 = vunpack.c.l.bf16 %v1145_v61 }
  0x3a   : > { %1157 = vst [vmem:[%s1305_s6 + $0x50] sm:$0xff] %v1091_v4   ;;  %v511_v14 = vadd.f32 %v1024_v56, %v415_v6  ;;  %v512_v15 = vadd.f32 %v1025_v63, %v416_v7  ;;  %v1029_v16 = vunpack.c.h.bf16 %v1145_v61  ;;  %v968_v17 = vunpack.c.l.bf16 %v1131_v3 }
  0x3b   : > { %v1096_v18 = vpack.c.bf16 %v542_v8, %v541_v5  ;;  %v417_v19 = vadd.f32 %v1282_v11, %v379_v9  ;;  %v418_v20 = vadd.f32 %v1282_v11, %v380_v10  ;;  %v969_v21 = vunpack.c.h.bf16 %v1131_v3 }
  0x3c   : > { %v543_v23 = vmax.f32 %v511_v14, 0.0  ;;  %v544_v24 = vmax.f32 %v512_v15, 0.0  ;;  %v381_v25 = vmul.f32 %v968_v17, %v1271_v0  ;;  %v1032_v26 = vunpack.c.l.bf16 %v1146_v13 }
  0x3d   : > { %1158 = vst [vmem:[%s1305_s6 + $0x58] sm:$0xff] %v1096_v18   ;;  %v513_v28 = vadd.f32 %v1028_v12, %v417_v19  ;;  %v514_v29 = vadd.f32 %v1029_v16, %v418_v20  ;;  %v382_v30 = vmul.f32 %v969_v21, %v1271_v0  ;;  %v1033_v31 = vunpack.c.h.bf16 %v1146_v13 }
  0x3e   : > { %v1101_v32 = vpack.c.bf16 %v544_v24, %v543_v23  ;;  %v419_v33 = vadd.f32 %v1282_v11, %v381_v25  ;;  %v972_v34 = vunpack.c.l.bf16 %v1132_v22  ;;  %v973_v35 = vunpack.c.h.bf16 %v1132_v22 }
  0x3f   : > { %v545_v36 = vmax.f32 %v513_v28, 0.0  ;;  %v546_v37 = vmax.f32 %v514_v29, 0.0  ;;  %v420_v38 = vadd.f32 %v1282_v11, %v382_v30  ;;  %v1036_v39 = vunpack.c.l.bf16 %v1147_v27 }
  0x40   : > { %1159 = vst [vmem:[%s1305_s6 + $0x60] sm:$0xff] %v1101_v32   ;;  %v515_v40 = vadd.f32 %v1032_v26, %v419_v33  ;;  %v383_v41 = vmul.f32 %v972_v34, %v1271_v0  ;;  %v384_v42 = vmul.f32 %v973_v35, %v1271_v0  ;;  %v1037_v43 = vunpack.c.h.bf16 %v1147_v27 }
  0x41   : > { %v1106_v44 = vpack.c.bf16 %v546_v37, %v545_v36  ;;  %v516_v45 = vadd.f32 %v1033_v31, %v420_v38 }
  0x42   : > { %v547_v46 = vmax.f32 %v515_v40, 0.0  ;;  %v421_v47 = vadd.f32 %v1282_v11, %v383_v41  ;;  %v422_v48 = vadd.f32 %v1282_v11, %v384_v42 }
  0x43   : > { %1160 = vst [vmem:[%s1305_s6 + $0x68] sm:$0xff] %v1106_v44   ;;  %v548_v49 = vmax.f32 %v516_v45, 0.0 }
  0x44   : > { %v517_v50 = vadd.f32 %v1036_v39, %v421_v47  ;;  %v518_v51 = vadd.f32 %v1037_v43, %v422_v48 }
  0x45   : > { %v1111_v52 = vpack.c.bf16 %v548_v49, %v547_v46 }
  0x46   : > { %v549_v53 = vmax.f32 %v517_v50, 0.0  ;;  %v550_v54 = vmax.f32 %v518_v51, 0.0 }
  0x47   : > { %1161 = vst [vmem:[%s1305_s6 + $0x70] sm:$0xff] %v1111_v52  }
  0x48   : > { %v1116_v55 = vpack.c.bf16 %v550_v54, %v549_v53 }
  0x4a   : > { %1162 = vst [vmem:[%s1305_s6 + $0x78] sm:$0xff] %v1116_v55  }
  0x4b PF: > { %s14_s17 = sadd.s32 1, %s1209_s17   ;;  %s1410_s15 = smov %s1205_s16 }
  0x4c   : > { %p11_p5 = scmp.ge.s32.totalorder %s14_s17, 4   ;;  %s1411_s16 = smov %s1413_s18 }
  0x4e   :  { %13 = sbr.rel (!%p11_p5) target bundleno = 2 (0x2), region = 69 }

// kernel: resblock_forward.5
= control target key start
LH: loop header
LB: loop body
LE: loop exit
PB: predicated region body
PF: predicated region fallthrough
CT: control target
= control target key end

     0   :  { %s966_s12 = smov 0   ;;  %s968_s13 = smov 0   ;;  %s1116_s0 = inlined_call_operand.vmem [shape: bf16[2,16,16,128], index: 0, kind: input, shape index: {}]   ;;  %s1117_s1 = inlined_call_operand.vmem [shape: f32[1,128], index: 1, kind: input, shape index: {}]   ;;  %s1118_s2 = inlined_call_operand.vmem [shape: f32[1,128], index: 2, kind: input, shape index: {}]   ;;  %s1119_s3 = inlined_call_operand.vmem [shape: bf16[2,16,16,128], index: 3, kind: output, shape index: {}]  }
   0x1   :  { %s970_s14 = smov 0  }
   0x2 LB: > { %s25_s15 = sadd.s32 1, %s940_s13  ;;  %p649_p0 = scmp.ge.s32.totalorder %s944_s14, 1  ;;  %s944_s14 = sphi %s970_s14, %s13_s14   ;;  %s940_s13 = sphi %s968_s13, %s1121_s13   ;;  %s936_s12 = sphi %s966_s12, %s1120_s12  }
   0x3   : > { %p27_p1 = scmp.ge.s32.totalorder %s25_s15, 2  ;;  %p159_p2 = scmp.lt.s32.totalorder %s944_s14, 3 }
   0x5   : > { %s1123_s15 = smov (%p27_p1, %s25_s15), 0  ;;  %p160_p3 = pnand %p649_p0, %p159_p2 }
   0x6   : > { %p194_p4 = scmp.lt.s32.totalorder (!%p160_p3), %s936_s12, 1 }
   0x7   : > { %163 = sbr.rel (%p160_p3) target bundleno = 58 (0x3a), region = 32 }
   0xc   : > { %s1125_s12 = smov (!%p194_p4, %s936_s12), 1  ;;  %v997_v0 = vld [vmem:[%s1117_s1] ss:$0 sm:$0xff] }
   0xd   : > { %s690_s16 = sshll.u32 %s1125_s12, 7  ;;  %v1006_v9 = vld [vmem:[%s1118_s2] ss:$0 sm:$0xff] }
   0xe   : > { %s992_s19 = scalar_lea.vmem %s1116_s0, %s690_s16  ;;  %s1031_s26 = scalar_lea.vmem %s1119_s3, %s690_s16 }
   0xf   : > { %v725_v1 = vld [vmem:[%s992_s19] sm:$0xff]   ;;  %v868_v2 = vld [vmem:[%s992_s19 + $0x8] sm:$0xff]   ;;  %v869_v3 = vld [vmem:[%s992_s19 + $0x10] sm:$0xff]  }
  0x10   : > { %v726_v4 = vunpack.c.l.bf16 %v725_v1  ;;  %v727_v5 = vunpack.c.h.bf16 %v725_v1  ;;  %v730_v6 = vunpack.c.l.bf16 %v868_v2  ;;  %v731_v7 = vunpack.c.h.bf16 %v868_v2  ;;  %v870_v8 = vld [vmem:[%s992_s19 + $0x18] sm:$0xff]   ;;  %v871_v30 = vld [vmem:[%s992_s19 + $0x20] sm:$0xff]   ;;  %v872_v35 = vld [vmem:[%s992_s19 + $0x28] sm:$0xff]  }
  0x11   : > { %v734_v10 = vunpack.c.l.bf16 %v869_v3  ;;  %v735_v11 = vunpack.c.h.bf16 %v869_v3  ;;  %v738_v12 = vunpack.c.l.bf16 %v870_v8  ;;  %v739_v13 = vunpack.c.h.bf16 %v870_v8  ;;  %v873_v40 = vld [vmem:[%s992_s19 + $0x30] sm:$0xff]   ;;  %v874_v45 = vld [vmem:[%s992_s19 + $0x38] sm:$0xff]   ;;  %v875_v3 = vld [vmem:[%s992_s19 + $0x40] sm:$0xff]  }
  0x12   : > { %v287_v14 = vmul.f32 %v726_v4, %v997_v0  ;;  %v288_v15 = vmul.f32 %v727_v5, %v997_v0  ;;  %v289_v16 = vmul.f32 %v730_v6, %v997_v0  ;;  %v290_v17 = vmul.f32 %v731_v7, %v997_v0 }
  0x13   : > { %v291_v18 = vmul.f32 %v734_v10, %v997_v0  ;;  %v292_v19 = vmul.f32 %v735_v11, %v997_v0  ;;  %v293_v20 = vmul.f32 %v738_v12, %v997_v0  ;;  %v294_v21 = vmul.f32 %v739_v13, %v997_v0  ;;  %v876_v13 = vld [vmem:[%s992_s19 + $0x48] sm:$0xff]  }
  0x14   : > { %v325_v22 = vadd.f32 %v1006_v9, %v287_v14  ;;  %v326_v23 = vadd.f32 %v1006_v9, %v288_v15  ;;  %v327_v24 = vadd.f32 %v1006_v9, %v289_v16  ;;  %v328_v25 = vadd.f32 %v1006_v9, %v290_v17 }
  0x15   : > { %v329_v26 = vadd.f32 %v1006_v9, %v291_v18  ;;  %v330_v27 = vadd.f32 %v1006_v9, %v292_v19  ;;  %v331_v28 = vadd.f32 %v1006_v9, %v293_v20  ;;  %v332_v29 = vadd.f32 %v1006_v9, %v294_v21  ;;  %v877_v18 = vld [vmem:[%s992_s19 + $0x50] sm:$0xff]  }
  0x16   : > { %v357_v31 = vmax.f32 %v325_v22, 0.0  ;;  %v358_v32 = vmax.f32 %v326_v23, 0.0  ;;  %v359_v33 = vmax.f32 %v327_v24, 0.0  ;;  %v360_v34 = vmax.f32 %v328_v25, 0.0  ;;  %v878_v23 = vld [vmem:[%s992_s19 + $0x58] sm:$0xff]  }
  0x17   : > { %v361_v36 = vmax.f32 %v329_v26, 0.0  ;;  %v362_v37 = vmax.f32 %v330_v27, 0.0  ;;  %v363_v38 = vmax.f32 %v331_v28, 0.0  ;;  %v364_v39 = vmax.f32 %v332_v29, 0.0 }
  0x18   : > { %v791_v41 = vpack.c.bf16 %v358_v32, %v357_v31  ;;  %v796_v42 = vpack.c.bf16 %v360_v34, %v359_v33  ;;  %v742_v43 = vunpack.c.l.bf16 %v871_v30  ;;  %v743_v44 = vunpack.c.h.bf16 %v871_v30 }
  0x19   : > { %v801_v46 = vpack.c.bf16 %v362_v37, %v361_v36  ;;  %v806_v47 = vpack.c.bf16 %v364_v39, %v363_v38  ;;  %v746_v48 = vunpack.c.l.bf16 %v872_v35  ;;  %v747_v49 = vunpack.c.h.bf16 %v872_v35 }
  0x1a   : > { %792 = vst [vmem:[%s1031_s26] sm:$0xff] %v791_v41   ;;  %883 = vst [vmem:[%s1031_s26 + $0x8] sm:$0xff] %v796_v42   ;;  %v295_v50 = vmul.f32 %v742_v43, %v997_v0  ;;  %v296_v51 = vmul.f32 %v743_v44, %v997_v0  ;;  %v750_v52 = vunpack.c.l.bf16 %v873_v40  ;;  %v751_v53 = vunpack.c.h.bf16 %v873_v40  ;;  %v879_v40 = vld [vmem:[%s992_s19 + $0x60] sm:$0xff]  }
  0x1b   : > { %884 = vst [vmem:[%s1031_s26 + $0x10] sm:$0xff] %v801_v46   ;;  %885 = vst [vmem:[%s1031_s26 + $0x18] sm:$0xff] %v806_v47   ;;  %v297_v54 = vmul.f32 %v746_v48, %v997_v0  ;;  %v298_v55 = vmul.f32 %v747_v49, %v997_v0  ;;  %v754_v56 = vunpack.c.l.bf16 %v874_v45  ;;  %v755_v57 = vunpack.c.h.bf16 %v874_v45 }
  0x1c   : > { %v333_v58 = vadd.f32 %v1006_v9, %v295_v50  ;;  %v334_v59 = vadd.f32 %v1006_v9, %v296_v51  ;;  %v299_v60 = vmul.f32 %v750_v52, %v997_v0  ;;  %v300_v61 = vmul.f32 %v751_v53, %v997_v0  ;;  %v880_v53 = vld [vmem:[%s992_s19 + $0x68] sm:$0xff]  }
  0x1d   : > { %v335_v62 = vadd.f32 %v1006_v9, %v297_v54  ;;  %v336_v63 = vadd.f32 %v1006_v9, %v298_v55  ;;  %v301_v1 = vmul.f32 %v754_v56, %v997_v0  ;;  %v302_v2 = vmul.f32 %v755_v57, %v997_v0 }
  0x1e   : > { %v365_v4 = vmax.f32 %v333_v58, 0.0  ;;  %v366_v5 = vmax.f32 %v334_v59, 0.0  ;;  %v337_v6 = vadd.f32 %v1006_v9, %v299_v60  ;;  %v338_v7 = vadd.f32 %v1006_v9, %v300_v61  ;;  %v881_v58 = vld [vmem:[%s992_s19 + $0x70] sm:$0xff]  }
  0x1f   : > { %v367_v8 = vmax.f32 %v335_v62, 0.0  ;;  %v368_v10 = vmax.f32 %v336_v63, 0.0  ;;  %v339_v11 = vadd.f32 %v1006_v9, %v301_v1  ;;  %v340_v12 = vadd.f32 %v1006_v9, %v302_v2  ;;  %v882_v63 = vld [vmem:[%s992_s19 + $0x78] sm:$0xff]  }
  0x20   : > { %v811_v14 = vpack.c.bf16 %v366_v5, %v365_v4  ;;  %v369_v15 = vmax.f32 %v337_v6, 0.0  ;;  %v370_v16 = vmax.f32 %v338_v7, 0.0  ;;  %v758_v17 = vunpack.c.l.bf16 %v875_v3 }
  0x21   : > { %v816_v19 = vpack.c.bf16 %v368_v10, %v367_v8  ;;  %v371_v20 = vmax.f32 %v339_v11, 0.0  ;;  %v372_v21 = vmax.f32 %v340_v12, 0.0  ;;  %v759_v22 = vunpack.c.h.bf16 %v875_v3 }
  0x22   : > { %886 = vst [vmem:[%s1031_s26 + $0x20] sm:$0xff] %v811_v14   ;;  %v821_v24 = vpack.c.bf16 %v370_v16, %v369_v15  ;;  %v303_v25 = vmul.f32 %v758_v17, %v997_v0  ;;  %v762_v26 = vunpack.c.l.bf16 %v876_v13  ;;  %v763_v27 = vunpack.c.h.bf16 %v876_v13 }
  0x23   : > { %887 = vst [vmem:[%s1031_s26 + $0x28] sm:$0xff] %v816_v19   ;;  %v826_v28 = vpack.c.bf16 %v372_v21, %v371_v20  ;;  %v304_v29 = vmul.f32 %v759_v22, %v997_v0  ;;  %v766_v30 = vunpack.c.l.bf16 %v877_v18  ;;  %v767_v31 = vunpack.c.h.bf16 %v877_v18 }
  0x24   : > { %888 = vst [vmem:[%s1031_s26 + $0x30] sm:$0xff] %v821_v24   ;;  %v341_v32 = vadd.f32 %v1006_v9, %v303_v25  ;;  %v305_v33 = vmul.f32 %v762_v26, %v997_v0  ;;  %v306_v34 = vmul.f32 %v763_v27, %v997_v0  ;;  %v770_v35 = vunpack.c.l.bf16 %v878_v23 }
  0x25   : > { %889 = vst [vmem:[%s1031_s26 + $0x38] sm:$0xff] %v826_v28   ;;  %v342_v36 = vadd.f32 %v1006_v9, %v304_v29  ;;  %v307_v37 = vmul.f32 %v766_v30, %v997_v0  ;;  %v308_v38 = vmul.f32 %v767_v31, %v997_v0  ;;  %v771_v39 = vunpack.c.h.bf16 %v878_v23 }
  0x26   : > { %v373_v41 = vmax.f32 %v341_v32, 0.0  ;;  %v343_v42 = vadd.f32 %v1006_v9, %v305_v33  ;;  %v344_v43 = vadd.f32 %v1006_v9, %v306_v34  ;;  %v309_v44 = vmul.f32 %v770_v35, %v997_v0 }
  0x27   : > { %v374_v45 = vmax.f32 %v342_v36, 0.0  ;;  %v345_v46 = vadd.f32 %v1006_v9, %v307_v37  ;;  %v346_v47 = vadd.f32 %v1006_v9, %v308_v38  ;;  %v310_v48 = vmul.f32 %v771_v39, %v997_v0 }
  0x28   : > { %v375_v49 = vmax.f32 %v343_v42, 0.0  ;;  %v376_v50 = vmax.f32 %v344_v43, 0.0  ;;  %v347_v51 = vadd.f32 %v1006_v9, %v309_v44  ;;  %v774_v52 = vunpack.c.l.bf16 %v879_v40 }
  0x29   : > { %v831_v54 = vpack.c.bf16 %v374_v45, %v373_v41  ;;  %v377_v55 = vmax.f32 %v345_v46, 0.0  ;;  %v378_v56 = vmax.f32 %v346_v47, 0.0  ;;  %v348_v57 = vadd.f32 %v1006_v9, %v310_v48 }
  0x2a   : > { %v836_v59 = vpack.c.bf16 %v376_v50, %v375_v49  ;;  %v379_v60 = vmax.f32 %v347_v51, 0.0  ;;  %v775_v61 = vunpack.c.h.bf16 %v879_v40  ;;  %v311_v62 = vmul.f32 %v774_v52, %v997_v0 }
  0x2b   : > { %890 = vst [vmem:[%s1031_s26 + $0x40] sm:$0xff] %v831_v54   ;;  %v841_v1 = vpack.c.bf16 %v378_v56, %v377_v55  ;;  %v380_v2 = vmax.f32 %v348_v57, 0.0  ;;  %v778_v3 = vunpack.c.l.bf16 %v880_v53  ;;  %v779_v4 = vunpack.c.h.bf16 %v880_v53 }
  0x2c   : > { %891 = vst [vmem:[%s1031_s26 + $0x48] sm:$0xff] %v836_v59   ;;  %v312_v5 = vmul.f32 %v775_v61, %v997_v0  ;;  %v349_v6 = vadd.f32 %v1006_v9, %v311_v62  ;;  %v782_v7 = vunpack.c.l.bf16 %v881_v58  ;;  %v783_v8 = vunpack.c.h.bf16 %v881_v58 }
  0x2d   : > { %892 = vst [vmem:[%s1031_s26 + $0x50] sm:$0xff] %v841_v1   ;;  %v846_v10 = vpack.c.bf16 %v380_v2, %v379_v60  ;;  %v313_v11 = vmul.f32 %v778_v3, %v997_v0  ;;  %v314_v12 = vmul.f32 %v779_v4, %v997_v0  ;;  %v786_v13 = vunpack.c.l.bf16 %v882_v63 }
  0x2e   : > { %v350_v14 = vadd.f32 %v1006_v9, %v312_v5  ;;  %v381_v15 = vmax.f32 %v349_v6, 0.0  ;;  %v315_v16 = vmul.f32 %v782_v7, %v997_v0  ;;  %v316_v17 = vmul.f32 %v783_v8, %v997_v0 }
  0x2f   : > { %893 = vst [vmem:[%s1031_s26 + $0x58] sm:$0xff] %v846_v10   ;;  %v351_v18 = vadd.f32 %v1006_v9, %v313_v11  ;;  %v352_v19 = vadd.f32 %v1006_v9, %v314_v12  ;;  %v787_v20 = vunpack.c.h.bf16 %v882_v63  ;;  %v317_v21 = vmul.f32 %v786_v13, %v997_v0 }
  0x30   : > { %v382_v22 = vmax.f32 %v350_v14, 0.0  ;;  %v353_v23 = vadd.f32 %v1006_v9, %v315_v16  ;;  %v354_v24 = vadd.f32 %v1006_v9, %v316_v17 }
  0x31   : > { %v383_v25 = vmax.f32 %v351_v18, 0.0  ;;  %v384_v26 = vmax.f32 %v352_v19, 0.0  ;;  %v318_v27 = vmul.f32 %v787_v20, %v997_v0  ;;  %v355_v28 = vadd.f32 %v1006_v9, %v317_v21 }
  0x32   : > { %v851_v29 = vpack.c.bf16 %v382_v22, %v381_v15  ;;  %v385_v30 = vmax.f32 %v353_v23, 0.0  ;;  %v386_v31 = vmax.f32 %v354_v24, 0.0 }
  0x33   : > { %v856_v32 = vpack.c.bf16 %v384_v26, %v383_v25  ;;  %v356_v33 = vadd.f32 %v1006_v9, %v318_v27  ;;  %v387_v34 = vmax.f32 %v355_v28, 0.0 }
  0x34   : > { %894 = vst [vmem:[%s1031_s26 + $0x60] sm:$0xff] %v851_v29   ;;  %v861_v35 = vpack.c.bf16 %v386_v31, %v385_v30 }
  0x35   : > { %895 = vst [vmem:[%s1031_s26 + $0x68] sm:$0xff] %v856_v32   ;;  %v388_v36 = vmax.f32 %v356_v33, 0.0 }
  0x36   : > { %896 = vst [vmem:[%s1031_s26 + $0x70] sm:$0xff] %v861_v35  }
  0x37   : > { %v866_v37 = vpack.c.bf16 %v388_v36, %v387_v34 }
  0x39   : > { %897 = vst [vmem:[%s1031_s26 + $0x78] sm:$0xff] %v866_v37  }
  0x3a PF: > { %s13_s14 = sadd.s32 1, %s944_s14   ;;  %s1120_s12 = smov %s940_s13 }
  0x3b   : > { %p10_p5 = scmp.ge.s32.totalorder %s13_s14, 4   ;;  %s1121_s13 = smov %s1123_s15 }
  0x3d   :  { %12 = sbr.rel (!%p10_p5) target bundleno = 2 (0x2), region = 62 }

// kernel: resblock_forward.4
= control target key start
LH: loop header
LB: loop body
LE: loop exit
PB: predicated region body
PF: predicated region fallthrough
CT: control target
= control target key end

     0   :  { %s5745_s12 = smov 0   ;;  %s5747_s13 = smov 0   ;;  %s7873_s0 = inlined_call_operand.vmem [shape: bf16[2,18,18,128], index: 0, kind: input, shape index: {}]   ;;  %s7874_s1 = inlined_call_operand.vmem [shape: bf16[1152,128], index: 1, kind: input, shape index: {}]   ;;  %s7875_s2 = inlined_call_operand.vmem [shape: bf16[2,16,16,128], index: 2, kind: output, shape index: {0}]   ;;  %s7876_s3 = inlined_call_operand.vmem [shape: f32[2,1,2,128], index: 3, kind: output, shape index: {1}]  }
   0x1   :  { %s5749_s14 = smov 0  }
   0x2 LB: > { %s26_s15 = sadd.s32 1, %s5719_s13  ;;  %p4454_p0 = scmp.ge.s32.totalorder %s5723_s14, 1  ;;  %s5723_s14 = sphi %s5749_s14, %s14_s14   ;;  %s5719_s13 = sphi %s5747_s13, %s7939_s13   ;;  %s5715_s12 = sphi %s5745_s12, %s7938_s12  }
   0x3   : > { %p28_p1 = scmp.ge.s32.totalorder %s26_s15, 2  ;;  %p156_p2 = scmp.lt.s32.totalorder %s5723_s14, 3 }
   0x5   : > { %s7941_s15 = smov (%p28_p1, %s26_s15), 0  ;;  %p157_p3 = pnand %p4454_p0, %p156_p2 }
   0x7   : > { %160 = sbr.rel (%p157_p3) target bundleno = 572 (0x23c), region = 28 }
   0xc   : > { %v5574_v0 = vld [vmem:[%s7874_s1 + $0x78] sm:$0xff]   ;;  %p192_p4 = scmp.lt.s32.totalorder %s5715_s12, 1  ;;  %v5576_v2 = vld [vmem:[%s7874_s1 + $0x70] sm:$0xff]   ;;  %v5578_v4 = vld [vmem:[%s7874_s1 + $0x68] sm:$0xff]   ;;  %vm264_vm0 = vsmask.f32 3328 }
   0xd   : > { %v5575_v1 = vld [vmem:[%s7874_s1 + $0x38] sm:$0xff]   ;;  %5013 = vmatprep.subr.bf16.mxu0 %v5574_v0  ;;  %5533 = vmatprep.subr.bf16.mxu1 %v5574_v0  ;;  %v5577_v3 = vld [vmem:[%s7874_s1 + $0x30] sm:$0xff]   ;;  %v5579_v5 = vld [vmem:[%s7874_s1 + $0x28] sm:$0xff]   ;;  %vm265_vm1 = vsmask.f32 7440  ;;  %vm715_vm3 = vcmask 1042432  }
   0xe   : > { %5014 = vmatpush3.bf16.msra.mxu0 %v5575_v1  ;;  %5541 = vmatpush3.bf16.msra.mxu1 %v5575_v1  ;;  %s7943_s12 = smov (!%p192_p4, %s5715_s12), 1  ;;  %v5580_v6 = vld [vmem:[%s7874_s1 + $0x60] sm:$0xff]   ;;  %v5582_v8 = vld [vmem:[%s7874_s1 + $0x58] sm:$0xff]   ;;  %v5584_v10 = vld [vmem:[%s7874_s1 + $0x50] sm:$0xff]   ;;  %vm716_vm4 = vcmask 1046532   ;;  %vm4319_vm6 = vcmask 1040384  }
   0xf   : > { %5015 = vmatprep.subr.bf16.mxu0 %v5576_v2  ;;  %5534 = vmatprep.subr.bf16.mxu1 %v5576_v2  ;;  %s5549_s30 = smul.u32 216, %s7943_s12  ;;  %v5581_v7 = vld [vmem:[%s7874_s1 + $0x20] sm:$0xff]   ;;  %v5583_v9 = vld [vmem:[%s7874_s1 + $0x18] sm:$0xff]   ;;  %v5585_v16 = vld [vmem:[%s7874_s1 + $0x10] sm:$0xff]   ;;  %s4458_s7 = sshll.u32 %s7943_s12, 1 }
  0x10   : > { %v5586_v21 = vld [vmem:[%s7874_s1 + $0x48] sm:$0xff]   ;;  %vm5839_vm2 = vmor %vm264_vm0, %vm265_vm1  ;;  %v5588_v43 = vld [vmem:[%s7874_s1 + $0x40] sm:$0xff]   ;;  %s214_s11 = scalar_lea.vmem %s7876_s3, %s4458_s7 }
  0x11   : > { %s5796_s10 = scalar_lea.vmem %s7873_s0, %s5549_s30  ;;  %v5587_v39 = vld [vmem:[%s7874_s1 + $0x8] sm:$0xff]   ;;  %v5589_v46 = vld [vmem:[%s7874_s1] sm:$0xff]   ;;  %v5592_v56 = vld [vmem:[%s7874_s1 + $0xf8] sm:$0xff]  }
  0x12   : > { %5016 = vmatpush3.bf16.msra.mxu0 %v5577_v3  ;;  %5542 = vmatpush3.bf16.msra.mxu1 %v5577_v3  ;;  %v5805_v11 = vld [vmem:[%s5796_s10] sm:$0xf]  ;;  %v5808_v12 = vld [vmem:[%s5796_s10 + $0x4] sm:$0xf]  ;;  %v5811_v13 = vld [vmem:[%s5796_s10 + $0x8] sm:$0x1] }
  0x13   : > { %5017 = vmatprep.subr.bf16.mxu0 %v5578_v4  ;;  %5535 = vmatprep.subr.bf16.mxu1 %v5578_v4  ;;  %v268_v14 = vshrl.u32 %v5805_v11, 16  ;;  %v271_v15 = vshll.u32 %v5805_v11, 16  ;;  %v277_v17 = vshll.u32 %v5808_v12, 16  ;;  %v281_v18 = vshrl.u32 %v5808_v12, 16  ;;  %v5822_v20 = vld [vmem:[%s5796_s10 + $0x90] sm:$0xf]  ;;  %vm6037_vm5 = vmor %vm715_vm3, %vm716_vm4 }
  0x14   : > { %v287_v19 = vshll.u32 %v5811_v13, 16  ;;  %v5828_v24 = vld [vmem:[%s5796_s10 + $0x94] sm:$0xf]  ;;  %v556_v25 = vshrl.u32 %v5822_v20, 16  ;;  %v720_v29 = vrot.slane %v5808_v12, 5  ;;  %v559_v33 = vshll.u32 %v5822_v20, 16 }
  0x15   : > { %v270_v22 = vrot.slane %v268_v14, 4  ;;  %v273_v23 = vrot.slane %v271_v15, 5  ;;  %v279_v26 = vrot.slane %v277_v17, 5  ;;  %v283_v27 = vrot.slane %v281_v18, 4  ;;  %v5833_v30 = vld [vmem:[%s5796_s10 + $0x98] sm:$0x1] }
  0x16   : > { %5018 = vmatpush3.bf16.msra.mxu0 %v5579_v5  ;;  %5543 = vmatpush3.bf16.msra.mxu1 %v5579_v5  ;;  %v289_v28 = vrot.slane %v287_v19, 5  ;;  %v558_v32 = vrot.slane %v556_v25, 4  ;;  %v565_v34 = vshll.u32 %v5828_v24, 16  ;;  %v569_v37 = vshrl.u32 %v5828_v24, 16  ;;  %v5593_v59 = vld [vmem:[%s7874_s1 + $0x178] sm:$0xff]  }
  0x17   : > { %5019 = vmatprep.subr.bf16.mxu0 %v5580_v6  ;;  %5536 = vmatprep.subr.bf16.mxu1 %v5580_v6  ;;  %v274_v31 = vor.u32 %v273_v23, %v270_v22  ;;  %v284_v36 = vor.u32 %v283_v27, %v279_v26  ;;  %v575_v38 = vshll.u32 %v5833_v30, 16  ;;  %v561_v41 = vrot.slane %v559_v33, 5  ;;  %v5872_v60 = vld [vmem:[%s5796_s10 + $0xc] sm:$0xf]  ;;  %v5594_v63 = vld [vmem:[%s7874_s1 + $0xb8] sm:$0xff]   ;;  %v5596_v6 = vld [vmem:[%s7874_s1 + $0xf0] sm:$0xff]  }
  0x18   : > { %v567_v42 = vrot.slane %v565_v34, 5  ;;  %v571_v45 = vrot.slane %v569_v37, 4  ;;  %v723_v48 = vrot.slane %v5811_v13, 5  ;;  %v5861_v51 = vrot.slane %v720_v29, 4  ;;  %v5595_v0 = vld [vmem:[%s7874_s1 + $0x138] sm:$0xff]   ;;  %v5597_v22 = vld [vmem:[%s7874_s1 + $0xb0] sm:$0xff]  }
  0x19   : > { %v275_v40 = vrot.slane %v274_v31, 4  ;;  %v285_v44 = vrot.slane %v284_v36, 4  ;;  %v562_v49 = vor.u32 %v561_v41, %v558_v32  ;;  %v577_v53 = vrot.slane %v575_v38, 5  ;;  %v5885_v1 = vld [vmem:[%s5796_s10 + $0x10] sm:$0xf] }
  0x1a   : > { %5020 = vmatpush3.bf16.msra.mxu0 %v5581_v7  ;;  %5544 = vmatpush3.bf16.msra.mxu1 %v5581_v7  ;;  %v572_v52 = vor.u32 %v571_v45, %v567_v42  ;;  %v4635_v58 = vcombine.low %v5805_v11, %v5808_v12  ;;  %v4647_v62 = vcombine.low %v5822_v20, %v5828_v24  ;;  %v5888_v2 = vld [vmem:[%s5796_s10 + $0x14] sm:$0x1]  ;;  %v292_v3 = vshrl.u32 %v5872_v60, 16  ;;  %v261_v17 = vld [vmem:[%s5796_s10 + $0xa4] sm:$0x1] }
  0x1b   : > { %5021 = vmatprep.subr.bf16.mxu0 %v5582_v8  ;;  %5537 = vmatprep.subr.bf16.mxu1 %v5582_v8  ;;  %v280_v47 = vsel %vm5839_vm2, %v275_v40, %v279_v26  ;;  %v290_v50 = vsel %vm5839_vm2, %v285_v44, %v289_v28  ;;  %v563_v55 = vrot.slane %v562_v49, 4  ;;  %v295_v4 = vshll.u32 %v5872_v60, 16  ;;  %v5603_v40 = vld [vmem:[%s7874_s1 + $0x170] sm:$0xff]  }
  0x1c   : > { %v4651_v54 = vcombine.low %v280_v47, %v290_v50  ;;  %v573_v57 = vrot.slane %v572_v52, 4  ;;  %v301_v7 = vshll.u32 %v5885_v1, 16  ;;  %v305_v8 = vshrl.u32 %v5885_v1, 16  ;;  %v5601_v47 = vld [vmem:[%s7874_s1 + $0xa8] sm:$0xff]  }
  0x1d   : > { %v568_v61 = vsel %vm5839_vm2, %v563_v55, %v567_v42  ;;  %v294_v14 = vrot.slane %v292_v3, 4  ;;  %v297_v15 = vrot.slane %v295_v4, 5  ;;  %v599_v31 = vshll.u32 %v261_v17, 16  ;;  %v5960_v3 = vld [vmem:[%s5796_s10 + $0xac] sm:$0xf] }
  0x1e   : > { %5022 = vmatpush3.bf16.msra.mxu0 %v5583_v9  ;;  %5545 = vmatpush3.bf16.msra.mxu1 %v5583_v9  ;;  %v578_v5 = vsel %vm5839_vm2, %v573_v57, %v577_v53  ;;  %v311_v9 = vshll.u32 %v5888_v2, 16  ;;  %v303_v18 = vrot.slane %v301_v7, 5  ;;  %v307_v19 = vrot.slane %v305_v8, 4  ;;  %v5602_v53 = vld [vmem:[%s7874_s1 + $0xe0] sm:$0xff]   ;;  %v5942_v57 = vld [vmem:[%s5796_s10 + $0x1c] sm:$0xf] }
  0x1f   : > { %5023 = vmatprep.subr.bf16.mxu0 %v5584_v10  ;;  %5538 = vmatprep.subr.bf16.mxu1 %v5584_v10  ;;  %v5901_v10 = vld [vmem:[%s5796_s10 + $0x9c] sm:$0xf]  ;;  %v4663_v11 = vcombine.low %v568_v61, %v578_v5  ;;  %v298_v23 = vor.u32 %v297_v15, %v294_v14  ;;  %v601_v38 = vrot.slane %v599_v31, 5  ;;  %v5604_v61 = vld [vmem:[%s7874_s1 + $0xa0] sm:$0xff]   ;;  %v325_v5 = vshll.u32 %v5942_v57, 16 }
  0x20   : > { %3280 = vmatprep.mubr.bf16.mxu0 %v4651_v54  ;;  %v313_v20 = vrot.slane %v311_v9, 5  ;;  %v583_v24 = vshll.u32 %v5901_v10, 16  ;;  %v308_v27 = vor.u32 %v307_v19, %v303_v18  ;;  %v5605_v54 = vld [vmem:[%s7874_s1 + $0x130] sm:$0xff]   ;;  %v5608_v9 = vld [vmem:[%s7874_s1 + $0xd8] sm:$0xff]   ;;  %v613_v19 = vshll.u32 %v5960_v3, 16 }
  0x21   : > { %3376 = vmatprep.mubr.bf16.mxu1 %v4663_v11  ;;  %v299_v32 = vrot.slane %v298_v23, 4  ;;  %v262_v8 = vld [vmem:[%s5796_s10 + $0xb0] sm:$0x1]  ;;  %v617_v23 = vshrl.u32 %v5960_v3, 16 }
  0x22   : > { %5024 = vmatpush3.bf16.msra.mxu0 %v5585_v16  ;;  %5546 = vmatpush3.bf16.msra.mxu1 %v5585_v16  ;;  %v5904_v16 = vld [vmem:[%s5796_s10 + $0xa0] sm:$0xf]  ;;  %v585_v33 = vrot.slane %v583_v24, 5  ;;  %v309_v37 = vrot.slane %v308_v27, 4  ;;  %v5609_v24 = vld [vmem:[%s7874_s1 + $0x98] sm:$0xff]   ;;  %v623_v27 = vshll.u32 %v262_v8, 16 }
  0x23   : > { %5025 = vmatprep.subr.bf16.mxu0 %v5586_v21  ;;  %5539 = vmatprep.subr.bf16.mxu1 %v5586_v21  ;;  %v580_v21 = vshrl.u32 %v5901_v10, 16  ;;  %v589_v25 = vshll.u32 %v5904_v16, 16  ;;  %v593_v26 = vshrl.u32 %v5904_v16, 16  ;;  %v304_v41 = vsel %vm5839_vm2, %v299_v32, %v303_v18 }
  0x24   : > { %v314_v45 = vsel %vm5839_vm2, %v309_v37, %v313_v20  ;;  %v4648_v55 = vcombine.low %v5901_v10, %v5904_v16  ;;  %v327_v16 = vrot.slane %v325_v5, 5  ;;  %v619_v32 = vrot.slane %v617_v23, 4  ;;  %v5610_v37 = vld [vmem:[%s7874_s1 + $0xd0] sm:$0xff]  }
  0x25   : > { %v582_v28 = vrot.slane %v580_v21, 4  ;;  %v591_v34 = vrot.slane %v589_v25, 5  ;;  %v595_v36 = vrot.slane %v593_v26, 4  ;;  %v4652_v49 = vcombine.low %v304_v41, %v314_v45  ;;  %v5990_v45 = vld [vmem:[%s5796_s10 + $0x24] sm:$0xf] }
  0x26   : > { %5026 = vmatpush3.bf16.msra.mxu0 %v5587_v39  ;;  %5547 = vmatpush3.bf16.msra.mxu1 %v5587_v39  ;;  %v5600_v39 = vld [vmem:[%s7874_s1 + $0xe8] sm:$0xff]   ;;  %v615_v26 = vrot.slane %v613_v19, 5 }
  0x27   : > { %5027 = vmatprep.subr.bf16.mxu0 %v5588_v43  ;;  %5540 = vmatprep.subr.bf16.mxu1 %v5588_v43  ;;  %v586_v42 = vor.u32 %v585_v33, %v582_v28  ;;  %v596_v43 = vor.u32 %v595_v36, %v591_v34 }
  0x28   : > { %v620_v41 = vor.u32 %v619_v32, %v615_v26 }
  0x29   : > { %v587_v50 = vrot.slane %v586_v42, 4  ;;  %v597_v52 = vrot.slane %v596_v43, 4  ;;  %v5611_v43 = vld [vmem:[%s7874_s1 + $0x90] sm:$0xff]  }
  0x2a   : > { %5028 = vmatpush3.bf16.msra.mxu0 %v5589_v46  ;;  %5548 = vmatpush3.bf16.msra.mxu1 %v5589_v46  ;;  %v4636_v46 = vcombine.low %v5872_v60, %v5885_v1 }
  0x2b   : > { %5125 = vmatprep.subr.bf16.mxu1 %v5592_v56  ;;  %5237 = vmatprep.subr.bf16.mxu0 %v5593_v59  ;;  %v5939_v56 = vld [vmem:[%s5796_s10 + $0x18] sm:$0xf]  ;;  %v592_v59 = vsel %vm5839_vm2, %v587_v50, %v591_v34  ;;  %v602_v60 = vsel %vm5839_vm2, %v597_v52, %v601_v38  ;;  %v625_v34 = vrot.slane %v623_v27, 5  ;;  %v727_v38 = vrot.slane %v5885_v1, 5  ;;  %v6001_v50 = vld [vmem:[%s5796_s10 + $0x2c] sm:$0x1] }
  0x2c   : > { %v4664_v4 = vcombine.low %v592_v59, %v602_v60  ;;  %v4637_v36 = vcombine.low %v5939_v56, %v5942_v57  ;;  %v340_v52 = vshrl.u32 %v5990_v45, 16  ;;  %v621_v60 = vrot.slane %v620_v41, 4 }
  0x2d   : > { %3281 = vmatmul.mubr.bf16.vlgmr.msra.gmra.mxu0 %v4635_v58  ;;  %3377 = vmatmul.mubr.bf16.vlgmr.msra.gmra.mxu1 %v4647_v62  ;;  %v5945_v58 = vld [vmem:[%s5796_s10 + $0x20] sm:$0x1]  ;;  %v316_v62 = vshrl.u32 %v5939_v56, 16  ;;  %v359_v5 = vshll.u32 %v6001_v50, 16 }
  0x2e   : > { %5126 = vmatpush3.bf16.msra.mxu1 %v5594_v63  ;;  %5238 = vmatpush3.bf16.msra.mxu0 %v5595_v0  ;;  %v319_v63 = vshll.u32 %v5939_v56, 16  ;;  %v5957_v0 = vld [vmem:[%s5796_s10 + $0xa8] sm:$0xf]  ;;  %v335_v7 = vshll.u32 %v5945_v58, 16 }
  0x2f   : > { %5127 = vmatprep.subr.bf16.mxu1 %v5596_v6  ;;  %5239 = vmatprep.subr.bf16.mxu0 %v5603_v40  ;;  %v329_v6 = vshrl.u32 %v5942_v57, 16  ;;  %v318_v10 = vrot.slane %v316_v62, 4  ;;  %v604_v14 = vshrl.u32 %v5957_v0, 16  ;;  %v607_v15 = vshll.u32 %v5957_v0, 16  ;;  %v6013_v62 = vld [vmem:[%s5796_s10 + $0xb4] sm:$0xf] }
  0x30   : > { %3288 = vmatprep.mubr.bf16.mxu0 %v4652_v49  ;;  %v321_v11 = vrot.slane %v319_v63, 5  ;;  %3384 = vmatprep.mubr.bf16.mxu1 %v4664_v4  ;;  %v337_v18 = vrot.slane %v335_v7, 5  ;;  %v4649_v42 = vcombine.low %v5957_v0, %v5960_v3  ;;  %v6016_v63 = vld [vmem:[%s5796_s10 + $0xb8] sm:$0xf]  ;;  %v342_v0 = vrot.slane %v340_v52, 4 }
  0x31   : > { %v331_v17 = vrot.slane %v329_v6, 4  ;;  %v606_v21 = vrot.slane %v604_v14, 4  ;;  %v263_v6 = vld [vmem:[%s5796_s10 + $0xbc] sm:$0x1]  ;;  %v626_v7 = vsel %vm5839_vm2, %v621_v60, %v625_v34  ;;  %v6064_v52 = vld [vmem:[%s5796_s10 + $0x34] sm:$0xf] }
  0x32   : > { %5128 = vmatpush3.bf16.msra.mxu1 %v5597_v22  ;;  %5240 = vmatpush3.bf16.msra.mxu0 %v5605_v54  ;;  %v322_v20 = vor.u32 %v321_v11, %v318_v10  ;;  %v609_v22 = vrot.slane %v607_v15, 5  ;;  %v631_v10 = vshll.u32 %v6013_v62, 16  ;;  %v5617_v11 = vld [vmem:[%s7874_s1 + $0x128] sm:$0xff]  }
  0x33   : > { %5129 = vmatprep.subr.bf16.mxu1 %v5600_v39  ;;  %v332_v25 = vor.u32 %v331_v17, %v327_v16  ;;  %v637_v17 = vshll.u32 %v6016_v63, 16 }
  0x34   : > { %v323_v28 = vrot.slane %v322_v20, 4  ;;  %v610_v31 = vor.u32 %v609_v22, %v606_v21  ;;  %v633_v20 = vrot.slane %v631_v10, 5  ;;  %v641_v21 = vshrl.u32 %v6016_v63, 16  ;;  %v5616_v22 = vld [vmem:[%s7874_s1 + $0x88] sm:$0xff]  }
  0x35   : > { %3289 = vmatmul.mubr.bf16.gmra.mxu0 %v4636_v46  ;;  %3385 = vmatmul.mubr.bf16.gmra.mxu1 %v4648_v55  ;;  %v333_v33 = vrot.slane %v332_v25, 4  ;;  %v5993_v46 = vld [vmem:[%s5796_s10 + $0x28] sm:$0xf]  ;;  %v647_v25 = vshll.u32 %v263_v6, 16  ;;  %v5630_v6 = vld [vmem:[%s7874_s1 + $0x158] sm:$0xff]  }
  0x36   : > { %5130 = vmatpush3.bf16.msra.mxu1 %v5601_v47  ;;  %v328_v39 = vsel %vm5839_vm2, %v323_v28, %v327_v16  ;;  %v611_v40 = vrot.slane %v610_v31, 4  ;;  %v5615_v47 = vld [vmem:[%s7874_s1 + $0x168] sm:$0xff]   ;;  %v349_v54 = vshll.u32 %v5993_v46, 16  ;;  %v361_v16 = vrot.slane %v359_v5, 5 }
  0x37   : > { %5131 = vmatprep.subr.bf16.mxu1 %v5602_v53  ;;  %v338_v49 = vsel %vm5839_vm2, %v333_v33, %v337_v18  ;;  %v343_v53 = vshll.u32 %v5990_v45, 16  ;;  %v5614_v55 = vld [vmem:[%s7874_s1 + $0xc8] sm:$0xff]   ;;  %5241 = vmatprep.subr.bf16.mxu0 %v5615_v47  ;;  %v643_v32 = vrot.slane %v641_v21, 4  ;;  %v649_v34 = vrot.slane %v647_v25, 5 }
  0x38   : > { %v4653_v56 = vcombine.low %v328_v39, %v338_v49  ;;  %v616_v59 = vsel %vm5839_vm2, %v611_v40, %v615_v26  ;;  %v351_v4 = vrot.slane %v349_v54, 5  ;;  %5242 = vmatpush3.bf16.msra.mxu0 %v5617_v11  ;;  %v5618_v26 = vld [vmem:[%s7874_s1 + $0xc0] sm:$0xff]   ;;  %v4638_v41 = vcombine.low %v5990_v45, %v5993_v46  ;;  %v6061_v49 = vld [vmem:[%s5796_s10 + $0x30] sm:$0xf]  ;;  %v6069_v54 = vld [vmem:[%s5796_s10 + $0x38] sm:$0x1] }
  0x39   : > { %v345_v3 = vrot.slane %v343_v53, 5  ;;  %v4665_v14 = vcombine.low %v616_v59, %v626_v7  ;;  %v364_v13 = vshrl.u32 %v6061_v49, 16  ;;  %v377_v59 = vshrl.u32 %v6064_v52, 16  ;;  %v651_v11 = vld [vmem:[%s5796_s10] sm:$0xe] }
  0x3a   : > { %5132 = vmatpush3.bf16.msra.mxu1 %v5604_v61  ;;  %v353_v61 = vshrl.u32 %v5993_v46, 16  ;;  %3296 = vmatprep.mubr.bf16.mxu0 %v4653_v56  ;;  %v373_v56 = vshll.u32 %v6064_v52, 16  ;;  %v383_v60 = vshll.u32 %v6069_v54, 16 }
  0x3b   : > { %5133 = vmatprep.subr.bf16.mxu1 %v5608_v9  ;;  %v628_v9 = vshrl.u32 %v6013_v62, 16  ;;  %v346_v15 = vor.u32 %v345_v3, %v342_v0  ;;  %3392 = vmatprep.mubr.bf16.mxu1 %v4665_v14  ;;  %v5625_v0 = vld [vmem:[%s7874_s1 + $0x120] sm:$0xff]  }
  0x3c   : > { %v355_v8 = vrot.slane %v353_v61, 4  ;;  %v4475_v61 = vld [vmem:[%s5796_s10 + $0xc] sm:$0xf]  ;;  %v385_v10 = vrot.slane %v383_v60, 5 }
  0x3d   : > { %3297 = vmatmul.mubr.bf16.gmra.mxu0 %v4637_v36  ;;  %v630_v19 = vrot.slane %v628_v9, 4  ;;  %v347_v23 = vrot.slane %v346_v15, 4  ;;  %3393 = vmatmul.mubr.bf16.gmra.mxu1 %v4649_v42  ;;  %v5619_v36 = vld [vmem:[%s7874_s1 + $0x80] sm:$0xff]   ;;  %v5622_v42 = vld [vmem:[%s7874_s1 + $0x1f8] sm:$0xff]   ;;  %v379_v9 = vrot.slane %v377_v59, 4 }
  0x3e   : > { %5134 = vmatpush3.bf16.msra.mxu1 %v5609_v24  ;;  %v356_v18 = vor.u32 %v355_v8, %v351_v4  ;;  %v639_v24 = vrot.slane %v637_v17, 5  ;;  %v375_v8 = vrot.slane %v373_v56, 5 }
  0x3f   : > { %5135 = vmatprep.subr.bf16.mxu1 %v5610_v37  ;;  %v634_v31 = vor.u32 %v633_v20, %v630_v19  ;;  %v352_v33 = vsel %vm5839_vm2, %v347_v23, %v351_v4  ;;  %v366_v4 = vrot.slane %v364_v13, 4 }
  0x40   : > { %v357_v28 = vrot.slane %v356_v18, 4  ;;  %v644_v40 = vor.u32 %v643_v32, %v639_v24  ;;  %v5632_v18 = vld [vmem:[%s7874_s1 + $0x118] sm:$0xff]   ;;  %v380_v19 = vor.u32 %v379_v9, %v375_v8 }
  0x41   : > { %v635_v39 = vrot.slane %v634_v31, 4 }
  0x42   : > { %5136 = vmatpush3.bf16.msra.mxu1 %v5611_v43  ;;  %v362_v37 = vsel %vm5839_vm2, %v357_v28, %v361_v16  ;;  %v6058_v43 = vsel %vm6037_vm5, %v5861_v51, %v723_v48  ;;  %v645_v53 = vrot.slane %v644_v40, 4  ;;  %v5624_v48 = vld [vmem:[%s7874_s1 + $0x160] sm:$0xff]   ;;  %v4650_v51 = vcombine.low %v6013_v62, %v6016_v63  ;;  %v6088_v62 = vld [vmem:[%s5796_s10 + $0x10] sm:$0xf] }
  0x43   : > { %5137 = vmatprep.subr.bf16.mxu1 %v5614_v55  ;;  %v4654_v47 = vcombine.low %v352_v33, %v362_v37  ;;  %v640_v45 = vsel %vm5839_vm2, %v635_v39, %v639_v24  ;;  %v367_v55 = vshll.u32 %v6061_v49, 16  ;;  %v880_v63 = vshrl.u32 %v4475_v61, 16  ;;  %5243 = vmatprep.subr.bf16.mxu0 %v5624_v48  ;;  %v6116_v39 = vld [vmem:[%s5796_s10 + $0x3c] sm:$0xf]  ;;  %v5631_v48 = vld [vmem:[%s7874_s1 + $0x1f0] sm:$0xff]  }
  0x44   : > { %v650_v3 = vsel %vm5839_vm2, %v645_v53, %v649_v34  ;;  %v883_v16 = vshll.u32 %v4475_v61, 16  ;;  %v889_v17 = vshll.u32 %v6088_v62, 16  ;;  %5244 = vmatpush3.bf16.msra.mxu0 %v5625_v0  ;;  %v893_v20 = vshrl.u32 %v6088_v62, 16 }
  0x45   : > { %3304 = vmatprep.mubr.bf16.mxu0 %v4654_v47  ;;  %v369_v5 = vrot.slane %v367_v55, 5  ;;  %v4666_v7 = vcombine.low %v640_v45, %v650_v3  ;;  %v882_v15 = vrot.slane %v880_v63, 4  ;;  %v4683_v21 = vcombine.low %v4475_v61, %v6088_v62  ;;  %5245 = vmatprep.subr.bf16.mxu0 %v5630_v6  ;;  %v4477_v55 = vld [vmem:[%s5796_s10 + $0x18] sm:$0xf]  ;;  %v6144_v61 = vld [vmem:[%s5796_s10 + $0x1c] sm:$0xf] }
  0x46   : > { %5138 = vmatpush3.bf16.msra.mxu1 %v5616_v22  ;;  %3305 = vmatmul.mubr.bf16.gmra.mxu0 %v4638_v41  ;;  %v4459_v22 = vrot.slane %v651_v11, 9  ;;  %v885_v24 = vrot.slane %v883_v16, 5  ;;  %v6100_v25 = vrot.slane %v889_v17, 5  ;;  %v381_v28 = vrot.slane %v380_v19, 4  ;;  %v6125_v41 = vld [vmem:[%s5796_s10 + $0x40] sm:$0xf] }
  0x47   : > { %5139 = vmatprep.subr.bf16.mxu1 %v5618_v26  ;;  %v370_v14 = vor.u32 %v369_v5, %v366_v4  ;;  %3400 = vmatprep.mubr.bf16.mxu1 %v4666_v7  ;;  %v6104_v26 = vrot.slane %v727_v38, 4  ;;  %v895_v31 = vrot.slane %v893_v20, 4  ;;  %v388_v47 = vshrl.u32 %v6116_v39, 16  ;;  %v652_v63 = vld [vmem:[%s5796_s10 + $0xc] sm:$0xe]  ;;  %v5633_v19 = vld [vmem:[%s7874_s1 + $0x1b0] sm:$0xff]  }
  0x48   : > { %3401 = vmatmul.mubr.bf16.gmra.mxu1 %v4650_v51  ;;  %v721_v32 = vsel %vm6037_vm5, %v4459_v22, %v720_v29  ;;  %v886_v34 = vor.u32 %v885_v24, %v882_v15  ;;  %5246 = vmatpush3.bf16.msra.mxu0 %v5632_v18  ;;  %v386_v40 = vsel %vm5839_vm2, %v381_v28, %v385_v10  ;;  %v5623_v29 = vld [vmem:[%s7874_s1 + $0x1b8] sm:$0xff]   ;;  %v397_v53 = vshll.u32 %v6125_v41, 16  ;;  %v6150_v10 = vld [vmem:[%s5796_s10 + $0x48] sm:$0xf]  ;;  %v6153_v11 = vld [vmem:[%s5796_s10 + $0x4c] sm:$0xf] }
  0x49   : > { %v371_v23 = vrot.slane %v370_v14, 4  ;;  %3441 = vmatprep.mubr.bf16.mxu1 %v4683_v21  ;;  %v4667_v37 = vcombine.low %v721_v32, %v6058_v43  ;;  %v896_v12 = vor.u32 %v895_v31, %v6100_v25  ;;  %v391_v43 = vshll.u32 %v6116_v39, 16  ;;  %v6162_v18 = vld [vmem:[%s5796_s10 + $0x50] sm:$0x1]  ;;  %v4479_v24 = vld [vmem:[%s5796_s10 + $0x24] sm:$0xf] }
  0x4a   : > { %5140 = vmatpush3.bf16.msra.mxu1 %v5619_v36  ;;  %v4639_v36 = vcombine.low %v6061_v49, %v6064_v52  ;;  %v6132_v45 = vrot.slane %v886_v34, 4  ;;  %v401_v13 = vshrl.u32 %v6125_v41, 16  ;;  %v390_v56 = vrot.slane %v388_v47, 4  ;;  %v6174_v34 = vld [vmem:[%s5796_s10 + $0x28] sm:$0xf] }
  0x4b   : > { %5349 = vmatprep.subr.bf16.mxu1 %v5622_v42  ;;  %v376_v33 = vsel %vm5839_vm2, %v371_v23, %v375_v8  ;;  %v6128_v42 = vld [vmem:[%s5796_s10 + $0x44] sm:$0x1]  ;;  %v6140_v51 = vrot.slane %v896_v12, 4  ;;  %v393_v59 = vrot.slane %v391_v43, 5  ;;  %v399_v0 = vrot.slane %v397_v53, 5  ;;  %v5636_v12 = vld [vmem:[%s7874_s1 + $0x150] sm:$0xff]  }
  0x4c   : > { %v4655_v49 = vcombine.low %v376_v33, %v386_v40  ;;  %v407_v60 = vshll.u32 %v6128_v42, 16  ;;  %v403_v3 = vrot.slane %v401_v13, 4  ;;  %v904_v4 = vshrl.u32 %v4477_v55, 16  ;;  %v653_v40 = vld [vmem:[%s5796_s10 + $0x18] sm:$0xe]  ;;  %5247 = vmatprep.subr.bf16.mxu0 %v5636_v12 }
  0x4d   : > { %v907_v5 = vshll.u32 %v4477_v55, 16  ;;  %v394_v6 = vor.u32 %v393_v59, %v390_v56  ;;  %v4684_v9 = vcombine.low %v4477_v55, %v6144_v61  ;;  %v4640_v17 = vcombine.low %v6116_v39, %v6125_v41  ;;  %v4507_v8 = vld [vmem:[%s5796_s10 + $0x14] sm:$0x1] }
  0x4e   : > { %3312 = vmatprep.mubr.bf16.mxu0 %v4655_v49  ;;  %v409_v7 = vrot.slane %v407_v60, 5  ;;  %v404_v14 = vor.u32 %v403_v3, %v399_v0  ;;  %v6155_v15 = vrot.slane %v904_v4, 4  ;;  %v4460_v21 = vrot.slane %v652_v63, 9 }
  0x4f   : > { %3313 = vmatmul.mubr.bf16.gmra.mxu0 %v4639_v36  ;;  %v6157_v16 = vrot.slane %v907_v5, 5  ;;  %v395_v20 = vrot.slane %v394_v6, 4  ;;  %v730_v22 = vrot.slane %v5888_v2, 5  ;;  %v412_v23 = vshrl.u32 %v6150_v10, 16  ;;  %v6202_v5 = vld [vmem:[%s5796_s10 + $0x54] sm:$0xf] }
  0x50   : > { %3442 = vmatmul.mubr.bf16.vlgmr.msra.gmra.mxu1 %v4667_v37  ;;  %v405_v28 = vrot.slane %v404_v14, 4  ;;  %v415_v31 = vshll.u32 %v6150_v10, 16  ;;  %v421_v32 = vshll.u32 %v6153_v11, 16  ;;  %v425_v33 = vshrl.u32 %v6153_v11, 16  ;;  %v6208_v14 = vld [vmem:[%s5796_s10 + $0x58] sm:$0xf] }
  0x51   : > { %5350 = vmatpush3.bf16.msra.mxu1 %v5623_v29  ;;  %3449 = vmatprep.mubr.bf16.mxu1 %v4684_v9  ;;  %v400_v36 = vsel %vm5839_vm2, %v395_v20, %v399_v0  ;;  %v728_v2 = vsel %vm6037_vm5, %v4460_v21, %v727_v38  ;;  %v731_v37 = vsel %vm6037_vm5, %v6104_v26, %v730_v22  ;;  %v414_v39 = vrot.slane %v412_v23, 4  ;;  %v5637_v26 = vld [vmem:[%s7874_s1 + $0x110] sm:$0xff]   ;;  %v6212_v20 = vld [vmem:[%s5796_s10 + $0x5c] sm:$0x1] }
  0x52   : > { %5351 = vmatprep.subr.bf16.mxu1 %v5631_v48  ;;  %v410_v29 = vsel %vm5839_vm2, %v405_v28, %v409_v7  ;;  %v4668_v47 = vcombine.low %v728_v2, %v731_v37  ;;  %v417_v43 = vrot.slane %v415_v31, 5  ;;  %v423_v49 = vrot.slane %v421_v32, 5  ;;  %5248 = vmatpush3.bf16.msra.mxu0 %v5637_v26  ;;  %v4481_v28 = vld [vmem:[%s5796_s10 + $0x30] sm:$0xf]  ;;  %v6223_v31 = vld [vmem:[%s5796_s10 + $0x34] sm:$0xf] }
  0x53   : > { %v4656_v1 = vcombine.low %v400_v36, %v410_v29  ;;  %v427_v53 = vrot.slane %v425_v33, 4  ;;  %v431_v38 = vshll.u32 %v6162_v18, 16  ;;  %v928_v13 = vshrl.u32 %v4479_v24, 16  ;;  %v654_v2 = vld [vmem:[%s5796_s10 + $0x24] sm:$0xe]  ;;  %v5640_v37 = vld [vmem:[%s7874_s1 + $0x1e8] sm:$0xff]  }
  0x54   : > { %v418_v55 = vor.u32 %v417_v43, %v414_v39  ;;  %v931_v48 = vshll.u32 %v4479_v24, 16  ;;  %v4685_v59 = vcombine.low %v4479_v24, %v6174_v34  ;;  %v4641_v4 = vcombine.low %v6150_v10, %v6153_v11 }
  0x55   : > { %5352 = vmatpush3.bf16.msra.mxu1 %v5633_v19  ;;  %3320 = vmatprep.mubr.bf16.mxu0 %v4656_v1  ;;  %v428_v60 = vor.u32 %v427_v53, %v423_v49  ;;  %v433_v0 = vrot.slane %v431_v38, 5  ;;  %v6197_v3 = vrot.slane %v928_v13, 4  ;;  %v4461_v7 = vrot.slane %v653_v40, 9  ;;  %v6435_v13 = vld [vmem:[%s5796_s10 + $0x6c] sm:$0xf] }
  0x56   : > { %v419_v63 = vrot.slane %v418_v55, 4  ;;  %v6204_v6 = vrot.slane %v931_v48, 5  ;;  %v734_v9 = vrot.slane %v5942_v57, 5  ;;  %v737_v10 = vrot.slane %v5945_v58, 5  ;;  %5353 = vmatprep.subr.bf16.mxu1 %v5640_v37  ;;  %v6238_v55 = vld [vmem:[%s5796_s10 + $0x60] sm:$0xf] }
  0x57   : > { %3321 = vmatmul.mubr.bf16.gmra.mxu0 %v4640_v17  ;;  %v429_v19 = vrot.slane %v428_v60, 4  ;;  %v436_v17 = vshrl.u32 %v6202_v5, 16  ;;  %v439_v21 = vshll.u32 %v6202_v5, 16  ;;  %v445_v24 = vshll.u32 %v6208_v14, 16  ;;  %v5641_v48 = vld [vmem:[%s7874_s1 + $0x1a8] sm:$0xff]  }
  0x58   : > { %3450 = vmatmul.mubr.bf16.gmra.mxu1 %v4668_v47  ;;  %v424_v22 = vsel %vm5839_vm2, %v419_v63, %v423_v49  ;;  %v735_v23 = vsel %vm6037_vm5, %v4461_v7, %v734_v9  ;;  %v736_v57 = vrot.slane %v734_v9, 4  ;;  %v449_v36 = vshrl.u32 %v6208_v14, 16  ;;  %v6248_v7 = vld [vmem:[%s5796_s10 + $0x64] sm:$0xf] }
  0x59   : > { %3457 = vmatprep.mubr.bf16.mxu1 %v4685_v59  ;;  %v434_v58 = vsel %vm5839_vm2, %v429_v19, %v433_v0  ;;  %v438_v32 = vrot.slane %v436_v17, 4  ;;  %v441_v33 = vrot.slane %v439_v21, 5  ;;  %v447_v12 = vrot.slane %v445_v24, 5  ;;  %v6255_v21 = vld [vmem:[%s5796_s10 + $0x68] sm:$0x1]  ;;  %5354 = vmatpush3.bf16.msra.mxu1 %v5641_v48 }
  0x5a   : > { %v4657_v39 = vcombine.low %v424_v22, %v434_v58  ;;  %v738_v40 = vsel %vm6037_vm5, %v736_v57, %v737_v10  ;;  %v455_v29 = vshll.u32 %v6212_v20, 16  ;;  %v451_v49 = vrot.slane %v449_v36, 4  ;;  %v4483_v57 = vld [vmem:[%s5796_s10 + $0x3c] sm:$0xf]  ;;  %v6263_v24 = vld [vmem:[%s5796_s10 + $0x40] sm:$0xf] }
  0x5b   : > { %v4669_v47 = vcombine.low %v735_v23, %v738_v40  ;;  %v442_v43 = vor.u32 %v441_v33, %v438_v32  ;;  %v952_v1 = vshrl.u32 %v4481_v28, 16  ;;  %v955_v38 = vshll.u32 %v4481_v28, 16  ;;  %v655_v33 = vld [vmem:[%s5796_s10 + $0x30] sm:$0xe]  ;;  %v5645_v36 = vld [vmem:[%s7874_s1 + $0x108] sm:$0xff]  }
  0x5c   : > { %3328 = vmatprep.mubr.bf16.mxu0 %v4657_v39  ;;  %v457_v53 = vrot.slane %v455_v29, 5  ;;  %v4686_v26 = vcombine.low %v4481_v28, %v6223_v31  ;;  %v452_v60 = vor.u32 %v451_v49, %v447_v12  ;;  %v4642_v63 = vcombine.low %v6202_v5, %v6208_v14 }
  0x5d   : > { %v443_v59 = vrot.slane %v442_v43, 4  ;;  %v6243_v0 = vrot.slane %v952_v1, 4  ;;  %v6250_v9 = vrot.slane %v955_v38, 5  ;;  %v4462_v19 = vrot.slane %v654_v2, 9 }
  0x5e   : > { %v741_v10 = vrot.slane %v5993_v46, 5  ;;  %v744_v17 = vrot.slane %v6001_v50, 5  ;;  %v453_v23 = vrot.slane %v452_v60, 4  ;;  %v460_v5 = vshrl.u32 %v6238_v55, 16  ;;  %v5644_v46 = vld [vmem:[%s7874_s1 + $0x148] sm:$0xff]  }
  0x5f   : > { %3329 = vmatmul.mubr.bf16.gmra.mxu0 %v4641_v4  ;;  %v448_v22 = vsel %vm5839_vm2, %v443_v59, %v447_v12  ;;  %v463_v4 = vshll.u32 %v6238_v55, 16  ;;  %v469_v58 = vshll.u32 %v6248_v7, 16  ;;  %v473_v32 = vshrl.u32 %v6248_v7, 16  ;;  %5249 = vmatprep.subr.bf16.mxu0 %v5644_v46  ;;  %v5648_v12 = vld [vmem:[%s7874_s1 + $0x1e0] sm:$0xff]  }
  0x60   : > { %3458 = vmatmul.mubr.bf16.gmra.mxu1 %v4669_v47  ;;  %v742_v50 = vsel %vm6037_vm5, %v4462_v19, %v741_v10  ;;  %v743_v28 = vrot.slane %v741_v10, 4  ;;  %v458_v2 = vsel %vm5839_vm2, %v453_v23, %v457_v53  ;;  %v462_v37 = vrot.slane %v460_v5, 4  ;;  %5250 = vmatpush3.bf16.msra.mxu0 %v5645_v36  ;;  %v6287_v10 = vld [vmem:[%s5796_s10 + $0x6c] sm:$0xf]  ;;  %v5649_v46 = vld [vmem:[%s7874_s1 + $0x1a0] sm:$0xff]  }
  0x61   : > { %3465 = vmatprep.mubr.bf16.mxu1 %v4686_v26  ;;  %v465_v39 = vrot.slane %v463_v4, 5  ;;  %v479_v40 = vshll.u32 %v6255_v21, 16  ;;  %v4658_v29 = vcombine.low %v448_v22, %v458_v2  ;;  %v471_v43 = vrot.slane %v469_v58, 5  ;;  %5355 = vmatprep.subr.bf16.mxu1 %v5648_v12  ;;  %v6290_v22 = vld [vmem:[%s5796_s10 + $0x70] sm:$0xf] }
  0x62   : > { %v745_v47 = vsel %vm6037_vm5, %v743_v28, %v744_v17  ;;  %v475_v49 = vrot.slane %v473_v32, 4  ;;  %v976_v26 = vshrl.u32 %v4483_v57, 16  ;;  %v979_v59 = vshll.u32 %v4483_v57, 16  ;;  %v6304_v32 = vld [vmem:[%s5796_s10 + $0x74] sm:$0x1]  ;;  %5356 = vmatpush3.bf16.msra.mxu1 %v5649_v46 }
  0x63   : > { %v4670_v1 = vcombine.low %v742_v50, %v745_v47  ;;  %v466_v53 = vor.u32 %v465_v39, %v462_v37  ;;  %v481_v38 = vrot.slane %v479_v40, 5  ;;  %3336 = vmatprep.mubr.bf16.mxu0 %v4658_v29  ;;  %v4687_v19 = vcombine.low %v4483_v57, %v6263_v24  ;;  %v4485_v2 = vld [vmem:[%s5796_s10 + $0x48] sm:$0xf]  ;;  %v6313_v37 = vld [vmem:[%s5796_s10 + $0x4c] sm:$0xf] }
  0x64   : > { %v476_v48 = vor.u32 %v475_v49, %v471_v43  ;;  %v6292_v23 = vrot.slane %v976_v26, 4  ;;  %v4643_v5 = vcombine.low %v6238_v55, %v6248_v7  ;;  %v4463_v4 = vrot.slane %v655_v33, 9  ;;  %v656_v29 = vld [vmem:[%s5796_s10 + $0x3c] sm:$0xe] }
  0x65   : > { %v467_v17 = vrot.slane %v466_v53, 4  ;;  %v6299_v50 = vrot.slane %v979_v59, 5  ;;  %v748_v28 = vrot.slane %v6064_v52, 5  ;;  %v751_v58 = vrot.slane %v6069_v54, 5  ;;  %v5650_v52 = vld [vmem:[%s7874_s1 + $0x140] sm:$0xff]  }
  0x66   : > { %v477_v57 = vrot.slane %v476_v48, 4  ;;  %v484_v33 = vshrl.u32 %v6287_v10, 16  ;;  %v487_v36 = vshll.u32 %v6287_v10, 16  ;;  %v497_v12 = vshrl.u32 %v6290_v22, 16  ;;  %5251 = vmatprep.subr.bf16.mxu0 %v5650_v52  ;;  %v5651_v53 = vld [vmem:[%s7874_s1 + $0x100] sm:$0xff]  }
  0x67   : > { %3337 = vmatmul.mubr.bf16.gmra.mxu0 %v4642_v63  ;;  %v472_v55 = vsel %vm5839_vm2, %v467_v17, %v471_v43  ;;  %v493_v63 = vshll.u32 %v6290_v22, 16  ;;  %v749_v39 = vsel %vm6037_vm5, %v4463_v4, %v748_v28  ;;  %v750_v40 = vrot.slane %v748_v28, 4  ;;  %v6335_v28 = vld [vmem:[%s5796_s10 + $0x78] sm:$0xf] }
  0x68   : > { %3466 = vmatmul.mubr.bf16.gmra.mxu1 %v4670_v1  ;;  %v482_v54 = vsel %vm5839_vm2, %v477_v57, %v481_v38  ;;  %v486_v43 = vrot.slane %v484_v33, 4  ;;  %v489_v49 = vrot.slane %v487_v36, 5  ;;  %v499_v26 = vrot.slane %v497_v12, 4  ;;  %5252 = vmatpush3.bf16.msra.mxu0 %v5651_v53  ;;  %v6350_v12 = vld [vmem:[%s7874_s1 + $0x238] sm:$0xff]  }
  0x69   : > { %3473 = vmatprep.mubr.bf16.mxu1 %v4687_v19  ;;  %v4659_v47 = vcombine.low %v472_v55, %v482_v54  ;;  %v495_v1 = vrot.slane %v493_v63, 5  ;;  %v752_v38 = vsel %vm6037_vm5, %v750_v40, %v751_v58  ;;  %v503_v48 = vshll.u32 %v6304_v32, 16  ;;  %v5655_v19 = vld [vmem:[%s7874_s1 + $0x1d8] sm:$0xff]   ;;  %5485 = vmatprep.subr.bf16.mxu0 %v6350_v12 }
  0x6a   : > { %v1000_v59 = vshrl.u32 %v4485_v2, 16  ;;  %v4671_v17 = vcombine.low %v749_v39, %v752_v38  ;;  %v490_v4 = vor.u32 %v489_v49, %v486_v43  ;;  %v1003_v46 = vshll.u32 %v4485_v2, 16  ;;  %v6341_v63 = vld [vmem:[%s5796_s10 + $0x7c] sm:$0xf]  ;;  %5357 = vmatprep.subr.bf16.mxu1 %v5655_v19  ;;  %v6355_v49 = vld [vmem:[%s5796_s10 + $0x80] sm:$0x1] }
  0x6b   : > { %3344 = vmatprep.mubr.bf16.mxu0 %v4659_v47  ;;  %v500_v55 = vor.u32 %v499_v26, %v495_v1  ;;  %v505_v58 = vrot.slane %v503_v48, 5  ;;  %v4688_v36 = vcombine.low %v4485_v2, %v6313_v37  ;;  %v4644_v39 = vcombine.low %v6287_v10, %v6290_v22  ;;  %v4487_v26 = vld [vmem:[%s5796_s10 + $0x54] sm:$0xf]  ;;  %v6365_v48 = vld [vmem:[%s5796_s10 + $0x58] sm:$0xf] }
  0x6c   : > { %v6337_v33 = vrot.slane %v1000_v59, 4  ;;  %v491_v52 = vrot.slane %v490_v4, 4  ;;  %v6343_v54 = vrot.slane %v1003_v46, 5  ;;  %v4464_v40 = vrot.slane %v656_v29, 9 }
  0x6d   : > { %v501_v2 = vrot.slane %v500_v55, 4  ;;  %v755_v47 = vrot.slane %v6125_v41, 5  ;;  %v758_v43 = vrot.slane %v6128_v42, 5  ;;  %v508_v53 = vshrl.u32 %v6335_v28, 16  ;;  %v5657_v41 = vld [vmem:[%s7874_s1 + $0x198] sm:$0xff]  }
  0x6e   : > { %v496_v10 = vsel %vm5839_vm2, %v491_v52, %v495_v1  ;;  %v511_v29 = vshll.u32 %v6335_v28, 16  ;;  %v517_v38 = vshll.u32 %v6341_v63, 16  ;;  %5358 = vmatpush3.bf16.msra.mxu1 %v5657_v41  ;;  %v5660_v52 = vld [vmem:[%s7874_s1 + $0x1d0] sm:$0xff]   ;;  %v1027_v44 = vshll.u32 %v4487_v26, 16 }
  0x6f   : > { %3345 = vmatmul.mubr.bf16.gmra.mxu0 %v4643_v5  ;;  %v521_v5 = vshrl.u32 %v6341_v63, 16  ;;  %v506_v42 = vsel %vm5839_vm2, %v501_v2, %v505_v58  ;;  %v756_v1 = vsel %vm6037_vm5, %v4464_v40, %v755_v47  ;;  %v757_v59 = vrot.slane %v755_v47, 4  ;;  %5359 = vmatprep.subr.bf16.mxu1 %v5660_v52 }
  0x70   : > { %3474 = vmatmul.mubr.bf16.gmra.mxu1 %v4671_v17  ;;  %v510_v19 = vrot.slane %v508_v53, 4  ;;  %v657_v17 = vld [vmem:[%s5796_s10 + $0x48] sm:$0xe]  ;;  %v4660_v4 = vcombine.low %v496_v10, %v506_v42  ;;  %v513_v46 = vrot.slane %v511_v29, 5  ;;  %v519_v55 = vrot.slane %v517_v38, 5  ;;  %v5662_v29 = vld [vmem:[%s7874_s1 + $0x190] sm:$0xff]  }
  0x71   : > { %3481 = vmatprep.mubr.bf16.mxu1 %v4688_v36  ;;  %v523_v36 = vrot.slane %v521_v5, 4  ;;  %v759_v57 = vsel %vm6037_vm5, %v757_v59, %v758_v43  ;;  %v527_v58 = vshll.u32 %v6355_v49, 16  ;;  %v1024_v2 = vshrl.u32 %v4487_v26, 16 }
  0x72   : > { %3352 = vmatprep.mubr.bf16.mxu0 %v4660_v4  ;;  %v4672_v40 = vcombine.low %v756_v1, %v759_v57  ;;  %v514_v47 = vor.u32 %v513_v46, %v510_v19  ;;  %v6388_v5 = vrot.slane %v1027_v44, 5  ;;  %v4689_v41 = vcombine.low %v4487_v26, %v6365_v48  ;;  %v5665_v57 = vld [vmem:[%s7874_s1 + $0x1c8] sm:$0xff]   ;;  %v6397_v4 = vld [vmem:[%s5796_s10 + $0x84] sm:$0xf]  ;;  %5360 = vmatpush3.bf16.msra.mxu1 %v5662_v29 }
  0x73   : > { %v524_v53 = vor.u32 %v523_v36, %v519_v55  ;;  %v529_v38 = vrot.slane %v527_v58, 5  ;;  %v6386_v43 = vrot.slane %v1024_v2, 4  ;;  %v4645_v59 = vcombine.low %v6335_v28, %v6341_v63  ;;  %v6402_v46 = vld [vmem:[%s5796_s10 + $0x88] sm:$0xf]  ;;  %v6405_v36 = vld [vmem:[%s5796_s10 + $0x8c] sm:$0x1]  ;;  %5361 = vmatprep.subr.bf16.mxu1 %v5665_v57 }
  0x74   : > { %v515_v42 = vrot.slane %v514_v47, 4  ;;  %v4465_v19 = vrot.slane %v657_v17, 9  ;;  %v762_v44 = vrot.slane %v6153_v11, 5  ;;  %v765_v26 = vrot.slane %v6162_v18, 5  ;;  %v4523_v17 = vld [vmem:[%s5796_s10 + $0xc] sm:$0xe] }
  0x75   : > { %v525_v1 = vrot.slane %v524_v53, 4  ;;  %v892_v28 = vsel %vm5839_vm2, %v6132_v45, %v6100_v25  ;;  %v532_v18 = vshrl.u32 %v6397_v4, 16  ;;  %v535_v52 = vshll.u32 %v6397_v4, 16  ;;  %v4489_v53 = vld [vmem:[%s5796_s10 + $0x60] sm:$0xf] }
  0x76   : > { %v763_v2 = vsel %vm6037_vm5, %v4465_v19, %v762_v44  ;;  %v541_v47 = vshll.u32 %v6402_v46, 16  ;;  %v1048_v19 = vshrl.u32 %v4489_v53, 16  ;;  %v6516_v25 = vld [vmem:[%s5796_s10 + $0x84] sm:$0xf] }
  0x77   : > { %3353 = vmatmul.mubr.bf16.gmra.mxu0 %v4644_v39  ;;  %v520_v39 = vsel %vm5839_vm2, %v515_v42, %v519_v55  ;;  %v530_v11 = vsel %vm5839_vm2, %v525_v1, %v529_v38  ;;  %v534_v29 = vrot.slane %v532_v18, 4  ;;  %v537_v55 = vrot.slane %v535_v52, 5  ;;  %v6426_v42 = vld [vmem:[%s5796_s10 + $0x64] sm:$0xf] }
  0x78   : > { %3482 = vmatmul.mubr.bf16.gmra.mxu1 %v4672_v40  ;;  %v4661_v58 = vcombine.low %v520_v39, %v530_v11  ;;  %v764_v40 = vrot.slane %v762_v44, 4  ;;  %v545_v38 = vshrl.u32 %v6402_v46, 16  ;;  %v543_v1 = vrot.slane %v541_v47, 5  ;;  %v658_v39 = vld [vmem:[%s5796_s10 + $0x54] sm:$0xe]  ;;  %v5667_v11 = vld [vmem:[%s7874_s1 + $0x188] sm:$0xff]  }
  0x79   : > { %3489 = vmatprep.mubr.bf16.mxu1 %v4689_v41  ;;  %v551_v41 = vshll.u32 %v6405_v36, 16  ;;  %v1051_v44 = vshll.u32 %v4489_v53, 16  ;;  %v538_v52 = vor.u32 %v537_v55, %v534_v29  ;;  %v4690_v56 = vcombine.low %v4489_v53, %v6426_v42  ;;  %5362 = vmatpush3.bf16.msra.mxu1 %v5667_v11 }
  0x7a   : > { %3360 = vmatprep.mubr.bf16.mxu0 %v4661_v58  ;;  %v766_v57 = vsel %vm6037_vm5, %v764_v40, %v765_v26  ;;  %v547_v10 = vrot.slane %v545_v38, 4  ;;  %v6438_v58 = vld [vmem:[%s5796_s10 + $0x70] sm:$0xf]  ;;  %v6440_v26 = vrot.slane %v1048_v19, 4  ;;  %v4646_v38 = vcombine.low %v6397_v4, %v6402_v46 }
  0x7b   : > { %v4673_v18 = vcombine.low %v763_v2, %v766_v57  ;;  %v553_v60 = vrot.slane %v551_v41, 5  ;;  %v6442_v40 = vrot.slane %v1051_v44, 5  ;;  %v5670_v2 = vld [vmem:[%s7874_s1 + $0x1c0] sm:$0xff]   ;;  %v539_v29 = vrot.slane %v538_v52, 4 }
  0x7c   : > { %v548_v55 = vor.u32 %v547_v10, %v543_v1  ;;  %v4466_v41 = vrot.slane %v658_v39, 9  ;;  %v659_v57 = vld [vmem:[%s5796_s10 + $0x60] sm:$0xe]  ;;  %v769_v19 = vrot.slane %v6208_v14, 5  ;;  %v772_v53 = vrot.slane %v6212_v20, 5  ;;  %5363 = vmatprep.subr.bf16.mxu1 %v5670_v2 }
  0x7d   : > { %v1072_v44 = vshrl.u32 %v6435_v13, 16  ;;  %v1075_v11 = vshll.u32 %v6435_v13, 16  ;;  %v544_v47 = vsel %vm5839_vm2, %v539_v29, %v543_v1  ;;  %v1085_v10 = vshrl.u32 %v6438_v58, 16 }
  0x7e   : > { %v549_v52 = vrot.slane %v548_v55, 4  ;;  %v770_v14 = vsel %vm6037_vm5, %v4466_v41, %v769_v19  ;;  %v771_v20 = vrot.slane %v769_v19, 4  ;;  %v1329_v29 = vrot.slane %v6088_v62, 5 }
  0x7f   : > { %3361 = vmatmul.mubr.bf16.gmra.mxu0 %v4645_v59  ;;  %v4691_v59 = vcombine.low %v6435_v13, %v6438_v58  ;;  %v6465_v4 = vrot.slane %v1072_v44, 4  ;;  %v6467_v39 = vrot.slane %v1075_v11, 5  ;;  %v5672_v13 = vld [vmem:[%s7874_s1 + $0x180] sm:$0xff]   ;;  %v1332_v41 = vrot.slane %v4507_v8, 5  ;;  %v6478_v44 = vld [vmem:[%s5796_s10 + $0x78] sm:$0xf] }
  0x80   : > { %3490 = vmatmul.mubr.bf16.gmra.mxu1 %v4673_v18  ;;  %v554_v1 = vsel %vm5839_vm2, %v549_v52, %v553_v60  ;;  %v4539_v18 = vrot.slane %v4523_v17, 9  ;;  %v773_v55 = vsel %vm6037_vm5, %v771_v20, %v772_v53  ;;  %v4467_v19 = vrot.slane %v659_v57, 9  ;;  %v6481_v11 = vld [vmem:[%s5796_s10 + $0x7c] sm:$0xf]  ;;  %v4524_v20 = vld [vmem:[%s5796_s10 + $0x18] sm:$0xe] }
  0x81   : > { %3497 = vmatprep.mubr.bf16.mxu1 %v4690_v56  ;;  %v899_v56 = vshll.u32 %v4507_v8, 16  ;;  %v4662_v2 = vcombine.low %v544_v47, %v554_v1  ;;  %v4674_v60 = vcombine.low %v770_v14, %v773_v55  ;;  %v1331_v52 = vrot.slane %v1329_v29, 4  ;;  %5364 = vmatpush3.bf16.msra.mxu1 %v5672_v13 }
  0x82   : > { %v1330_v62 = vsel %vm6037_vm5, %v4539_v18, %v1329_v29  ;;  %v776_v47 = vrot.slane %v6248_v7, 5  ;;  %v779_v53 = vrot.slane %v6255_v21, 5  ;;  %v1096_v8 = vshrl.u32 %v6478_v44, 16  ;;  %v4508_v7 = vld [vmem:[%s5796_s10 + $0x20] sm:$0x1] }
  0x83   : > { %v901_v17 = vrot.slane %v899_v56, 5  ;;  %3368 = vmatprep.mubr.bf16.mxu0 %v4662_v2  ;;  %v1099_v57 = vshll.u32 %v6478_v44, 16  ;;  %v1333_v14 = vsel %vm6037_vm5, %v1331_v52, %v1332_v41  ;;  %v1109_v56 = vshrl.u32 %v6481_v11, 16  ;;  %v660_v29 = vld [vmem:[%s5796_s10 + $0x6c] sm:$0xe] }
  0x84   : > { %v4692_v18 = vcombine.low %v6478_v44, %v6481_v11  ;;  %v4715_v21 = vcombine.low %v1330_v62, %v1333_v14  ;;  %v777_v13 = vsel %vm6037_vm5, %v4467_v19, %v776_v47  ;;  %v778_v2 = vrot.slane %v776_v47, 4  ;;  %v6522_v47 = vld [vmem:[%s5796_s10 + $0x88] sm:$0xf] }
  0x85   : > { %v902_v1 = vsel %vm5839_vm2, %v6140_v51, %v901_v17  ;;  %v6507_v55 = vrot.slane %v1096_v8, 4  ;;  %v6509_v41 = vrot.slane %v1099_v57, 5  ;;  %v1336_v44 = vrot.slane %v6144_v61, 5 }
  0x86   : > { %v4699_v51 = vcombine.low %v892_v28, %v902_v1  ;;  %v780_v19 = vsel %vm6037_vm5, %v778_v2, %v779_v53  ;;  %v4468_v17 = vrot.slane %v660_v29, 9  ;;  %v783_v62 = vrot.slane %v6290_v22, 5  ;;  %v5661_v2 = vld [vmem:[%s7874_s1 + $0x230] sm:$0xff]  }
  0x87   : > { %3369 = vmatmul.mubr.bf16.gmra.mxu0 %v4646_v38  ;;  %v4540_v38 = vrot.slane %v4524_v20, 9  ;;  %v4675_v45 = vcombine.low %v777_v13, %v780_v19  ;;  %v786_v52 = vrot.slane %v6304_v32, 5  ;;  %v7882_v22 = vor.u32 %v6157_v16, %v6155_v15  ;;  %v4509_v13 = vld [vmem:[%s5796_s10 + $0x2c] sm:$0x1]  ;;  %v4525_v19 = vld [vmem:[%s5796_s10 + $0x24] sm:$0xe] }
  0x88   : > { %3498 = vmatmul.mubr.bf16.gmra.mxu1 %v4674_v60  ;;  %3602 = vmatprep.mubr.bf16.mxu0 %v4715_v21  ;;  %v1339_v60 = vrot.slane %v4508_v7, 5  ;;  %v6526_v53 = vsel %vm6037_vm5, %v4468_v17, %v783_v62  ;;  %v785_v8 = vrot.slane %v783_v62, 4  ;;  %v913_v20 = vshll.u32 %v6144_v61, 16 }
  0x89   : > { %3505 = vmatprep.mubr.bf16.mxu1 %v4691_v59  ;;  %v1337_v28 = vsel %vm6037_vm5, %v4540_v38, %v1336_v44  ;;  %v1338_v59 = vrot.slane %v1336_v44, 4  ;;  %v911_v57 = vrot.slane %v7882_v22, 4  ;;  %v7883_v32 = vshrl.u32 %v6144_v61, 16 }
  0x8a   : > { %v923_v29 = vshll.u32 %v4508_v7, 16  ;;  %v1120_v21 = vshrl.u32 %v6516_v25, 16  ;;  %v787_v15 = vsel %vm6037_vm5, %v785_v8, %v786_v52  ;;  %v915_v16 = vrot.slane %v913_v20, 5 }
  0x8b   : > { %v1340_v14 = vsel %vm6037_vm5, %v1338_v59, %v1339_v60  ;;  %v919_v1 = vrot.slane %v7883_v32, 4  ;;  %v1123_v44 = vshll.u32 %v6516_v25, 16  ;;  %v661_v60 = vld [vmem:[%s5796_s10 + $0x78] sm:$0xe]  ;;  %v4676_v61 = vcombine.low %v6526_v53, %v787_v15 }
  0x8c   : > { %v4716_v38 = vcombine.low %v1337_v28, %v1340_v14  ;;  %v925_v17 = vrot.slane %v923_v29, 5  ;;  %v6547_v7 = vrot.slane %v1120_v21, 4  ;;  %v1133_v62 = vshrl.u32 %v6522_v47, 16  ;;  %v6571_v21 = vld [vmem:[%s5796_s10 + $0x90] sm:$0xf] }
  0x8d   : > { %v916_v28 = vsel %vm5839_vm2, %v911_v57, %v915_v16  ;;  %v920_v59 = vor.u32 %v919_v1, %v915_v16  ;;  %v6552_v22 = vrot.slane %v1123_v44, 5  ;;  %v4693_v52 = vcombine.low %v6516_v25, %v6522_v47  ;;  %v4510_v16 = vld [vmem:[%s5796_s10 + $0x38] sm:$0x1]  ;;  %v4526_v44 = vld [vmem:[%s5796_s10 + $0x30] sm:$0xe] }
  0x8e   : > { %v4541_v53 = vrot.slane %v4525_v19, 9  ;;  %v1343_v8 = vrot.slane %v6174_v34, 5  ;;  %v1346_v20 = vrot.slane %v4509_v13, 5  ;;  %v790_v57 = vrot.slane %v6341_v63, 5 }
  0x8f   : > { %3603 = vmatmul.mubr.bf16.vlgmr.msra.gmra.mxu0 %v4699_v51  ;;  %v921_v51 = vrot.slane %v920_v59, 4  ;;  %v793_v14 = vrot.slane %v6355_v49, 5  ;;  %v934_v25 = vor.u32 %v6204_v6, %v6197_v3  ;;  %v937_v1 = vshll.u32 %v6174_v34, 16  ;;  %v6574_v49 = vld [vmem:[%s5796_s10 + $0x94] sm:$0xf] }
  0x90   : > { %3506 = vmatmul.mubr.bf16.gmra.mxu1 %v4675_v45  ;;  %5486 = vmatpush3.bf16.msra.mxu0 %v6350_v12  ;;  %v4469_v45 = vrot.slane %v661_v60, 9  ;;  %v5666_v12 = vld [vmem:[%s7874_s1 + $0x228] sm:$0xff]   ;;  %v1345_v32 = vrot.slane %v1343_v8, 4  ;;  %v7884_v29 = vshrl.u32 %v6174_v34, 16  ;;  %v947_v59 = vshll.u32 %v4509_v13, 16  ;;  %v5671_v13 = vld [vmem:[%s7874_s1 + $0x220] sm:$0xff]  }
  0x91   : > { %3513 = vmatprep.mubr.bf16.mxu1 %v4692_v18  ;;  %3610 = vmatprep.mubr.bf16.mxu0 %v4716_v38  ;;  %v1344_v18 = vsel %vm6037_vm5, %v4541_v53, %v1343_v8  ;;  %v926_v3 = vsel %vm5839_vm2, %v921_v51, %v925_v17  ;;  %v792_v38 = vrot.slane %v790_v57, 4  ;;  %v935_v15 = vrot.slane %v934_v25, 4 }
  0x92   : > { %5487 = vmatprep.subr.bf16.mxu0 %v5661_v2  ;;  %v943_v63 = vrot.slane %v7884_v29, 4  ;;  %v6580_v6 = vsel %vm6037_vm5, %v4469_v45, %v790_v57  ;;  %v4700_v19 = vcombine.low %v916_v28, %v926_v3  ;;  %v1347_v34 = vsel %vm6037_vm5, %v1345_v32, %v1346_v20  ;;  %v662_v20 = vld [vmem:[%s5796_s10 + $0x84] sm:$0xe] }
  0x93   : > { %v939_v60 = vrot.slane %v937_v1, 5  ;;  %v4717_v53 = vcombine.low %v1344_v18, %v1347_v34  ;;  %v794_v17 = vsel %vm6037_vm5, %v792_v38, %v793_v14  ;;  %v1144_v8 = vshrl.u32 %v6571_v21, 16  ;;  %v6615_v34 = vld [vmem:[%s5796_s10 + $0x9c] sm:$0xf] }
  0x94   : > { %5488 = vmatpush3.bf16.msra.mxu0 %v5661_v2  ;;  %v1147_v45 = vshll.u32 %v6571_v21, 16  ;;  %v4677_v51 = vcombine.low %v6580_v6, %v794_v17  ;;  %v949_v25 = vrot.slane %v947_v59, 5  ;;  %v1157_v18 = vshrl.u32 %v6574_v49, 16  ;;  %v6628_v59 = vld [vmem:[%s5796_s10 + $0x44] sm:$0x1] }
  0x95   : > { %5489 = vmatprep.subr.bf16.mxu0 %v5666_v12  ;;  %v940_v28 = vsel %vm5839_vm2, %v935_v15, %v939_v60  ;;  %v944_v57 = vor.u32 %v943_v63, %v939_v60  ;;  %v6597_v2 = vrot.slane %v1144_v8, 4  ;;  %v4694_v32 = vcombine.low %v6571_v21, %v6574_v49  ;;  %v6625_v60 = vld [vmem:[%s5796_s10 + $0xa0] sm:$0xf] }
  0x96   : > { %v6599_v14 = vrot.slane %v1147_v45, 5  ;;  %v4542_v29 = vrot.slane %v4526_v44, 9  ;;  %v1350_v63 = vrot.slane %v6223_v31, 5  ;;  %v1353_v3 = vrot.slane %v4510_v16, 5 }
  0x97   : > { %3611 = vmatmul.mubr.bf16.gmra.mxu0 %v4700_v19  ;;  %v945_v1 = vrot.slane %v944_v57, 4  ;;  %v4470_v6 = vrot.slane %v662_v20, 9  ;;  %v800_v38 = vrot.slane %v6405_v36, 5  ;;  %v958_v15 = vor.u32 %v6250_v9, %v6243_v0 }
  0x98   : > { %3514 = vmatmul.mubr.bf16.gmra.mxu1 %v4676_v61  ;;  %3618 = vmatprep.mubr.bf16.mxu0 %v4717_v53  ;;  %v797_v61 = vrot.slane %v6402_v46, 5  ;;  %v1351_v21 = vsel %vm6037_vm5, %v4542_v29, %v1350_v63  ;;  %v1352_v44 = vrot.slane %v1350_v63, 4  ;;  %v961_v19 = vshll.u32 %v6223_v31, 16  ;;  %v5675_v46 = vld [vmem:[%s7874_s1 + $0x218] sm:$0xff]   ;;  %v663_v63 = vld [vmem:[%s5796_s10 + $0x90] sm:$0xe] }
  0x99   : > { %3521 = vmatprep.mubr.bf16.mxu1 %v4693_v52  ;;  %5490 = vmatpush3.bf16.msra.mxu0 %v5666_v12  ;;  %v950_v52 = vsel %vm5839_vm2, %v945_v1, %v949_v25  ;;  %v959_v12 = vrot.slane %v958_v15, 4  ;;  %v7885_v8 = vshrl.u32 %v6223_v31, 16  ;;  %v971_v57 = vshll.u32 %v4510_v16, 16  ;;  %v4527_v25 = vld [vmem:[%s5796_s10 + $0x3c] sm:$0xe]  ;;  %v5678_v16 = vld [vmem:[%s7874_s1 + $0x210] sm:$0xff]  }
  0x9a   : > { %5491 = vmatprep.subr.bf16.mxu0 %v5671_v13  ;;  %v4701_v0 = vcombine.low %v940_v28, %v950_v52  ;;  %v6622_v9 = vsel %vm6037_vm5, %v4470_v6, %v797_v61  ;;  %v799_v36 = vrot.slane %v797_v61, 4  ;;  %v1354_v53 = vsel %vm6037_vm5, %v1352_v44, %v1353_v3 }
  0x9b   : > { %v963_v17 = vrot.slane %v961_v19, 5  ;;  %v967_v45 = vrot.slane %v7885_v8, 4  ;;  %v4718_v28 = vcombine.low %v1351_v21, %v1354_v53  ;;  %v1168_v1 = vshrl.u32 %v6615_v34, 16 }
  0x9c   : > { %v801_v20 = vsel %vm6037_vm5, %v799_v36, %v800_v38  ;;  %v1171_v29 = vshll.u32 %v6615_v34, 16  ;;  %v973_v31 = vrot.slane %v971_v57, 5  ;;  %v4695_v52 = vcombine.low %v6615_v34, %v6625_v60  ;;  %v5681_v57 = vld [vmem:[%s7874_s1 + $0x208] sm:$0xff]  }
  0x9d   : > { %5492 = vmatpush3.bf16.msra.mxu0 %v5671_v13  ;;  %v4678_v6 = vcombine.low %v6622_v9, %v801_v20  ;;  %v964_v3 = vsel %vm5839_vm2, %v959_v12, %v963_v17  ;;  %v968_v61 = vor.u32 %v967_v45, %v963_v17  ;;  %v6646_v38 = vrot.slane %v1168_v1, 4  ;;  %v6676_v20 = vld [vmem:[%s5796_s10 + $0xac] sm:$0xf] }
  0x9e   : > { %5493 = vmatprep.subr.bf16.mxu0 %v5675_v46  ;;  %v6648_v15 = vrot.slane %v1171_v29, 5  ;;  %v1181_v13 = vshrl.u32 %v6625_v60, 16  ;;  %v4543_v44 = vrot.slane %v4527_v25, 9  ;;  %v1357_v19 = vrot.slane %v6263_v24, 5 }
  0x9f   : > { %3619 = vmatmul.mubr.bf16.gmra.mxu0 %v4701_v0  ;;  %v969_v21 = vrot.slane %v968_v61, 4  ;;  %v1360_v9 = vrot.slane %v6628_v59, 5  ;;  %v4471_v36 = vrot.slane %v663_v63, 9  ;;  %v982_v12 = vor.u32 %v6299_v50, %v6292_v23 }
  0xa0   : > { %3522 = vmatmul.mubr.bf16.gmra.mxu1 %v4677_v51  ;;  %3626 = vmatprep.mubr.bf16.mxu0 %v4718_v28  ;;  %v5694_v51 = vld [vmem:[%s5796_s10 + $0x94] sm:$0xf]  ;;  %v985_v53 = vshll.u32 %v6263_v24, 16  ;;  %v1358_v34 = vsel %vm6037_vm5, %v4543_v44, %v1357_v19  ;;  %v1359_v17 = vrot.slane %v1357_v19, 4  ;;  %v7886_v8 = vshrl.u32 %v6263_v24, 16 }
  0xa1   : > { %3529 = vmatprep.mubr.bf16.mxu1 %v4694_v32  ;;  %v804_v0 = vrot.slane %v5694_v51, 5  ;;  %5494 = vmatpush3.bf16.msra.mxu0 %v5675_v46  ;;  %v974_v32 = vsel %vm5839_vm2, %v969_v21, %v973_v31  ;;  %v983_v25 = vrot.slane %v982_v12, 4  ;;  %v6673_v28 = vld [vmem:[%s5796_s10 + $0xa8] sm:$0xf]  ;;  %v995_v29 = vshll.u32 %v6628_v59, 16 }
  0xa2   : > { %v991_v45 = vrot.slane %v7886_v8, 4  ;;  %5495 = vmatprep.subr.bf16.mxu0 %v5678_v16  ;;  %v4702_v23 = vcombine.low %v964_v3, %v974_v32  ;;  %v1361_v24 = vsel %vm6037_vm5, %v1359_v17, %v1360_v9  ;;  %v987_v1 = vrot.slane %v985_v53, 5  ;;  %v4528_v3 = vld [vmem:[%s5796_s10 + $0x48] sm:$0xe]  ;;  %v664_v51 = vld [vmem:[%s5796_s10 + $0x9c] sm:$0xe] }
  0xa3   : > { %v6670_v50 = vsel %vm6037_vm5, %v4471_v36, %v804_v0  ;;  %v806_v46 = vrot.slane %v804_v0, 4  ;;  %v1192_v63 = vshrl.u32 %v6673_v28, 16  ;;  %v4719_v61 = vcombine.low %v1358_v34, %v1361_v24  ;;  %v4512_v36 = vld [vmem:[%s5796_s10 + $0x50] sm:$0x1] }
  0xa4   : > { %v7887_v31 = vrot.slane %v5833_v30, 5  ;;  %v1195_v44 = vshll.u32 %v6673_v28, 16  ;;  %v1205_v19 = vshrl.u32 %v6676_v20, 16  ;;  %v988_v59 = vsel %vm5839_vm2, %v983_v25, %v987_v1  ;;  %v5684_v30 = vld [vmem:[%s7874_s1 + $0x200] sm:$0xff]  }
  0xa5   : > { %5496 = vmatpush3.bf16.msra.mxu0 %v5678_v16  ;;  %v992_v0 = vor.u32 %v991_v45, %v987_v1  ;;  %v997_v12 = vrot.slane %v995_v29, 5  ;;  %v6697_v53 = vrot.slane %v1192_v63, 4  ;;  %v4696_v16 = vcombine.low %v6673_v28, %v6676_v20 }
  0xa6   : > { %v808_v21 = vsel %vm6037_vm5, %v806_v46, %v7887_v31  ;;  %5497 = vmatprep.subr.bf16.mxu0 %v5681_v57  ;;  %v6699_v32 = vrot.slane %v1195_v44, 5  ;;  %v4544_v34 = vrot.slane %v4528_v3, 9  ;;  %v1364_v8 = vrot.slane %v6313_v37, 5  ;;  %v5695_v46 = vld [vmem:[%s5796_s10 + $0xa0] sm:$0xf] }
  0xa7   : > { %v4679_v9 = vcombine.low %v6670_v50, %v808_v21  ;;  %3627 = vmatmul.mubr.bf16.gmra.mxu0 %v4702_v23  ;;  %v993_v17 = vrot.slane %v992_v0, 4  ;;  %v1367_v45 = vrot.slane %v4512_v36, 5  ;;  %v4472_v50 = vrot.slane %v664_v51, 9  ;;  %v6720_v31 = vld [vmem:[%s5796_s10 + $0xb4] sm:$0xf] }
  0xa8   : > { %3530 = vmatmul.mubr.bf16.gmra.mxu1 %v4678_v6  ;;  %3634 = vmatprep.mubr.bf16.mxu0 %v4719_v61  ;;  %v811_v25 = vrot.slane %v5695_v46, 5  ;;  %v5696_v6 = vld [vmem:[%s5796_s10 + $0xa4] sm:$0x1]  ;;  %v1006_v24 = vor.u32 %v6343_v54, %v6337_v33  ;;  %v1009_v1 = vshll.u32 %v6313_v37, 16  ;;  %v1365_v28 = vsel %vm6037_vm5, %v4544_v34, %v1364_v8  ;;  %v6723_v21 = vld [vmem:[%s5796_s10 + $0xb8] sm:$0xf] }
  0xa9   : > { %3537 = vmatprep.mubr.bf16.mxu1 %v4695_v52  ;;  %v814_v23 = vrot.slane %v5696_v6, 5  ;;  %5498 = vmatpush3.bf16.msra.mxu0 %v5681_v57  ;;  %v998_v52 = vsel %vm5839_vm2, %v993_v17, %v997_v12  ;;  %v1366_v29 = vrot.slane %v1364_v8, 4  ;;  %v7888_v63 = vshrl.u32 %v6313_v37, 16  ;;  %v4529_v12 = vld [vmem:[%s5796_s10 + $0x54] sm:$0xe] }
  0xaa   : > { %5499 = vmatprep.subr.bf16.mxu0 %v5684_v30  ;;  %v4703_v61 = vcombine.low %v988_v59, %v998_v52  ;;  %v6717_v33 = vsel %vm6037_vm5, %v4472_v50, %v811_v25  ;;  %v813_v54 = vrot.slane %v811_v25, 4  ;;  %v1007_v57 = vrot.slane %v1006_v24, 4  ;;  %v4513_v50 = vld [vmem:[%s5796_s10 + $0x5c] sm:$0x1]  ;;  %v665_v46 = vld [vmem:[%s5796_s10 + $0xa8] sm:$0xe] }
  0xab   : > { %v1015_v3 = vrot.slane %v7888_v63, 4  ;;  %v1368_v44 = vsel %vm6037_vm5, %v1366_v29, %v1367_v45  ;;  %v1011_v51 = vrot.slane %v1009_v1, 5  ;;  %v1019_v37 = vshll.u32 %v4512_v36, 16 }
  0xac   : > { %v1216_v0 = vshrl.u32 %v6720_v31, 16  ;;  %v4720_v59 = vcombine.low %v1365_v28, %v1368_v44  ;;  %v815_v34 = vsel %vm6037_vm5, %v813_v54, %v814_v23  ;;  %v1219_v17 = vshll.u32 %v6720_v31, 16 }
  0xad   : > { %v1229_v8 = vshrl.u32 %v6723_v21, 16  ;;  %5500 = vmatpush3.bf16.msra.mxu0 %v5684_v30  ;;  %v4680_v25 = vcombine.low %v6717_v33, %v815_v34  ;;  %v1012_v36 = vsel %vm5839_vm2, %v1007_v57, %v1011_v51  ;;  %v1016_v45 = vor.u32 %v1015_v3, %v1011_v51  ;;  %v5697_v3 = vld [vmem:[%s5796_s10 + $0xac] sm:$0xf]  ;;  %v6764_v34 = vld [vmem:[%s5796_s10 + $0xc4] sm:$0xf] }
  0xae   : > { %v1021_v6 = vrot.slane %v1019_v37, 5  ;;  %v6738_v24 = vrot.slane %v1216_v0, 4  ;;  %v6740_v23 = vrot.slane %v1219_v17, 5  ;;  %v4697_v1 = vcombine.low %v6720_v31, %v6723_v21 }
  0xaf   : > { %3635 = vmatmul.mubr.bf16.gmra.mxu0 %v4703_v61  ;;  %v4545_v52 = vrot.slane %v4529_v12, 9  ;;  %v1017_v30 = vrot.slane %v1016_v45, 4  ;;  %v1371_v28 = vrot.slane %v6365_v48, 5  ;;  %v1374_v29 = vrot.slane %v4513_v50, 5  ;;  %v5698_v61 = vld [vmem:[%s5796_s10 + $0xb0] sm:$0x1] }
  0xb0   : > { %3538 = vmatmul.mubr.bf16.gmra.mxu1 %v4679_v9  ;;  %3642 = vmatprep.mubr.bf16.mxu0 %v4720_v59  ;;  %v4473_v63 = vrot.slane %v665_v46, 9  ;;  %v818_v9 = vrot.slane %v5697_v3, 5  ;;  %v821_v33 = vrot.slane %v5698_v61, 5  ;;  %v1030_v54 = vor.u32 %v6388_v5, %v6386_v43  ;;  %v6761_v59 = vld [vmem:[%s5796_s10 + $0xc0] sm:$0xf] }
  0xb1   : > { %3545 = vmatprep.mubr.bf16.mxu1 %v4696_v16  ;;  %v1033_v57 = vshll.u32 %v6365_v48, 16  ;;  %v1022_v16 = vsel %vm5839_vm2, %v1017_v30, %v1021_v6  ;;  %v1372_v31 = vsel %vm6037_vm5, %v4545_v52, %v1371_v28  ;;  %v1373_v44 = vrot.slane %v1371_v28, 4  ;;  %v4530_v6 = vld [vmem:[%s5796_s10 + $0x60] sm:$0xe]  ;;  %v666_v3 = vld [vmem:[%s5796_s10 + $0xb4] sm:$0xe] }
  0xb2   : > { %v7889_v51 = vshrl.u32 %v6365_v48, 16  ;;  %v4704_v0 = vcombine.low %v1012_v36, %v1022_v16  ;;  %v6758_v12 = vsel %vm6037_vm5, %v4473_v63, %v818_v9  ;;  %v820_v43 = vrot.slane %v818_v9, 4  ;;  %v4514_v63 = vld [vmem:[%s5796_s10 + $0x68] sm:$0x1] }
  0xb3   : > { %v1031_v5 = vrot.slane %v1030_v54, 4  ;;  %v1375_v17 = vsel %vm6037_vm5, %v1373_v44, %v1374_v29  ;;  %v1035_v46 = vrot.slane %v1033_v57, 5  ;;  %v1043_v45 = vshll.u32 %v4513_v50, 16 }
  0xb4   : > { %v1039_v37 = vrot.slane %v7889_v51, 4  ;;  %v1240_v48 = vshrl.u32 %v6761_v59, 16  ;;  %v4721_v36 = vcombine.low %v1372_v31, %v1375_v17  ;;  %v822_v52 = vsel %vm6037_vm5, %v820_v43, %v821_v33  ;;  %v4531_v31 = vld [vmem:[%s5796_s10 + $0x6c] sm:$0xe]  ;;  %v5699_v43 = vld [vmem:[%s5796_s10 + $0xb8] sm:$0xf] }
  0xb5   : > { %v1243_v30 = vshll.u32 %v6761_v59, 16  ;;  %v1253_v28 = vshrl.u32 %v6764_v34, 16  ;;  %v4681_v9 = vcombine.low %v6758_v12, %v822_v52  ;;  %v1036_v29 = vsel %vm5839_vm2, %v1031_v5, %v1035_v46 }
  0xb6   : > { %v1040_v50 = vor.u32 %v1039_v37, %v1035_v46  ;;  %v1045_v61 = vrot.slane %v1043_v45, 5  ;;  %v6779_v54 = vrot.slane %v1240_v48, 4  ;;  %v4698_v57 = vcombine.low %v6761_v59, %v6764_v34 }
  0xb7   : > { %3643 = vmatmul.mubr.bf16.gmra.mxu0 %v4704_v0  ;;  %v6781_v33 = vrot.slane %v1243_v30, 5  ;;  %v4546_v16 = vrot.slane %v4530_v6, 9  ;;  %v1378_v51 = vrot.slane %v6426_v42, 5  ;;  %v1381_v37 = vrot.slane %v4514_v63, 5  ;;  %v5700_v0 = vld [vmem:[%s5796_s10 + $0xbc] sm:$0x1] }
  0xb8   : > { %3546 = vmatmul.mubr.bf16.gmra.mxu1 %v4680_v25  ;;  %3650 = vmatprep.mubr.bf16.mxu0 %v4721_v36  ;;  %v1041_v44 = vrot.slane %v1040_v50, 4  ;;  %v4474_v12 = vrot.slane %v666_v3, 9  ;;  %v825_v25 = vrot.slane %v5699_v43, 5  ;;  %v828_v5 = vrot.slane %v5700_v0, 5  ;;  %v4515_v36 = vld [vmem:[%s5796_s10 + $0x74] sm:$0x1] }
  0xb9   : > { %3553 = vmatprep.mubr.bf16.mxu1 %v4697_v1  ;;  %v1054_v17 = vor.u32 %v6442_v40, %v6440_v26  ;;  %v1057_v59 = vshll.u32 %v6426_v42, 16  ;;  %v1379_v46 = vsel %vm6037_vm5, %v4546_v16, %v1378_v51  ;;  %v1380_v45 = vrot.slane %v1378_v51, 4  ;;  %v6804_v16 = vld [vmem:[%s5796_s10 + $0x18] sm:$0xf]  ;;  %v6810_v0 = vld [vmem:[%s5796_s10 + $0x1c] sm:$0xf] }
  0xba   : > { %v1046_v1 = vsel %vm5839_vm2, %v1041_v44, %v1045_v61  ;;  %v7890_v48 = vshrl.u32 %v6426_v42, 16  ;;  %v826_v30 = vsel %vm6037_vm5, %v4474_v12, %v825_v25  ;;  %v827_v26 = vrot.slane %v825_v25, 4  ;;  %v6813_v12 = vld [vmem:[%s5796_s10 + $0x20] sm:$0x1] }
  0xbb   : > { %v4705_v52 = vcombine.low %v1036_v29, %v1046_v1  ;;  %v1055_v40 = vrot.slane %v1054_v17, 4  ;;  %v1382_v3 = vsel %vm6037_vm5, %v1380_v45, %v1381_v37  ;;  %v1059_v50 = vrot.slane %v1057_v59, 5 }
  0xbc   : > { %v1063_v6 = vrot.slane %v7890_v48, 4  ;;  %v1067_v61 = vshll.u32 %v4514_v63, 16  ;;  %v4547_v44 = vrot.slane %v4531_v31, 9  ;;  %v4722_v51 = vcombine.low %v1379_v46, %v1382_v3 }
  0xbd   : > { %v829_v42 = vsel %vm6037_vm5, %v827_v26, %v828_v5  ;;  %v1385_v43 = vrot.slane %v6438_v58, 5  ;;  %v1388_v29 = vrot.slane %v4515_v36, 5  ;;  %v1060_v37 = vsel %vm5839_vm2, %v1055_v40, %v1059_v50 }
  0xbe   : > { %v4682_v25 = vcombine.low %v826_v30, %v829_v42  ;;  %v1064_v17 = vor.u32 %v1063_v6, %v1059_v50  ;;  %v1069_v63 = vrot.slane %v1067_v61, 5  ;;  %v1489_v5 = vshrl.u32 %v6804_v16, 16  ;;  %v4532_v61 = vld [vmem:[%s5796_s10 + $0x78] sm:$0xe] }
  0xbf   : > { %3651 = vmatmul.mubr.bf16.gmra.mxu0 %v4705_v52  ;;  %v1386_v31 = vsel %vm6037_vm5, %v4547_v44, %v1385_v43  ;;  %v1387_v59 = vrot.slane %v1385_v43, 4  ;;  %v1492_v1 = vshll.u32 %v6804_v16, 16  ;;  %v1498_v45 = vshll.u32 %v6810_v0, 16 }
  0xc0   : > { %3554 = vmatmul.mubr.bf16.gmra.mxu1 %v4681_v9  ;;  %3658 = vmatprep.mubr.bf16.mxu0 %v4722_v51  ;;  %v1065_v46 = vrot.slane %v1064_v17, 4  ;;  %v1502_v48 = vshrl.u32 %v6810_v0, 16  ;;  %v1508_v9 = vshll.u32 %v6813_v12, 16  ;;  %v1491_v52 = vrot.slane %v1489_v5, 4  ;;  %v6832_v17 = vld [vmem:[%s5796_s10 + $0x80] sm:$0x1] }
  0xc1   : > { %3561 = vmatprep.mubr.bf16.mxu1 %v4698_v57  ;;  %v1389_v6 = vsel %vm6037_vm5, %v1387_v59, %v1388_v29  ;;  %v1494_v30 = vrot.slane %v1492_v1, 5  ;;  %v1078_v26 = vor.u32 %v6467_v39, %v6465_v4  ;;  %v1500_v3 = vrot.slane %v1498_v45, 5  ;;  %v6838_v5 = vld [vmem:[%s5796_s10 + $0x24] sm:$0xf] }
  0xc2   : > { %v1070_v57 = vsel %vm5839_vm2, %v1065_v46, %v1069_v63  ;;  %v4723_v40 = vcombine.low %v1386_v31, %v1389_v6  ;;  %v1504_v50 = vrot.slane %v1502_v48, 4  ;;  %v1510_v42 = vrot.slane %v1508_v9, 5  ;;  %v6845_v6 = vld [vmem:[%s5796_s10 + $0x28] sm:$0xf] }
  0xc3   : > { %v4706_v44 = vcombine.low %v1060_v37, %v1070_v57  ;;  %v1495_v51 = vor.u32 %v1494_v30, %v1491_v52  ;;  %v1079_v43 = vrot.slane %v1078_v26, 4  ;;  %v1081_v59 = vshll.u32 %v6438_v58, 16  ;;  %v4588_v57 = vld [vmem:[%s5796_s10 + $0x2c] sm:$0x1] }
  0xc4   : > { %v1505_v29 = vor.u32 %v1504_v50, %v1500_v3  ;;  %v1087_v4 = vrot.slane %v1085_v10, 4  ;;  %v1091_v39 = vshll.u32 %v4515_v36, 16  ;;  %v4731_v31 = vcombine.low %v6804_v16, %v6810_v0 }
  0xc5   : > { %v1496_v63 = vrot.slane %v1495_v51, 4  ;;  %v4548_v37 = vrot.slane %v4532_v61, 9  ;;  %v1392_v1 = vrot.slane %v6481_v11, 5  ;;  %v1083_v45 = vrot.slane %v1081_v59, 5 }
  0xc6   : > { %v1506_v46 = vrot.slane %v1505_v29, 4  ;;  %v1093_v48 = vrot.slane %v1091_v39, 5  ;;  %v1395_v9 = vrot.slane %v6832_v17, 5  ;;  %v1513_v16 = vshrl.u32 %v6838_v5, 16 }
  0xc7   : > { %3659 = vmatmul.mubr.bf16.gmra.mxu0 %v4706_v44  ;;  %v1501_v58 = vsel %vm5839_vm2, %v1496_v63, %v1500_v3  ;;  %v1393_v10 = vsel %vm6037_vm5, %v4548_v37, %v1392_v1  ;;  %v1394_v36 = vrot.slane %v1392_v1, 4  ;;  %v1084_v30 = vsel %vm5839_vm2, %v1079_v43, %v1083_v45 }
  0xc8   : > { %3562 = vmatmul.mubr.bf16.gmra.mxu1 %v4682_v25  ;;  %3666 = vmatprep.mubr.bf16.mxu0 %v4723_v40  ;;  %v1511_v52 = vsel %vm5839_vm2, %v1506_v46, %v1510_v42  ;;  %v1088_v26 = vor.u32 %v1087_v4, %v1083_v45  ;;  %v1516_v25 = vshll.u32 %v6838_v5, 16  ;;  %v1515_v61 = vrot.slane %v1513_v16, 4 }
  0xc9   : > { %v4747_v50 = vcombine.low %v1501_v58, %v1511_v52  ;;  %v1396_v3 = vsel %vm6037_vm5, %v1394_v36, %v1395_v9  ;;  %v1522_v44 = vshll.u32 %v6845_v6, 16  ;;  %v1526_v42 = vshrl.u32 %v6845_v6, 16  ;;  %v4533_v36 = vld [vmem:[%s5796_s10 + $0x84] sm:$0xe] }
  0xca   : > { %v1089_v51 = vrot.slane %v1088_v26, 4  ;;  %v4724_v29 = vcombine.low %v1393_v10, %v1396_v3  ;;  %v1518_v40 = vrot.slane %v1516_v25, 5  ;;  %v1532_v43 = vshll.u32 %v4588_v57, 16 }
  0xcb   : > { %3763 = vmatprep.mubr.bf16.mxu1 %v4747_v50  ;;  %v1524_v59 = vrot.slane %v1522_v44, 5  ;;  %v7877_v4 = vrot.slane %v6845_v6, 5  ;;  %v1948_v39 = vrot.slane %v4588_v57, 5  ;;  %v1528_v1 = vrot.slane %v1526_v42, 4  ;;  %v4517_v57 = vld [vmem:[%s5796_s10 + $0x8c] sm:$0x1] }
  0xcc   : > { %v1094_v63 = vsel %vm5839_vm2, %v1089_v51, %v1093_v48  ;;  %v1519_v37 = vor.u32 %v1518_v40, %v1515_v61  ;;  %v1102_v46 = vor.u32 %v6509_v41, %v6507_v55  ;;  %v1534_v9 = vrot.slane %v1532_v43, 5  ;;  %v6882_v50 = vld [vmem:[%s5796_s10 + $0x30] sm:$0xf]  ;;  %v6888_v61 = vld [vmem:[%s5796_s10 + $0x34] sm:$0xf] }
  0xcd   : > { %v4707_v45 = vcombine.low %v1084_v30, %v1094_v63  ;;  %v1947_v58 = vrot.slane %v7877_v4, 4  ;;  %v1105_v10 = vshll.u32 %v6481_v11, 16  ;;  %v1529_v52 = vor.u32 %v1528_v1, %v1524_v59  ;;  %v6893_v42 = vld [vmem:[%s5796_s10 + $0x38] sm:$0x1]  ;;  %v4604_v4 = vld [vmem:[%s5796_s10 + $0x24] sm:$0xe] }
  0xce   : > { %v1520_v16 = vrot.slane %v1519_v37, 4  ;;  %v1103_v26 = vrot.slane %v1102_v46, 4  ;;  %v1111_v48 = vrot.slane %v1109_v56, 4  ;;  %v1115_v30 = vshll.u32 %v6832_v17, 16 }
  0xcf   : > { %3667 = vmatmul.mubr.bf16.gmra.mxu0 %v4707_v45  ;;  %v6876_v55 = vsel %vm6037_vm5, %v1947_v58, %v1948_v39  ;;  %v1107_v41 = vrot.slane %v1105_v10, 5  ;;  %v4732_v25 = vcombine.low %v6838_v5, %v6845_v6  ;;  %v1530_v56 = vrot.slane %v1529_v52, 4 }
  0xd0   : > { %3764 = vmatmul.mubr.bf16.vlgmr.msra.gmra.mxu1 %v4731_v31  ;;  %3674 = vmatprep.mubr.bf16.mxu0 %v4724_v29  ;;  %v1525_v11 = vsel %vm5839_vm2, %v1520_v16, %v1524_v59  ;;  %v4549_v3 = vrot.slane %v4533_v36, 9  ;;  %v1399_v31 = vrot.slane %v6522_v47, 5  ;;  %v1117_v17 = vrot.slane %v1115_v30, 5 }
  0xd1   : > { %v1108_v44 = vsel %vm5839_vm2, %v1103_v26, %v1107_v41  ;;  %v1112_v51 = vor.u32 %v1111_v48, %v1107_v41  ;;  %v1402_v40 = vrot.slane %v4517_v57, 5  ;;  %v1535_v5 = vsel %vm5839_vm2, %v1530_v56, %v1534_v9  ;;  %v4534_v26 = vld [vmem:[%s5796_s10 + $0x90] sm:$0xe]  ;;  %v6912_v56 = vld [vmem:[%s5796_s10 + $0x98] sm:$0x1] }
  0xd2   : > { %v1400_v29 = vsel %vm6037_vm5, %v4549_v3, %v1399_v31  ;;  %v1401_v59 = vrot.slane %v1399_v31, 4  ;;  %v1537_v43 = vshrl.u32 %v6882_v50, 16  ;;  %v4748_v39 = vcombine.low %v1525_v11, %v1535_v5 }
  0xd3   : > { %v1113_v63 = vrot.slane %v1112_v51, 4  ;;  %v1540_v37 = vshll.u32 %v6882_v50, 16  ;;  %v1546_v1 = vshll.u32 %v6888_v61, 16  ;;  %v1550_v9 = vshrl.u32 %v6888_v61, 16 }
  0xd4   : > { %v1403_v46 = vsel %vm6037_vm5, %v1401_v59, %v1402_v40  ;;  %v1539_v45 = vrot.slane %v1537_v43, 4  ;;  %v1556_v58 = vshll.u32 %v6893_v42, 16  ;;  %3771 = vmatprep.mubr.bf16.mxu1 %v4748_v39  ;;  %v1126_v11 = vor.u32 %v6552_v22, %v6547_v7  ;;  %v6918_v40 = vld [vmem:[%s5796_s10 + $0x3c] sm:$0xf] }
  0xd5   : > { %v1118_v10 = vsel %vm5839_vm2, %v1113_v63, %v1117_v17  ;;  %v4725_v36 = vcombine.low %v1400_v29, %v1403_v46  ;;  %v1542_v16 = vrot.slane %v1540_v37, 5  ;;  %v1548_v52 = vrot.slane %v1546_v1, 5 }
  0xd6   : > { %v4708_v48 = vcombine.low %v1108_v44, %v1118_v10  ;;  %v1552_v41 = vrot.slane %v1550_v9, 4  ;;  %v1558_v30 = vrot.slane %v1556_v58, 5  ;;  %v1129_v31 = vshll.u32 %v6522_v47, 16 }
  0xd7   : > { %v1543_v3 = vor.u32 %v1542_v16, %v1539_v45  ;;  %v1135_v51 = vrot.slane %v1133_v62, 4  ;;  %v1139_v17 = vshll.u32 %v4517_v57, 16  ;;  %v1127_v5 = vrot.slane %v1126_v11, 4  ;;  %v6925_v57 = vld [vmem:[%s5796_s10 + $0x40] sm:$0xf] }
  0xd8   : > { %3772 = vmatmul.mubr.bf16.gmra.mxu1 %v4732_v25  ;;  %3675 = vmatmul.mubr.bf16.gmra.mxu0 %v4708_v48  ;;  %v1553_v44 = vor.u32 %v1552_v41, %v1548_v52  ;;  %v4733_v29 = vcombine.low %v6882_v50, %v6888_v61  ;;  %v4550_v7 = vrot.slane %v4534_v26, 9  ;;  %v1131_v25 = vrot.slane %v1129_v31, 5  ;;  %v6936_v45 = vld [vmem:[%s5796_s10 + $0x44] sm:$0x1] }
  0xd9   : > { %3682 = vmatprep.mubr.bf16.mxu0 %v4725_v36  ;;  %v1544_v22 = vrot.slane %v1543_v3, 4  ;;  %v1141_v59 = vrot.slane %v1139_v17, 5  ;;  %v1406_v43 = vrot.slane %v6574_v49, 5  ;;  %v1409_v62 = vrot.slane %v6912_v56, 5 }
  0xda   : > { %v1554_v47 = vrot.slane %v1553_v44, 4  ;;  %v1561_v39 = vshrl.u32 %v6918_v40, 16  ;;  %v1564_v63 = vshll.u32 %v6918_v40, 16  ;;  %v1132_v37 = vsel %vm5839_vm2, %v1127_v5, %v1131_v25  ;;  %v4535_v5 = vld [vmem:[%s5796_s10 + $0x9c] sm:$0xe] }
  0xdb   : > { %v1549_v50 = vsel %vm5839_vm2, %v1544_v22, %v1548_v52  ;;  %v1136_v1 = vor.u32 %v1135_v51, %v1131_v25  ;;  %v1407_v46 = vsel %vm6037_vm5, %v4550_v7, %v1406_v43  ;;  %v1408_v58 = vrot.slane %v1406_v43, 4 }
  0xdc   : > { %v1559_v9 = vsel %vm5839_vm2, %v1554_v47, %v1558_v30  ;;  %v1563_v10 = vrot.slane %v1561_v39, 4  ;;  %v1566_v36 = vrot.slane %v1564_v63, 5  ;;  %v1570_v52 = vshll.u32 %v6925_v57, 16  ;;  %v6952_v47 = vld [vmem:[%s5796_s10 + $0xa4] sm:$0x1] }
  0xdd   : > { %v4749_v16 = vcombine.low %v1549_v50, %v1559_v9  ;;  %v1137_v26 = vrot.slane %v1136_v1, 4  ;;  %v1574_v48 = vshrl.u32 %v6925_v57, 16  ;;  %v1410_v41 = vsel %vm6037_vm5, %v1408_v58, %v1409_v62  ;;  %v6955_v62 = vld [vmem:[%s5796_s10 + $0x48] sm:$0xf] }
  0xde   : > { %v1567_v11 = vor.u32 %v1566_v36, %v1563_v10  ;;  %v1580_v3 = vshll.u32 %v6936_v45, 16  ;;  %v4726_v51 = vcombine.low %v1407_v46, %v1410_v41  ;;  %v1572_v17 = vrot.slane %v1570_v52, 5 }
  0xdf   : > { %3779 = vmatprep.mubr.bf16.mxu1 %v4749_v16  ;;  %v1142_v31 = vsel %vm5839_vm2, %v1137_v26, %v1141_v59  ;;  %v1576_v44 = vrot.slane %v1574_v48, 4  ;;  %v1150_v43 = vor.u32 %v6599_v14, %v6597_v2  ;;  %v1153_v59 = vshll.u32 %v6574_v49, 16 }
  0xe0   : > { %v4709_v7 = vcombine.low %v1132_v37, %v1142_v31  ;;  %3780 = vmatmul.mubr.bf16.gmra.mxu1 %v4733_v29  ;;  %v1568_v22 = vrot.slane %v1567_v11, 4  ;;  %v1582_v25 = vrot.slane %v1580_v3, 5  ;;  %v1159_v63 = vrot.slane %v1157_v18, 4  ;;  %v6962_v37 = vld [vmem:[%s5796_s10 + $0x4c] sm:$0xf] }
  0xe1   : > { %v1577_v39 = vor.u32 %v1576_v44, %v1572_v17  ;;  %v1163_v50 = vshll.u32 %v6912_v56, 16  ;;  %v1151_v2 = vrot.slane %v1150_v43, 4  ;;  %v4734_v14 = vcombine.low %v6918_v40, %v6925_v57  ;;  %v6971_v56 = vld [vmem:[%s5796_s10 + $0x50] sm:$0x1] }
  0xe2   : > { %3683 = vmatmul.mubr.bf16.gmra.mxu0 %v4709_v7  ;;  %v1573_v29 = vsel %vm5839_vm2, %v1568_v22, %v1572_v17  ;;  %v4551_v1 = vrot.slane %v4535_v5, 9  ;;  %v1155_v9 = vrot.slane %v1153_v59, 5  ;;  %v1413_v49 = vrot.slane %v6625_v60, 5 }
  0xe3   : > { %3690 = vmatprep.mubr.bf16.mxu0 %v4726_v51  ;;  %v1578_v46 = vrot.slane %v1577_v39, 4  ;;  %v1165_v58 = vrot.slane %v1163_v50, 5  ;;  %v1416_v18 = vrot.slane %v6952_v47, 5  ;;  %v1585_v10 = vshrl.u32 %v6955_v62, 16 }
  0xe4   : > { %v1588_v36 = vshll.u32 %v6955_v62, 16  ;;  %v1594_v16 = vshll.u32 %v6962_v37, 16  ;;  %v1156_v26 = vsel %vm5839_vm2, %v1151_v2, %v1155_v9  ;;  %v1160_v52 = vor.u32 %v1159_v63, %v1155_v9 }
  0xe5   : > { %v1583_v40 = vsel %vm5839_vm2, %v1578_v46, %v1582_v25  ;;  %v1414_v48 = vsel %vm6037_vm5, %v4551_v1, %v1413_v49  ;;  %v1415_v11 = vrot.slane %v1413_v49, 4  ;;  %v1587_v3 = vrot.slane %v1585_v10, 4 }
  0xe6   : > { %v4750_v41 = vcombine.low %v1573_v29, %v1583_v40  ;;  %v1590_v31 = vrot.slane %v1588_v36, 5  ;;  %v1161_v44 = vrot.slane %v1160_v52, 4  ;;  %v1596_v5 = vrot.slane %v1594_v16, 5  ;;  %v4536_v52 = vld [vmem:[%s5796_s10 + $0xa8] sm:$0xe] }
  0xe7   : > { %v1598_v7 = vshrl.u32 %v6962_v37, 16  ;;  %v1604_v22 = vshll.u32 %v6971_v56, 16  ;;  %v1417_v25 = vsel %vm6037_vm5, %v1415_v11, %v1416_v18  ;;  %v1174_v39 = vor.u32 %v6648_v15, %v6646_v38  ;;  %v7009_v11 = vld [vmem:[%s5796_s10 + $0x54] sm:$0xf] }
  0xe8   : > { %3787 = vmatprep.mubr.bf16.mxu1 %v4750_v41  ;;  %v1591_v43 = vor.u32 %v1590_v31, %v1587_v3  ;;  %v1177_v59 = vshll.u32 %v6625_v60, 16  ;;  %v1166_v29 = vsel %vm5839_vm2, %v1161_v44, %v1165_v58  ;;  %v4727_v2 = vcombine.low %v1414_v48, %v1417_v25 }
  0xe9   : > { %3788 = vmatmul.mubr.bf16.gmra.mxu1 %v4734_v14  ;;  %v1600_v1 = vrot.slane %v1598_v7, 4  ;;  %v1606_v46 = vrot.slane %v1604_v22, 5  ;;  %v4710_v9 = vcombine.low %v1156_v26, %v1166_v29  ;;  %v1175_v18 = vrot.slane %v1174_v39, 4  ;;  %v6997_v14 = vld [vmem:[%s5796_s10 + $0xb0] sm:$0x1] }
  0xea   : > { %v1592_v49 = vrot.slane %v1591_v43, 4  ;;  %v1179_v10 = vrot.slane %v1177_v59, 5  ;;  %v1183_v16 = vrot.slane %v1181_v13, 4  ;;  %v1187_v40 = vshll.u32 %v6952_v47, 16  ;;  %v7014_v7 = vld [vmem:[%s5796_s10 + $0x58] sm:$0xf] }
  0xeb   : > { %v1601_v15 = vor.u32 %v1600_v1, %v1596_v5  ;;  %v4735_v58 = vcombine.low %v6955_v62, %v6962_v37  ;;  %3691 = vmatmul.mubr.bf16.gmra.mxu0 %v4710_v9  ;;  %v4552_v22 = vrot.slane %v4536_v52, 9  ;;  %v7023_v59 = vld [vmem:[%s5796_s10 + $0x5c] sm:$0x1]  ;;  %v1618_v9 = vshll.u32 %v7014_v7, 16 }
  0xec   : > { %v1597_v26 = vsel %vm5839_vm2, %v1592_v49, %v1596_v5  ;;  %v1180_v48 = vsel %vm5839_vm2, %v1175_v18, %v1179_v10  ;;  %3698 = vmatprep.mubr.bf16.mxu0 %v4727_v2  ;;  %v1184_v3 = vor.u32 %v1183_v16, %v1179_v10  ;;  %v1189_v31 = vrot.slane %v1187_v40, 5 }
  0xed   : > { %v5029_v51 = vpop.f32.mrf.mxu0  ;;  %v5101_v17 = vpop.f32.mrf.mxu1  ;;  %v1602_v62 = vrot.slane %v1601_v15, 4  ;;  %v1620_v40 = vrot.slane %v1618_v9, 5  ;;  %v1628_v52 = vshll.u32 %v7023_v59, 16  ;;  %v1938_v30 = vrot.slane %v6810_v0, 5 }
  0xee   : > { %v1185_v39 = vrot.slane %v1184_v3, 4 }
  0xef   : > { %v5030_v63 = vpop.f32.mrf.mxu0  ;;  %v5102_v50 = vpop.f32.mrf.mxu1  ;;  %v1607_v43 = vsel %vm5839_vm2, %v1602_v62, %v1606_v46 }
  0xf0   : > { %v7004_v41 = vadd.f32 %v5030_v63, %v5029_v51  ;;  %v7006_v60 = vadd.f32 %v5102_v50, %v5101_v17  ;;  %v1420_v51 = vrot.slane %v6676_v20, 5  ;;  %v1423_v17 = vrot.slane %v6997_v14, 5 }
  0xf1   : > { %v5032_v36 = vpop.f32.mrf.mxu0  ;;  %v5104_v38 = vpop.f32.mrf.mxu1  ;;  %v1609_v63 = vshrl.u32 %v7009_v11, 16  ;;  %v1612_v50 = vshll.u32 %v7009_v11, 16  ;;  %v4751_v29 = vcombine.low %v1597_v26, %v1607_v43  ;;  %v1190_v18 = vsel %vm5839_vm2, %v1185_v39, %v1189_v31 }
  0xf2   : > { %v1421_v2 = vsel %vm6037_vm5, %v4552_v22, %v1420_v51  ;;  %v1422_v1 = vrot.slane %v1420_v51, 4  ;;  %v4711_v15 = vcombine.low %v1180_v48, %v1190_v18  ;;  %v1630_v22 = vrot.slane %v1628_v52, 5 }
  0xf3   : > { %v5033_v13 = vpop.f32.mrf.mxu0  ;;  %v5105_v47 = vpop.f32.mrf.mxu1  ;;  %v1611_v10 = vrot.slane %v1609_v63, 4  ;;  %v1614_v46 = vrot.slane %v1612_v50, 5  ;;  %3795 = vmatprep.mubr.bf16.mxu1 %v4751_v29  ;;  %v1198_v48 = vor.u32 %v6699_v32, %v6697_v53  ;;  %v1201_v51 = vshll.u32 %v6676_v20, 16  ;;  %v4521_v20 = vld [vmem:[%s5796_s10 + $0xbc] sm:$0x1] }
  0xf4   : > { %v7011_v44 = vadd.f32 %v5033_v13, %v5032_v36  ;;  %v7016_v5 = vadd.f32 %v5105_v47, %v5104_v38  ;;  %v1622_v36 = vshrl.u32 %v7014_v7, 16  ;;  %v1424_v16 = vsel %vm6037_vm5, %v1422_v1, %v1423_v17  ;;  %3796 = vmatmul.mubr.bf16.gmra.mxu1 %v4735_v58  ;;  %3699 = vmatmul.mubr.bf16.gmra.mxu0 %v4711_v15 }
  0xf5   : > { %v5035_v25 = vpop.f32.mrf.mxu0  ;;  %v5107_v38 = vpop.f32.mrf.mxu1  ;;  %v4728_v13 = vcombine.low %v1421_v2, %v1424_v16  ;;  %v1615_v47 = vor.u32 %v1614_v46, %v1611_v10  ;;  %v1207_v17 = vrot.slane %v1205_v19, 4  ;;  %v1211_v63 = vshll.u32 %v6997_v14, 16  ;;  %v4537_v2 = vld [vmem:[%s5796_s10 + $0xb4] sm:$0xe]  ;;  %v7052_v19 = vld [vmem:[%s5796_s10 + $0x60] sm:$0xf] }
  0xf6   : > { %v1624_v62 = vrot.slane %v1622_v36, 4  ;;  %v4736_v50 = vcombine.low %v7009_v11, %v7014_v7  ;;  %v1199_v1 = vrot.slane %v1198_v48, 4  ;;  %v1203_v53 = vrot.slane %v1201_v51, 5  ;;  %v7059_v36 = vld [vmem:[%s5796_s10 + $0x64] sm:$0xf] }
  0xf7   : > { %v5036_v49 = vpop.f32.mrf.mxu0  ;;  %v5108_v31 = vpop.f32.mrf.mxu1  ;;  %3706 = vmatprep.mubr.bf16.mxu0 %v4728_v13  ;;  %v1616_v43 = vrot.slane %v1615_v47, 4  ;;  %v1213_v14 = vrot.slane %v1211_v63, 5  ;;  %v4553_v15 = vrot.slane %v4537_v2, 9  ;;  %v1427_v52 = vrot.slane %v6723_v21, 5  ;;  %v7069_v13 = vld [vmem:[%s5796_s10 + $0x68] sm:$0x1] }
  0xf8   : > { %v1625_v39 = vor.u32 %v1624_v62, %v1620_v40  ;;  %v7046_v32 = vadd.f32 %v5036_v49, %v5035_v25  ;;  %v7048_v9 = vadd.f32 %v5108_v31, %v5107_v38  ;;  %v1204_v25 = vsel %vm5839_vm2, %v1199_v1, %v1203_v53 }
  0xf9   : > { %v5038_v26 = vpop.f32.mrf.mxu0  ;;  %v5110_v29 = vpop.f32.mrf.mxu1  ;;  %v1621_v18 = vsel %vm5839_vm2, %v1616_v43, %v1620_v40  ;;  %v1208_v49 = vor.u32 %v1207_v17, %v1203_v53  ;;  %v1430_v40 = vrot.slane %v4521_v20, 5  ;;  %v1636_v31 = vshll.u32 %v7052_v19, 16 }
  0xfa   : > { %v1626_v10 = vrot.slane %v1625_v39, 4  ;;  %v1642_v48 = vshll.u32 %v7059_v36, 16  ;;  %v1428_v17 = vsel %vm6037_vm5, %v4553_v15, %v1427_v52  ;;  %v1652_v2 = vshll.u32 %v7069_v13, 16 }
  0xfb   : > { %v5039_v58 = vpop.f32.mrf.mxu0  ;;  %v5111_v11 = vpop.f32.mrf.mxu1  ;;  %v1209_v62 = vrot.slane %v1208_v49, 4  ;;  %v1638_v63 = vrot.slane %v1636_v31, 5  ;;  %v1222_v49 = vor.u32 %v6740_v23, %v6738_v24  ;;  %v4538_v31 = vld [vmem:[%s5796_s10 + $0xc0] sm:$0xe]  ;;  %v4737_v23 = vcombine.low %v7052_v19, %v7059_v36 }
  0xfc   : > { %v7056_v46 = vadd.f32 %v5039_v58, %v5038_v26  ;;  %v7063_v38 = vadd.f32 %v5111_v11, %v5110_v29  ;;  %v1631_v16 = vsel %vm5839_vm2, %v1626_v10, %v1630_v22  ;;  %v1633_v26 = vshrl.u32 %v7052_v19, 16 }
  0xfd   : > { %v4752_v47 = vcombine.low %v1621_v18, %v1631_v16  ;;  %v5041_v51 = vpop.f32.mrf.mxu0  ;;  %v1429_v58 = vrot.slane %v1427_v52, 4  ;;  %v1646_v22 = vshrl.u32 %v7059_v36, 16  ;;  %v1214_v39 = vsel %vm5839_vm2, %v1209_v62, %v1213_v14  ;;  %v5113_v11 = vpop.f32.mrf.mxu1 }
  0xfe   : > { %7891 = vst [vmem:[#allocation2_spill] sm:$0xff] %v7063_v38  ;;  %v1635_v43 = vrot.slane %v1633_v26, 4  ;;  %v1644_v29 = vrot.slane %v1642_v48, 5  ;;  %v4712_v53 = vcombine.low %v1204_v25, %v1214_v39  ;;  %v1654_v52 = vrot.slane %v1652_v2, 5 }
  0xff   : > { %3803 = vmatprep.mubr.bf16.mxu1 %v4752_v47  ;;  %v5042_v1 = vpop.f32.mrf.mxu0  ;;  %v1431_v18 = vsel %vm6037_vm5, %v1429_v58, %v1430_v40  ;;  %v1648_v10 = vrot.slane %v1646_v22, 4  ;;  %v1225_v14 = vshll.u32 %v6723_v21, 16  ;;  %v1231_v47 = vrot.slane %v1229_v8, 4  ;;  %v5114_v62 = vpop.f32.mrf.mxu1  ;;  %v7094_v22 = vld [vmem:[%s5796_s10 + $0x6c] sm:$0xf] }
 0x100   : > { %3804 = vmatmul.mubr.bf16.gmra.mxu1 %v4736_v50  ;;  %v4729_v15 = vcombine.low %v1428_v17, %v1431_v18  ;;  %v1639_v16 = vor.u32 %v1638_v63, %v1635_v43  ;;  %3707 = vmatmul.mubr.bf16.gmra.mxu0 %v4712_v53  ;;  %v1223_v50 = vrot.slane %v1222_v49, 4  ;;  %v1235_v40 = vshll.u32 %v4521_v20, 16  ;;  %v4522_v43 = vld [vmem:[%s5796_s10 + $0xc8] sm:$0x1]  ;;  %v7105_v53 = vld [vmem:[%s5796_s10 + $0x70] sm:$0xf] }
 0x101   : > { %v5044_v26 = vpop.f32.mrf.mxu0  ;;  %v1649_v25 = vor.u32 %v1648_v10, %v1644_v29  ;;  %v1227_v24 = vrot.slane %v1225_v14, 5  ;;  %v7090_v17 = vadd.f32 %v5042_v1, %v5041_v51  ;;  %v7096_v8 = vadd.f32 %v5114_v62, %v5113_v11  ;;  %v5116_v20 = vpop.f32.mrf.mxu1 }
 0x102   : > { %3714 = vmatprep.mubr.bf16.mxu0 %v4729_v15  ;;  %v1640_v48 = vrot.slane %v1639_v16, 4  ;;  %v1237_v21 = vrot.slane %v1235_v40, 5  ;;  %v4554_v1 = vrot.slane %v4538_v31, 9  ;;  %v1434_v11 = vrot.slane %v6764_v34, 5  ;;  %v7111_v15 = vld [vmem:[%s5796_s10 + $0x74] sm:$0x1] }
 0x103   : > { %v5045_v58 = vpop.f32.mrf.mxu0  ;;  %v1650_v39 = vrot.slane %v1649_v25, 4  ;;  %7892 = vst [vmem:[#allocation3_spill] sm:$0xff] %v7096_v8  ;;  %v1228_v19 = vsel %vm5839_vm2, %v1223_v50, %v1227_v24  ;;  %v1232_v51 = vor.u32 %v1231_v47, %v1227_v24  ;;  %v5117_v10 = vpop.f32.mrf.mxu1  ;;  %v1437_v49 = vrot.slane %v4522_v43, 5 }
 0x104   : > { %v7098_v63 = vadd.f32 %v5045_v58, %v5044_v26  ;;  %v1645_v2 = vsel %vm5839_vm2, %v1640_v48, %v1644_v29  ;;  %v1657_v16 = vshrl.u32 %v7094_v22, 16  ;;  %v7114_v25 = vadd.f32 %v5117_v10, %v5116_v20 }
 0x105   : > { %v1655_v18 = vsel %vm5839_vm2, %v1650_v39, %v1654_v52  ;;  %v1233_v26 = vrot.slane %v1232_v51, 4  ;;  %v1660_v50 = vshll.u32 %v7094_v22, 16  ;;  %v1435_v47 = vsel %vm6037_vm5, %v4554_v1, %v1434_v11 }
 0x106   : > { %v5047_v14 = vpop.f32.mrf.mxu0  ;;  %v4753_v29 = vcombine.low %v1645_v2, %v1655_v18  ;;  %7893 = vst [vmem:[#allocation4_spill] sm:$0xff] %v7114_v25  ;;  %v1436_v40 = vrot.slane %v1434_v11, 4  ;;  %v1659_v52 = vrot.slane %v1657_v16, 4  ;;  %v1666_v62 = vshll.u32 %v7105_v53, 16 }
 0x107   : > { %v1238_v48 = vsel %vm5839_vm2, %v1233_v26, %v1237_v21  ;;  %v1662_v24 = vrot.slane %v1660_v50, 5  ;;  %v1670_v58 = vshrl.u32 %v7105_v53, 16  ;;  %v1676_v39 = vshll.u32 %v7111_v15, 16 }
 0x108   : > { %v5048_v31 = vpop.f32.mrf.mxu0  ;;  %3811 = vmatprep.mubr.bf16.mxu1 %v4753_v29  ;;  %v4713_v20 = vcombine.low %v1228_v19, %v1238_v48  ;;  %v1438_v2 = vsel %vm6037_vm5, %v1436_v40, %v1437_v49  ;;  %v1668_v51 = vrot.slane %v1666_v62, 5  ;;  %v5119_v18 = vpop.f32.mrf.mxu1  ;;  %v1246_v26 = vor.u32 %v6781_v33, %v6779_v54  ;;  %v7133_v62 = vld [vmem:[%s5796_s10 + $0x78] sm:$0xf]  ;;  %v7140_v54 = vld [vmem:[%s5796_s10 + $0x7c] sm:$0xf] }
 0x109   : > { %3812 = vmatmul.mubr.bf16.gmra.mxu1 %v4737_v23  ;;  %v4730_v11 = vcombine.low %v1435_v47, %v1438_v2  ;;  %v1663_v16 = vor.u32 %v1662_v24, %v1659_v52  ;;  %v1672_v21 = vrot.slane %v1670_v58, 4  ;;  %v1678_v29 = vrot.slane %v1676_v39, 5 }
 0x10a   : > { %v5050_v10 = vpop.f32.mrf.mxu0  ;;  %3715 = vmatmul.mubr.bf16.gmra.mxu0 %v4713_v20  ;;  %v1249_v23 = vshll.u32 %v6764_v34, 16  ;;  %v1255_v19 = vrot.slane %v1253_v28, 4  ;;  %v1259_v49 = vshll.u32 %v4522_v43, 16  ;;  %v5120_v50 = vpop.f32.mrf.mxu1  ;;  %v4738_v48 = vcombine.low %v7094_v22, %v7105_v53 }
 0x10b   : > { %3722 = vmatprep.mubr.bf16.mxu0 %v4730_v11  ;;  %v1664_v47 = vrot.slane %v1663_v16, 4  ;;  %v1673_v52 = vor.u32 %v1672_v21, %v1668_v51  ;;  %v7137_v24 = vadd.f32 %v5048_v31, %v5047_v14  ;;  %v1247_v33 = vrot.slane %v1246_v26, 4  ;;  %v7152_v16 = vld [vmem:[%s5796_s10 + $0x80] sm:$0x1]  ;;  %v4603_v26 = vld [vmem:[%s5796_s10 + $0x18] sm:$0xe] }
 0x10c   : > { %v5051_v40 = vpop.f32.mrf.mxu0  ;;  %v1251_v34 = vrot.slane %v1249_v23, 5  ;;  %v1261_v28 = vrot.slane %v1259_v49, 5  ;;  %v7142_v43 = vadd.f32 %v5120_v50, %v5119_v18  ;;  %v5122_v58 = vpop.f32.mrf.mxu1  ;;  %v1681_v11 = vshrl.u32 %v7133_v62, 16 }
 0x10d   : > { %v1669_v39 = vsel %vm5839_vm2, %v1664_v47, %v1668_v51  ;;  %v1674_v20 = vrot.slane %v1673_v52, 4  ;;  %v7146_v2 = vadd.f32 %v5051_v40, %v5050_v10  ;;  %v1684_v21 = vshll.u32 %v7133_v62, 16 }
 0x10e   : > { %7894 = vst [vmem:[#allocation5_spill] sm:$0xff] %v7142_v43  ;;  %v1252_v22 = vsel %vm5839_vm2, %v1247_v33, %v1251_v34  ;;  %v1256_v14 = vor.u32 %v1255_v19, %v1251_v34  ;;  %v5123_v31 = vpop.f32.mrf.mxu1  ;;  %v1690_v18 = vshll.u32 %v7140_v54, 16  ;;  %v1683_v23 = vrot.slane %v1681_v11, 4 }
 0x10f   : > { %v1679_v51 = vsel %vm5839_vm2, %v1674_v20, %v1678_v29  ;;  %v7159_v10 = vadd.f32 %v5123_v31, %v5122_v58  ;;  %v1694_v49 = vshrl.u32 %v7140_v54, 16  ;;  %v5053_v50 = vpop.f32.mrf.mxu0  ;;  %v1686_v47 = vrot.slane %v1684_v21, 5  ;;  %v7171_v31 = vld [vmem:[%s5796_s10 + $0x84] sm:$0xf] }
 0x110   : > { %v4754_v40 = vcombine.low %v1669_v39, %v1679_v51  ;;  %v1257_v19 = vrot.slane %v1256_v14, 4  ;;  %v1692_v52 = vrot.slane %v1690_v18, 5  ;;  %v5141_v33 = vpop.f32.mrf.mxu1  ;;  %v1700_v1 = vshll.u32 %v7152_v16, 16 }
 0x111   : > { %7895 = vst [vmem:[#allocation6_spill] sm:$0xff] %v7159_v10  ;;  %v1696_v34 = vrot.slane %v1694_v49, 4  ;;  %v4619_v3 = vrot.slane %v4603_v26, 9  ;;  %v5054_v29 = vpop.f32.mrf.mxu0  ;;  %v1687_v20 = vor.u32 %v1686_v47, %v1683_v23  ;;  %v1941_v39 = vrot.slane %v6813_v12, 5 }
 0x112   : > { %3819 = vmatprep.mubr.bf16.mxu1 %v4754_v40  ;;  %v1262_v58 = vsel %vm5839_vm2, %v1257_v19, %v1261_v28  ;;  %v4739_v11 = vcombine.low %v7133_v62, %v7140_v54  ;;  %v5142_v14 = vpop.f32.mrf.mxu1  ;;  %v1702_v26 = vrot.slane %v1700_v1, 5  ;;  %v1940_v28 = vrot.slane %v1938_v30, 4 }
 0x113   : > { %v4714_v21 = vcombine.low %v1252_v22, %v1262_v58  ;;  %3820 = vmatmul.mubr.bf16.gmra.mxu1 %v4738_v48  ;;  %v1697_v18 = vor.u32 %v1696_v34, %v1692_v52  ;;  %v1939_v0 = vsel %vm6037_vm5, %v4619_v3, %v1938_v30  ;;  %v5056_v51 = vpop.f32.mrf.mxu0  ;;  %v1688_v49 = vrot.slane %v1687_v20, 4 }
 0x114   : > { %v4620_v23 = vrot.slane %v4604_v4, 9  ;;  %v7175_v12 = vadd.f32 %v5054_v29, %v5053_v50  ;;  %v5144_v40 = vpop.f32.mrf.mxu1  ;;  %v5143_v19 = vadd.f32 %v5142_v14, %v5141_v33  ;;  %v1705_v48 = vshrl.u32 %v7171_v31, 16  ;;  %v7190_v33 = vld [vmem:[%s5796_s10 + $0x88] sm:$0xf]  ;;  %v7193_v29 = vld [vmem:[%s5796_s10 + $0x8c] sm:$0x1] }
 0x115   : > { %3723 = vmatmul.mubr.bf16.gmra.mxu0 %v4714_v21  ;;  %v1698_v62 = vrot.slane %v1697_v18, 4  ;;  %v5057_v22 = vpop.f32.mrf.mxu0  ;;  %v1708_v1 = vshll.u32 %v7171_v31, 16  ;;  %v1693_v3 = vsel %vm5839_vm2, %v1688_v49, %v1692_v52  ;;  %v1942_v30 = vsel %vm6037_vm5, %v1940_v28, %v1941_v39 }
 0x116   : > { %v7896_v4 = vrot.slane %v6845_v6, 5  ;;  %v7187_v47 = vadd.f32 %v5057_v22, %v5056_v51  ;;  %v5145_v34 = vpop.f32.mrf.mxu1  ;;  %v4763_v20 = vcombine.low %v1939_v0, %v1942_v30  ;;  %v7199_v39 = vadd.f32 %v5143_v19, %v7004_v41  ;;  %v4605_v6 = vld [vmem:[%s5796_s10 + $0x30] sm:$0xe]  ;;  %v4606_v19 = vld [vmem:[%s5796_s10 + $0x3c] sm:$0xe] }
 0x117   : > { %v1703_v58 = vsel %vm5839_vm2, %v1698_v62, %v1702_v26  ;;  %v5146_v21 = vadd.f32 %v5145_v34, %v5144_v40  ;;  %v1707_v18 = vrot.slane %v1705_v48, 4  ;;  %v1710_v51 = vrot.slane %v1708_v1, 5  ;;  %v5059_v49 = vpop.f32.mrf.mxu0  ;;  %v7213_v34 = vld [vmem:[%s5796_s10 + $0x90] sm:$0xf] }
 0x118   : > { %v1946_v50 = vsel %vm6037_vm5, %v4620_v23, %v7896_v4  ;;  %v4755_v14 = vcombine.low %v1693_v3, %v1703_v58  ;;  %v5147_v28 = vpop.f32.mrf.mxu1  ;;  %5501 = vmatprep.mubr.bf16.mxu0 %v4763_v20  ;;  %v1714_v23 = vshll.u32 %v7190_v33, 16  ;;  %v1718_v22 = vshrl.u32 %v7190_v33, 16 }
 0x119   : > { %v4764_v52 = vcombine.low %v1946_v50, %v6876_v55  ;;  %v1724_v26 = vshll.u32 %v7193_v29, 16  ;;  %v7207_v41 = vadd.f32 %v5146_v21, %v7011_v44  ;;  %v1711_v0 = vor.u32 %v1710_v51, %v1707_v18  ;;  %v5060_v48 = vpop.f32.mrf.mxu0 }
 0x11a   : > { %3827 = vmatprep.mubr.bf16.mxu1 %v4755_v14  ;;  %v4621_v40 = vrot.slane %v4605_v6, 9  ;;  %v1952_v62 = vrot.slane %v6888_v61, 5  ;;  %v5148_v1 = vpop.f32.mrf.mxu1  ;;  %v1716_v3 = vrot.slane %v1714_v23, 5  ;;  %v1720_v30 = vrot.slane %v1718_v22, 4 }
 0x11b   : > { %3828 = vmatmul.mubr.bf16.gmra.mxu1 %v4739_v11  ;;  %v1726_v4 = vrot.slane %v1724_v26, 5  ;;  %v1955_v50 = vrot.slane %v6893_v42, 5  ;;  %v1712_v58 = vrot.slane %v1711_v0, 4  ;;  %v4740_v61 = vcombine.low %v7171_v31, %v7190_v33  ;;  %v5062_v6 = vpop.f32.mrf.mxu0  ;;  %v7227_v0 = vld [vmem:[%s5796_s10 + $0x94] sm:$0xf] }
 0x11c   : > { %v1953_v44 = vsel %vm6037_vm5, %v4621_v40, %v1952_v62  ;;  %v1954_v20 = vrot.slane %v1952_v62, 4  ;;  %v5150_v14 = vpop.f32.mrf.mxu1  ;;  %v1721_v11 = vor.u32 %v1720_v30, %v1716_v3  ;;  %v4622_v21 = vrot.slane %v4606_v19, 9  ;;  %v4607_v30 = vld [vmem:[%s5796_s10 + $0x48] sm:$0xe] }
 0x11d   : > { %5502 = vmatmul.mubr.bf16.vlgmr.msra.gmra.mxu0 %v4764_v52  ;;  %v1959_v18 = vrot.slane %v6925_v57, 5  ;;  %v7220_v42 = vadd.f32 %v5060_v48, %v5059_v49  ;;  %v1717_v51 = vsel %vm5839_vm2, %v1712_v58, %v1716_v3  ;;  %v5149_v22 = vadd.f32 %v5148_v1, %v5147_v28  ;;  %v5063_v26 = vpop.f32.mrf.mxu0  ;;  %v7238_v28 = vld [vmem:[%s5796_s10 + $0x98] sm:$0x1] }
 0x11e   : > { %v1956_v23 = vsel %vm6037_vm5, %v1954_v20, %v1955_v50  ;;  %v5151_v31 = vpop.f32.mrf.mxu1  ;;  %v1729_v52 = vshrl.u32 %v7213_v34, 16  ;;  %v1722_v40 = vrot.slane %v1721_v11, 4  ;;  %v7235_v48 = vadd.f32 %v5063_v26, %v5062_v6 }
 0x11f   : > { %v4765_v62 = vcombine.low %v1953_v44, %v1956_v23  ;;  %v1960_v57 = vsel %vm6037_vm5, %v4622_v21, %v1959_v18  ;;  %v1961_v49 = vrot.slane %v1959_v18, 4  ;;  %v7233_v19 = vadd.f32 %v5149_v22, %v7046_v32  ;;  %v5065_v50 = vpop.f32.mrf.mxu0  ;;  %v4608_v22 = vld [vmem:[%s5796_s10 + $0x54] sm:$0xe] }
 0x120   : > { %v5152_v3 = vadd.f32 %v5151_v31, %v5150_v14  ;;  %v1731_v1 = vrot.slane %v1729_v52, 4  ;;  %v5153_v58 = vpop.f32.mrf.mxu1  ;;  %v1727_v44 = vsel %vm5839_vm2, %v1722_v40, %v1726_v4  ;;  %v7897_v20 = vrot.slane %v6936_v45, 5 }
 0x121   : > { %5505 = vmatprep.mubr.bf16.mxu0 %v4765_v62  ;;  %v1732_v6 = vshll.u32 %v7213_v34, 16  ;;  %v1738_v11 = vshll.u32 %v7227_v0, 16  ;;  %v4756_v14 = vcombine.low %v1717_v51, %v1727_v44  ;;  %v1742_v23 = vshrl.u32 %v7227_v0, 16  ;;  %v5066_v26 = vpop.f32.mrf.mxu0 }
 0x122   : > { %v1963_v32 = vsel %vm6037_vm5, %v1961_v49, %v7897_v20  ;;  %v7250_v18 = vadd.f32 %v5152_v3, %v7056_v46  ;;  %v5154_v4 = vpop.f32.mrf.mxu1  ;;  %v1748_v45 = vshll.u32 %v7238_v28, 16  ;;  %v4623_v40 = vrot.slane %v4607_v30, 9 }
 0x123   : > { %v4766_v21 = vcombine.low %v1960_v57, %v1963_v32  ;;  %v1734_v31 = vrot.slane %v1732_v6, 5  ;;  %v1740_v52 = vrot.slane %v1738_v11, 5  ;;  %3835 = vmatprep.mubr.bf16.mxu1 %v4756_v14  ;;  %v1744_v62 = vrot.slane %v1742_v23, 4  ;;  %v5068_v57 = vpop.f32.mrf.mxu0 }
 0x124   : > { %v1966_v49 = vrot.slane %v6962_v37, 5  ;;  %v1969_v51 = vrot.slane %v6971_v56, 5  ;;  %v4741_v46 = vcombine.low %v7213_v34, %v7227_v0  ;;  %v5156_v3 = vpop.f32.mrf.mxu1  ;;  %3836 = vmatmul.mubr.bf16.gmra.mxu1 %v4740_v61  ;;  %v1750_v20 = vrot.slane %v1748_v45, 5 }
 0x125   : > { %5506 = vmatmul.mubr.bf16.gmra.mxu0 %v4766_v21  ;;  %v1735_v44 = vor.u32 %v1734_v31, %v1731_v1  ;;  %v4624_v32 = vrot.slane %v4608_v22, 9  ;;  %v1973_v6 = vrot.slane %v7014_v7, 5  ;;  %v1745_v30 = vor.u32 %v1744_v62, %v1740_v52  ;;  %v5069_v14 = vpop.f32.mrf.mxu0  ;;  %v7267_v22 = vld [vmem:[%s5796_s10 + $0x9c] sm:$0xf] }
 0x126   : > { %v1967_v37 = vsel %vm6037_vm5, %v4623_v40, %v1966_v49  ;;  %v1968_v11 = vrot.slane %v1966_v49, 4  ;;  %v7262_v56 = vadd.f32 %v5066_v26, %v5065_v50  ;;  %v5157_v34 = vpop.f32.mrf.mxu1  ;;  %v5155_v21 = vadd.f32 %v5154_v4, %v5153_v58  ;;  %v7274_v26 = vld [vmem:[%s5796_s10 + $0xa0] sm:$0xf] }
 0x127   : > { %v1736_v23 = vrot.slane %v1735_v44, 4  ;;  %v1974_v61 = vsel %vm6037_vm5, %v4624_v32, %v1973_v6  ;;  %v1975_v1 = vrot.slane %v1973_v6, 4  ;;  %v1746_v7 = vrot.slane %v1745_v30, 4  ;;  %v5071_v40 = vpop.f32.mrf.mxu0 }
 0x128   : > { %v1970_v31 = vsel %vm6037_vm5, %v1968_v11, %v1969_v51  ;;  %v7271_v45 = vadd.f32 %v5069_v14, %v5068_v57  ;;  %v5158_v50 = vadd.f32 %v5157_v34, %v5156_v3  ;;  %v5159_v62 = vpop.f32.mrf.mxu1  ;;  %v7898_v32 = vrot.slane %v7023_v59, 5  ;;  %v7286_v51 = vld [vmem:[%s5796_s10 + $0xa4] sm:$0x1]  ;;  %v4609_v57 = vld [vmem:[%s5796_s10 + $0x60] sm:$0xe] }
 0x129   : > { %v1741_v49 = vsel %vm5839_vm2, %v1736_v23, %v1740_v52  ;;  %v4767_v44 = vcombine.low %v1967_v37, %v1970_v31  ;;  %v7283_v4 = vadd.f32 %v5155_v21, %v7090_v17  ;;  %v1751_v3 = vsel %vm5839_vm2, %v1746_v7, %v1750_v20  ;;  %v5072_v59 = vpop.f32.mrf.mxu0  ;;  %v4610_v23 = vld [vmem:[%s5796_s10 + $0x6c] sm:$0xe] }
 0x12a   : > { %v1977_v58 = vsel %vm6037_vm5, %v1975_v1, %v7898_v32  ;;  %v7292_v30 = vadd.f32 %v5158_v50, %v7098_v63  ;;  %v1753_v52 = vshrl.u32 %v7267_v22, 16  ;;  %v5160_v37 = vpop.f32.mrf.mxu1  ;;  %v4757_v11 = vcombine.low %v1741_v49, %v1751_v3 }
 0x12b   : > { %v4768_v6 = vcombine.low %v1974_v61, %v1977_v58  ;;  %5509 = vmatprep.mubr.bf16.mxu0 %v4767_v44  ;;  %v1756_v14 = vshll.u32 %v7267_v22, 16  ;;  %v1762_v17 = vshll.u32 %v7274_v26, 16  ;;  %v1766_v34 = vshrl.u32 %v7274_v26, 16  ;;  %v5074_v21 = vpop.f32.mrf.mxu0 }
 0x12c   : > { %v1755_v1 = vrot.slane %v1753_v52, 4  ;;  %v1772_v20 = vshll.u32 %v7286_v51, 16  ;;  %v4625_v63 = vrot.slane %v4609_v57, 9  ;;  %v5162_v7 = vpop.f32.mrf.mxu1  ;;  %3843 = vmatprep.mubr.bf16.mxu1 %v4757_v11  ;;  %v1980_v44 = vrot.slane %v7059_v36, 5 }
 0x12d   : > { %5510 = vmatmul.mubr.bf16.gmra.mxu0 %v4768_v6  ;;  %v1758_v31 = vrot.slane %v1756_v14, 5  ;;  %v1764_v50 = vrot.slane %v1762_v17, 5  ;;  %v1768_v49 = vrot.slane %v1766_v34, 4  ;;  %3844 = vmatmul.mubr.bf16.gmra.mxu1 %v4741_v46  ;;  %v1983_v58 = vrot.slane %v7069_v13, 5  ;;  %v5075_v61 = vpop.f32.mrf.mxu0  ;;  %v7313_v34 = vld [vmem:[%s5796_s10 + $0xa8] sm:$0xf] }
 0x12e   : > { %v1774_v32 = vrot.slane %v1772_v20, 5  ;;  %v4742_v3 = vcombine.low %v7267_v22, %v7274_v26  ;;  %v4626_v52 = vrot.slane %v4610_v23, 9  ;;  %v5163_v57 = vpop.f32.mrf.mxu1  ;;  %v1981_v6 = vsel %vm6037_vm5, %v4625_v63, %v1980_v44 }
 0x12f   : > { %v1759_v55 = vor.u32 %v1758_v31, %v1755_v1  ;;  %v1769_v11 = vor.u32 %v1768_v49, %v1764_v50  ;;  %v1982_v14 = vrot.slane %v1980_v44, 4  ;;  %v1987_v36 = vrot.slane %v7105_v53, 5  ;;  %v5077_v22 = vpop.f32.mrf.mxu0  ;;  %v7318_v49 = vld [vmem:[%s5796_s10 + $0xac] sm:$0xf] }
 0x130   : > { %v7308_v46 = vadd.f32 %v5072_v59, %v5071_v40  ;;  %v5161_v17 = vadd.f32 %v5160_v37, %v5159_v62  ;;  %v7310_v13 = vadd.f32 %v5075_v61, %v5074_v21  ;;  %v5165_v23 = vpop.f32.mrf.mxu1  ;;  %v5164_v63 = vadd.f32 %v5163_v57, %v5162_v7  ;;  %v7326_v37 = vld [vmem:[%s5796_s10 + $0xb0] sm:$0x1] }
 0x131   : > { %v1760_v20 = vrot.slane %v1759_v55, 4  ;;  %v1770_v1 = vrot.slane %v1769_v11, 4  ;;  %v1984_v31 = vsel %vm6037_vm5, %v1982_v14, %v1983_v58  ;;  %v1988_v40 = vsel %vm6037_vm5, %v4626_v52, %v1987_v36  ;;  %v5078_v61 = vpop.f32.mrf.mxu0  ;;  %v4611_v52 = vld [vmem:[%s5796_s10 + $0x78] sm:$0xe] }
 0x132   : > { %v4769_v53 = vcombine.low %v1981_v6, %v1984_v31  ;;  %v1989_v62 = vrot.slane %v1987_v36, 4  ;;  %v7323_v59 = vadd.f32 %v5161_v17, %v7137_v24  ;;  %v5166_v55 = vpop.f32.mrf.mxu1  ;;  %v7333_v44 = vadd.f32 %v5164_v63, %v7146_v2 }
 0x133   : > { %v1765_v21 = vsel %vm5839_vm2, %v1760_v20, %v1764_v50  ;;  %v1775_v7 = vsel %vm5839_vm2, %v1770_v1, %v1774_v32  ;;  %v1777_v58 = vshrl.u32 %v7313_v34, 16  ;;  %v7899_v24 = vrot.slane %v7111_v15, 5  ;;  %v5080_v14 = vpop.f32.mrf.mxu0  ;;  %v4612_v1 = vld [vmem:[%s5796_s10 + $0x84] sm:$0xe] }
 0x134   : > { %v4758_v57 = vcombine.low %v1765_v21, %v1775_v7  ;;  %5513 = vmatprep.mubr.bf16.mxu0 %v4769_v53  ;;  %v1780_v6 = vshll.u32 %v7313_v34, 16  ;;  %v1786_v50 = vshll.u32 %v7318_v49, 16  ;;  %v5168_v36 = vpop.f32.mrf.mxu1  ;;  %v1790_v2 = vshrl.u32 %v7318_v49, 16 }
 0x135   : > { %v1991_v11 = vsel %vm6037_vm5, %v1989_v62, %v7899_v24  ;;  %v1779_v17 = vrot.slane %v1777_v58, 4  ;;  %v1796_v20 = vshll.u32 %v7326_v37, 16  ;;  %v4627_v15 = vrot.slane %v4611_v52, 9  ;;  %v5081_v62 = vpop.f32.mrf.mxu0 }
 0x136   : > { %v4770_v32 = vcombine.low %v1988_v40, %v1991_v11  ;;  %3851 = vmatprep.mubr.bf16.mxu1 %v4758_v57  ;;  %v1782_v31 = vrot.slane %v1780_v6, 5  ;;  %v1788_v63 = vrot.slane %v1786_v50, 5  ;;  %v1994_v53 = vrot.slane %v7140_v54, 5  ;;  %v5169_v21 = vpop.f32.mrf.mxu1 }
 0x137   : > { %3852 = vmatmul.mubr.bf16.gmra.mxu1 %v4742_v3  ;;  %v1792_v7 = vrot.slane %v1790_v2, 4  ;;  %v1798_v24 = vrot.slane %v1796_v20, 5  ;;  %v1997_v40 = vrot.slane %v7152_v16, 5  ;;  %v4743_v58 = vcombine.low %v7313_v34, %v7318_v49  ;;  %v5083_v54 = vpop.f32.mrf.mxu0  ;;  %v7356_v16 = vld [vmem:[%s5796_s10 + $0xb4] sm:$0xf] }
 0x138   : > { %5514 = vmatmul.mubr.bf16.gmra.mxu0 %v4770_v32  ;;  %v1783_v11 = vor.u32 %v1782_v31, %v1779_v17  ;;  %v1995_v57 = vsel %vm6037_vm5, %v4627_v15, %v1994_v53  ;;  %v1996_v52 = vrot.slane %v1994_v53, 4  ;;  %v4628_v6 = vrot.slane %v4612_v1, 9  ;;  %v5171_v50 = vpop.f32.mrf.mxu1  ;;  %v7363_v15 = vld [vmem:[%s5796_s10 + $0xb8] sm:$0xf] }
 0x139   : > { %v1793_v10 = vor.u32 %v1792_v7, %v1788_v63  ;;  %v2001_v3 = vrot.slane %v7190_v33, 5  ;;  %v7353_v32 = vadd.f32 %v5078_v61, %v5077_v22  ;;  %v5167_v2 = vadd.f32 %v5166_v55, %v5165_v23  ;;  %v5084_v1 = vpop.f32.mrf.mxu0 }
 0x13a   : > { %v1784_v20 = vrot.slane %v1783_v11, 4  ;;  %v1998_v34 = vsel %vm6037_vm5, %v1996_v52, %v1997_v40  ;;  %v7360_v17 = vadd.f32 %v5081_v62, %v5080_v14  ;;  %v5170_v31 = vadd.f32 %v5169_v21, %v5168_v36  ;;  %v5172_v53 = vpop.f32.mrf.mxu1  ;;  %v7376_v36 = vld [vmem:[%s5796_s10 + $0xbc] sm:$0x1] }
 0x13b   : > { %v1794_v7 = vrot.slane %v1793_v10, 4  ;;  %v4771_v33 = vcombine.low %v1995_v57, %v1998_v34  ;;  %v2002_v22 = vsel %vm6037_vm5, %v4628_v6, %v2001_v3  ;;  %v2003_v23 = vrot.slane %v2001_v3, 4  ;;  %v5086_v62 = vpop.f32.mrf.mxu0  ;;  %v4613_v57 = vld [vmem:[%s5796_s10 + $0x90] sm:$0xe] }
 0x13c   : > { %v1789_v61 = vsel %vm5839_vm2, %v1784_v20, %v1788_v63  ;;  %v7370_v55 = vadd.f32 %v5167_v2, %v7175_v12  ;;  %v7373_v14 = vadd.f32 %v5170_v31, %v7187_v47  ;;  %v1801_v10 = vshrl.u32 %v7356_v16, 16  ;;  %v5174_v21 = vpop.f32.mrf.mxu1  ;;  %v4614_v20 = vld [vmem:[%s5796_s10 + $0x9c] sm:$0xe] }
 0x13d   : > { %v1799_v40 = vsel %vm5839_vm2, %v1794_v7, %v1798_v24  ;;  %5517 = vmatprep.mubr.bf16.mxu0 %v4771_v33  ;;  %v7900_v11 = vrot.slane %v7193_v29, 5  ;;  %v1804_v63 = vshll.u32 %v7356_v16, 16  ;;  %v1810_v47 = vshll.u32 %v7363_v15, 16  ;;  %v5087_v34 = vpop.f32.mrf.mxu0 }
 0x13e   : > { %v4759_v52 = vcombine.low %v1789_v61, %v1799_v40  ;;  %v1803_v3 = vrot.slane %v1801_v10, 4  ;;  %v1814_v2 = vshrl.u32 %v7363_v15, 16  ;;  %v5175_v31 = vpop.f32.mrf.mxu1  ;;  %v1820_v29 = vshll.u32 %v7376_v36, 16 }
 0x13f   : > { %v2005_v12 = vsel %vm6037_vm5, %v2003_v23, %v7900_v11  ;;  %v1806_v24 = vrot.slane %v1804_v63, 5  ;;  %v1812_v7 = vrot.slane %v1810_v47, 5  ;;  %v4629_v11 = vrot.slane %v4613_v57, 9  ;;  %v7394_v61 = vpop.f32.mrf.mxu0 }
 0x140   : > { %v4772_v6 = vcombine.low %v2002_v22, %v2005_v12  ;;  %3859 = vmatprep.mubr.bf16.mxu1 %v4759_v52  ;;  %v1816_v23 = vrot.slane %v1814_v2, 4  ;;  %v2008_v43 = vrot.slane %v7227_v0, 5  ;;  %v2011_v22 = vrot.slane %v7238_v28, 5  ;;  %v7396_v10 = vpop.f32.mrf.mxu1 }
 0x141   : > { %3860 = vmatmul.mubr.bf16.gmra.mxu1 %v4743_v58  ;;  %v1807_v40 = vor.u32 %v1806_v24, %v1803_v3  ;;  %v1822_v12 = vrot.slane %v1820_v29, 5  ;;  %v4744_v63 = vcombine.low %v7356_v16, %v7363_v15  ;;  %v4630_v47 = vrot.slane %v4614_v20, 9  ;;  %v7408_v24 = vld [vmem:[%s5796_s10 + $0xc0] sm:$0xf]  ;;  %v7415_v29 = vld [vmem:[%s5796_s10 + $0xc4] sm:$0xf] }
 0x142   : > { %5518 = vmatmul.mubr.bf16.gmra.mxu0 %v4772_v6  ;;  %v1817_v52 = vor.u32 %v1816_v23, %v1812_v7  ;;  %v2009_v57 = vsel %vm6037_vm5, %v4629_v11, %v2008_v43  ;;  %v2010_v0 = vrot.slane %v2008_v43, 4  ;;  %v2015_v28 = vrot.slane %v7274_v26, 5  ;;  %v5090_v6 = vpop.f32.mrf.mxu0  ;;  %v5178_v2 = vpop.f32.mrf.mxu1 }
 0x143   : > { %v1808_v33 = vrot.slane %v1807_v40, 4  ;;  %v7403_v25 = vadd.f32 %v5084_v1, %v5083_v54  ;;  %v5173_v58 = vadd.f32 %v5172_v53, %v5171_v50  ;;  %v7405_v3 = vadd.f32 %v5087_v34, %v5086_v62  ;;  %v7423_v62 = vld [vmem:[%s5796_s10 + $0xc8] sm:$0x1] }
 0x144   : > { %v1818_v16 = vrot.slane %v1817_v52, 4  ;;  %v2012_v20 = vsel %vm6037_vm5, %v2010_v0, %v2011_v22  ;;  %v2016_v43 = vsel %vm6037_vm5, %v4630_v47, %v2015_v28  ;;  %v2017_v26 = vrot.slane %v2015_v28, 4  ;;  %v5092_v23 = vpop.f32.mrf.mxu0  ;;  %v5180_v11 = vpop.f32.mrf.mxu1 }
 0x145   : > { %v1813_v54 = vsel %vm5839_vm2, %v1808_v33, %v1812_v7  ;;  %v4773_v50 = vcombine.low %v2009_v57, %v2012_v20  ;;  %v7420_v1 = vadd.f32 %v5173_v58, %v7220_v42  ;;  %v5176_v53 = vadd.f32 %v5175_v31, %v5174_v21  ;;  %v4615_v33 = vld [vmem:[%s5796_s10 + $0xa8] sm:$0xe] }
 0x146   : > { %v1823_v34 = vsel %vm5839_vm2, %v1818_v16, %v1822_v12  ;;  %v7901_v22 = vrot.slane %v7286_v51, 5  ;;  %v1825_v47 = vshrl.u32 %v7408_v24, 16  ;;  %v1828_v7 = vshll.u32 %v7408_v24, 16  ;;  %v5093_v52 = vpop.f32.mrf.mxu0  ;;  %v5181_v42 = vpop.f32.mrf.mxu1  ;;  %v4616_v16 = vld [vmem:[%s5796_s10 + $0xb4] sm:$0xe] }
 0x147   : > { %v4760_v57 = vcombine.low %v1813_v54, %v1823_v34  ;;  %5521 = vmatprep.mubr.bf16.mxu0 %v4773_v50  ;;  %v7435_v31 = vadd.f32 %v5176_v53, %v7235_v48  ;;  %v1834_v12 = vshll.u32 %v7415_v29, 16  ;;  %v1838_v28 = vshrl.u32 %v7415_v29, 16 }
 0x148   : > { %v2019_v40 = vsel %vm6037_vm5, %v2017_v26, %v7901_v22  ;;  %v1827_v51 = vrot.slane %v1825_v47, 4  ;;  %v1830_v0 = vrot.slane %v1828_v7, 5  ;;  %v1844_v58 = vshll.u32 %v7423_v62, 16  ;;  %v7441_v20 = vpop.f32.mrf.mxu0  ;;  %v7443_v26 = vpop.f32.mrf.mxu1 }
 0x149   : > { %v4774_v21 = vcombine.low %v2016_v43, %v2019_v40  ;;  %7902 = vst [vmem:[#allocation7_spill] sm:$0xff] %v7435_v31  ;;  %3867 = vmatprep.mubr.bf16.mxu1 %v4760_v57  ;;  %v1836_v54 = vrot.slane %v1834_v12, 5  ;;  %v4631_v43 = vrot.slane %v4615_v33, 9  ;;  %v2022_v48 = vrot.slane %v7318_v49, 5 }
 0x14a   : > { %v2025_v50 = vrot.slane %v7326_v37, 5  ;;  %3868 = vmatmul.mubr.bf16.gmra.mxu1 %v4744_v63  ;;  %v1831_v53 = vor.u32 %v1830_v0, %v1827_v51  ;;  %v1840_v34 = vrot.slane %v1838_v28, 4  ;;  %v1846_v22 = vrot.slane %v1844_v58, 5  ;;  %v7449_v47 = vpop.f32.mrf.mxu0  ;;  %v7451_v7 = vpop.f32.mrf.mxu1 }
 0x14b   : > { %5522 = vmatmul.mubr.bf16.gmra.mxu0 %v4774_v21  ;;  %v4745_v40 = vcombine.low %v7408_v24, %v7415_v29  ;;  %v2023_v33 = vsel %vm6037_vm5, %v4631_v43, %v2022_v48  ;;  %v2024_v57 = vrot.slane %v2022_v48, 4  ;;  %v4632_v49 = vrot.slane %v4616_v16, 9  ;;  %v7461_v24 = vld [vmem:[%s5796_s10 + $0xcc] sm:$0xf]  ;;  %v7472_v48 = vld [vmem:[%s5796_s10 + $0xd0] sm:$0xf] }
 0x14c   : > { %v2029_v37 = vrot.slane %v7363_v15, 5  ;;  %v1832_v21 = vrot.slane %v1831_v53, 4  ;;  %v1841_v63 = vor.u32 %v1840_v34, %v1836_v54  ;;  %v7457_v12 = vadd.f32 %v5090_v6, %v7394_v61  ;;  %v5098_v0 = vpop.f32.mrf.mxu0  ;;  %v7463_v28 = vpop.f32.mrf.mxu1 }
 0x14d   : > { %v5179_v51 = vadd.f32 %v5178_v2, %v7396_v10  ;;  %v2026_v58 = vsel %vm6037_vm5, %v2024_v57, %v2025_v50  ;;  %v7469_v43 = vadd.f32 %v5093_v52, %v5092_v23  ;;  %v7904_v50 = vrot.slane %v7376_v36, 5  ;;  %v4602_v52 = vld [vmem:[%s5796_s10 + $0xd4] sm:$0x1]  ;;  %v4617_v36 = vld [vmem:[%s5796_s10 + $0xc0] sm:$0xe] }
 0x14e   : > { %v2030_v16 = vsel %vm6037_vm5, %v4632_v49, %v2029_v37  ;;  %v2031_v15 = vrot.slane %v2029_v37, 4  ;;  %v1837_v61 = vsel %vm5839_vm2, %v1832_v21, %v1836_v54  ;;  %v1842_v10 = vrot.slane %v1841_v63, 4  ;;  %v5099_v53 = vpop.f32.mrf.mxu0  ;;  %v5187_v34 = vpop.f32.mrf.mxu1 }
 0x14f   : > { %v4775_v6 = vcombine.low %v2023_v33, %v2026_v58  ;;  %v7477_v2 = vadd.f32 %v5179_v51, %v7262_v56  ;;  %v5182_v23 = vadd.f32 %v5181_v42, %v5180_v11  ;;  %v1849_v49 = vshrl.u32 %v7461_v24, 16 }
 0x150   : > { %v2033_v57 = vsel %vm6037_vm5, %v2031_v15, %v7904_v50  ;;  %v1852_v54 = vshll.u32 %v7461_v24, 16  ;;  %v1847_v33 = vsel %vm5839_vm2, %v1842_v10, %v1846_v22  ;;  %v1858_v37 = vshll.u32 %v7472_v48, 16  ;;  %v5189_v63 = vpop.f32.mrf.mxu1  ;;  %v5253_v51 = vpop.f32.mrf.mxu0  ;;  %v4618_v50 = vld [vmem:[%s5796_s10 + $0xcc] sm:$0xe]  ;;  %s4885_s10 = sshll.u32 %s7943_s12, 7 }
 0x151   : > { %7903 = vst [vmem:[#allocation8_spill] sm:$0xff] %v7477_v2  ;;  %5525 = vmatprep.mubr.bf16.mxu0 %v4775_v6  ;;  %v4776_v56 = vcombine.low %v2030_v16, %v2033_v57  ;;  %v1862_v21 = vshrl.u32 %v7472_v48, 16  ;;  %v4761_v58 = vcombine.low %v1837_v61, %v1847_v33  ;;  %v7492_v11 = vadd.f32 %v5182_v23, %v7271_v45  ;;  %s7763_s6 = scalar_lea.vmem %s7875_s2, %s4885_s10 }
 0x152   : > { %v1851_v42 = vrot.slane %v1849_v49, 4  ;;  %v1854_v15 = vrot.slane %v1852_v54, 5  ;;  %v1860_v2 = vrot.slane %v1858_v37, 5  ;;  %v1868_v22 = vshll.u32 %v4602_v52, 16  ;;  %v5190_v16 = vpop.f32.mrf.mxu1  ;;  %v5254_v6 = vpop.f32.mrf.mxu0 }
 0x153   : > { %5526 = vmatmul.mubr.bf16.gmra.mxu0 %v4776_v56  ;;  %v1864_v8 = vrot.slane %v1862_v21, 4  ;;  %v2046_v10 = vrot.slane %v4602_v52, 5  ;;  %3875 = vmatprep.mubr.bf16.mxu1 %v4761_v58  ;;  %v4633_v31 = vrot.slane %v4617_v36, 9  ;;  %v2036_v38 = vrot.slane %v7415_v29, 5 }
 0x154   : > { %v1855_v57 = vor.u32 %v1854_v15, %v1851_v42  ;;  %v2039_v61 = vrot.slane %v7423_v62, 5  ;;  %3876 = vmatmul.mubr.bf16.gmra.mxu1 %v4745_v40  ;;  %v1870_v23 = vrot.slane %v1868_v22, 5  ;;  %v4746_v49 = vcombine.low %v7461_v24, %v7472_v48  ;;  %v5192_v33 = vpop.f32.mrf.mxu1  ;;  %v5256_v56 = vpop.f32.mrf.mxu0 }
 0x155   : > { %v1865_v45 = vor.u32 %v1864_v8, %v1860_v2  ;;  %v4634_v54 = vrot.slane %v4618_v50, 9  ;;  %v2037_v52 = vsel %vm6037_vm5, %v4633_v31, %v2036_v38  ;;  %v2038_v21 = vrot.slane %v2036_v38, 4 }
 0x156   : > { %v1856_v37 = vrot.slane %v1855_v57, 4  ;;  %v2043_v36 = vrot.slane %v7472_v48, 5  ;;  %v7504_v29 = vadd.f32 %v7449_v47, %v7441_v20  ;;  %v5185_v8 = vadd.f32 %v7451_v7, %v7443_v26  ;;  %v5193_v40 = vpop.f32.mrf.mxu1  ;;  %v5257_v24 = vpop.f32.mrf.mxu0 }
 0x157   : > { %v1866_v58 = vrot.slane %v1865_v45, 4  ;;  %v7508_v62 = vadd.f32 %v5099_v53, %v5098_v0  ;;  %v2040_v38 = vsel %vm6037_vm5, %v2038_v21, %v2039_v61  ;;  %v5188_v7 = vadd.f32 %v5187_v34, %v7463_v28 }
 0x158   : > { %v1861_v42 = vsel %vm5839_vm2, %v1856_v37, %v1860_v2  ;;  %v2044_v31 = vsel %vm6037_vm5, %v4634_v54, %v2043_v36  ;;  %v2045_v48 = vrot.slane %v2043_v36, 4  ;;  %v4777_v47 = vcombine.low %v2037_v52, %v2040_v38  ;;  %v5195_v0 = vpop.f32.mrf.mxu1  ;;  %v5259_v53 = vpop.f32.mrf.mxu0 }
 0x159   : > { %v1871_v20 = vsel %vm5839_vm2, %v1866_v58, %v1870_v23  ;;  %v7519_v26 = vadd.f32 %v5185_v8, %v7308_v46  ;;  %v5191_v50 = vadd.f32 %v5190_v16, %v5189_v63  ;;  %v5255_v22 = vadd.f32 %v5254_v6, %v5253_v51 }
 0x15a   : > { %v4762_v15 = vcombine.low %v1861_v42, %v1871_v20  ;;  %v2047_v2 = vsel %vm6037_vm5, %v2045_v48, %v2046_v10  ;;  %5529 = vmatprep.mubr.bf16.mxu0 %v4777_v47  ;;  %v7525_v61 = vadd.f32 %v5188_v7, %v7310_v13  ;;  %v5194_v35 = vadd.f32 %v5193_v40, %v5192_v33  ;;  %v5196_v23 = vpop.f32.mrf.mxu1  ;;  %v5260_v46 = vpop.f32.mrf.mxu0 }
 0x15b   : > { %v4778_v57 = vcombine.low %v2044_v31, %v2047_v2  ;;  %v5258_v45 = vadd.f32 %v5257_v24, %v5256_v56  ;;  %v7528_v28 = vadd.f32 %v5191_v50, %v7353_v32  ;;  %v7531_v34 = vadd.f32 %v5255_v22, %v7199_v39 }
 0x15c   : > { %3883 = vmatprep.mubr.bf16.mxu1 %v4762_v15  ;;  %v5197_v27 = vadd.f32 %v5196_v23, %v5195_v0  ;;  %v5261_v10 = vadd.f32 %v5260_v46, %v5259_v53  ;;  %v7534_v63 = vadd.f32 %v5194_v35, %v7360_v17  ;;  %v5198_v51 = vpop.f32.mrf.mxu1  ;;  %v5262_v16 = vpop.f32.mrf.mxu0 }
 0x15d   : > { %3884 = vmatmul.mubr.bf16.gmra.mxu1 %v4746_v49  ;;  %5530 = vmatmul.mubr.bf16.gmra.mxu0 %v4778_v57  ;;  %v7537_v13 = vadd.f32 %v5258_v45, %v7207_v41 }
 0x15e   : > { %v7540_v6 = vadd.f32 %v5197_v27, %v7403_v25  ;;  %v7543_v32 = vadd.f32 %v5261_v10, %v7233_v19  ;;  %v5199_v39 = vpop.f32.mrf.mxu1  ;;  %v5263_v54 = vpop.f32.mrf.mxu0 }
 0x15f   : > { %v5200_v33 = vadd.f32 %v5199_v39, %v5198_v51  ;;  %v5264_v56 = vadd.f32 %v5263_v54, %v5262_v16 }
 0x160   : > { %v5201_v49 = vpop.f32.mrf.mxu1  ;;  %v5265_v37 = vpop.f32.mrf.mxu0 }
 0x161   : > { %v7546_v17 = vadd.f32 %v5200_v33, %v7405_v3  ;;  %v7549_v41 = vadd.f32 %v5264_v56, %v7250_v18 }
 0x162   : > { %v5202_v52 = vpop.f32.mrf.mxu1  ;;  %v5266_v21 = vpop.f32.mrf.mxu0 }
 0x163   : > { %v5203_v36 = vadd.f32 %v5202_v52, %v5201_v49  ;;  %v5267_v25 = vadd.f32 %v5266_v21, %v5265_v37 }
 0x164   : > { %v5204_v58 = vpop.f32.mrf.mxu1  ;;  %v5268_v8 = vpop.f32.mrf.mxu0 }
 0x165   : > { %v7552_v19 = vadd.f32 %v5203_v36, %v7457_v12  ;;  %v7555_v40 = vadd.f32 %v5267_v25, %v7283_v4 }
 0x166   : > { %v5205_v24 = vpop.f32.mrf.mxu1  ;;  %v5269_v42 = vpop.f32.mrf.mxu0 }
 0x167   : > { %v5206_v38 = vadd.f32 %v5205_v24, %v5204_v58  ;;  %v5270_v3 = vadd.f32 %v5269_v42, %v5268_v8 }
 0x168   : > { %v5207_v31 = vpop.f32.mrf.mxu1  ;;  %v5271_v48 = vpop.f32.mrf.mxu0 }
 0x169   : > { %v7558_v18 = vadd.f32 %v5206_v38, %v7469_v43  ;;  %v7561_v20 = vadd.f32 %v5270_v3, %v7292_v30 }
 0x16a   : > { %v5208_v47 = vpop.f32.mrf.mxu1  ;;  %v5272_v7 = vpop.f32.mrf.mxu0 }
 0x16b   : > { %v5209_v0 = vadd.f32 %v5208_v47, %v5207_v31  ;;  %v5273_v12 = vadd.f32 %v5272_v7, %v5271_v48  ;;  %v7906_v7 = vld [vmem:[#allocation7_spill] sm:$0xff] }
 0x16c   : > { %v5210_v53 = vpop.f32.mrf.mxu1  ;;  %v5274_v15 = vpop.f32.mrf.mxu0 }
 0x16d   : > { %v7564_v4 = vadd.f32 %v5209_v0, %v7504_v29  ;;  %v7567_v2 = vadd.f32 %v5273_v12, %v7323_v59 }
 0x16e   : > { %v5211_v50 = vpop.f32.mrf.mxu1  ;;  %v5275_v22 = vpop.f32.mrf.mxu0 }
 0x16f   : > { %v5212_v57 = vadd.f32 %v5211_v50, %v5210_v53  ;;  %v5276_v43 = vadd.f32 %v5275_v22, %v5274_v15 }
 0x170   : > { %v5213_v35 = vpop.f32.mrf.mxu1  ;;  %v5277_v45 = vpop.f32.mrf.mxu0 }
 0x171   : > { %v7570_v30 = vadd.f32 %v5212_v57, %v7508_v62  ;;  %v7573_v23 = vadd.f32 %v5276_v43, %v7333_v44  ;;  %v7908_v43 = vld [vmem:[#allocation8_spill] sm:$0xff] }
 0x172   : > { %v5214_v46 = vpop.f32.mrf.mxu1  ;;  %v5278_v27 = vpop.f32.mrf.mxu0 }
 0x173   : > { %v5215_v10 = vadd.f32 %v5214_v46, %v5213_v35  ;;  %v5279_v29 = vadd.f32 %v5278_v27, %v5277_v45 }
 0x174   : > { %v5216_v51 = vpop.f32.mrf.mxu1  ;;  %v5280_v16 = vpop.f32.mrf.mxu0 }
 0x175   : > { %v7576_v59 = vadd.f32 %v5215_v10, %v7006_v60  ;;  %v7579_v39 = vadd.f32 %v5279_v29, %v7370_v55 }
 0x176   : > { %v5217_v54 = vpop.f32.mrf.mxu1  ;;  %v5281_v33 = vpop.f32.mrf.mxu0 }
 0x177   : > { %v5218_v56 = vadd.f32 %v5217_v54, %v5216_v51  ;;  %v5282_v62 = vadd.f32 %v5281_v33, %v5280_v16  ;;  %v7909_v16 = vld [vmem:[#allocation4_spill] sm:$0xff] }
 0x178   : > { %v5219_v49 = vpop.f32.mrf.mxu1  ;;  %v5283_v37 = vpop.f32.mrf.mxu0 }
 0x179   : > { %v7582_v44 = vadd.f32 %v5218_v56, %v7016_v5  ;;  %v7585_v52 = vadd.f32 %v5282_v62, %v7373_v14  ;;  %v7905_v14 = vld [vmem:[#allocation2_spill] sm:$0xff] }
 0x17a   : > { %v5220_v21 = vpop.f32.mrf.mxu1  ;;  %v5284_v36 = vpop.f32.mrf.mxu0 }
 0x17b   : > { %v5221_v25 = vadd.f32 %v5220_v21, %v5219_v49  ;;  %v5285_v60 = vadd.f32 %v5284_v36, %v5283_v37 }
 0x17c   : > { %v5222_v58 = vpop.f32.mrf.mxu1  ;;  %v5286_v8 = vpop.f32.mrf.mxu0 }
 0x17d   : > { %v7588_v55 = vadd.f32 %v5221_v25, %v7048_v9  ;;  %v7591_v24 = vadd.f32 %v5285_v60, %v7420_v1  ;;  %v7907_v1 = vld [vmem:[#allocation3_spill] sm:$0xff]  ;;  %v7910_v25 = vld [vmem:[#allocation5_spill] sm:$0xff] }
 0x17e   : > { %v5223_v42 = vpop.f32.mrf.mxu1  ;;  %v5287_v38 = vpop.f32.mrf.mxu0 }
 0x17f   : > { %v5224_v3 = vadd.f32 %v5223_v42, %v5222_v58  ;;  %v5288_v5 = vadd.f32 %v5287_v38, %v5286_v8 }
 0x180   : > { %v5225_v31 = vpop.f32.mrf.mxu1  ;;  %v5289_v48 = vpop.f32.mrf.mxu0 }
 0x181   : > { %v7594_v47 = vadd.f32 %v5224_v3, %v7905_v14  ;;  %v7597_v0 = vadd.f32 %v5288_v5, %v7906_v7 }
 0x182   : > { %v5226_v12 = vpop.f32.mrf.mxu1  ;;  %v5290_v53 = vpop.f32.mrf.mxu0 }
 0x183   : > { %v5227_v15 = vadd.f32 %v5226_v12, %v5225_v31  ;;  %v5291_v9 = vadd.f32 %v5290_v53, %v5289_v48 }
 0x184   : > { %v5228_v50 = vpop.f32.mrf.mxu1  ;;  %v5292_v22 = vpop.f32.mrf.mxu0 }
 0x185   : > { %v7600_v57 = vadd.f32 %v5227_v15, %v7907_v1  ;;  %v7603_v35 = vadd.f32 %v5291_v9, %v7908_v43 }
 0x186   : > { %v5229_v45 = vpop.f32.mrf.mxu1  ;;  %v5293_v46 = vpop.f32.mrf.mxu0 }
 0x187   : > { %v5230_v27 = vadd.f32 %v5229_v45, %v5228_v50  ;;  %v5294_v10 = vadd.f32 %v5293_v46, %v5292_v22 }
 0x188   : > { %v5231_v29 = vpop.f32.mrf.mxu1  ;;  %v5295_v51 = vpop.f32.mrf.mxu0 }
 0x189   : > { %v7606_v54 = vadd.f32 %v5230_v27, %v7909_v16  ;;  %v7609_v33 = vadd.f32 %v5294_v10, %v7492_v11  ;;  %v7911_v11 = vld [vmem:[#allocation6_spill] sm:$0xff] }
 0x18a   : > { %v5232_v56 = vpop.f32.mrf.mxu1  ;;  %v5296_v62 = vpop.f32.mrf.mxu0 }
 0x18b   : > { %v5233_v49 = vadd.f32 %v5232_v56, %v5231_v29  ;;  %v5297_v37 = vadd.f32 %v5296_v62, %v5295_v51 }
 0x18c   : > { %v5234_v21 = vpop.f32.mrf.mxu1  ;;  %v5298_v36 = vpop.f32.mrf.mxu0 }
 0x18d   : > { %v7612_v60 = vadd.f32 %v5233_v49, %v7910_v25  ;;  %v7615_v58 = vadd.f32 %v5297_v37, %v7519_v26 }
 0x18e   : > { %v5235_v8 = vpop.f32.mrf.mxu1  ;;  %v5299_v42 = vpop.f32.mrf.mxu0 }
 0x18f   : > { %v5236_v38 = vadd.f32 %v5235_v8, %v5234_v21  ;;  %v5300_v3 = vadd.f32 %v5299_v42, %v5298_v36 }
 0x190   : > { %v5301_v5 = vpop.f32.mrf.mxu0  ;;  %v7617_v31 = vpop.f32.mrf.mxu1 }
 0x191   : > { %v7620_v48 = vadd.f32 %v5236_v38, %v7911_v11  ;;  %v7623_v14 = vadd.f32 %v5300_v3, %v7525_v61 }
 0x192   : > { %v5302_v7 = vpop.f32.mrf.mxu0  ;;  %v7625_v12 = vpop.f32.mrf.mxu1 }
 0x193   : > { %v5303_v53 = vadd.f32 %v5302_v7, %v5301_v5 }
 0x194   : > { %v5304_v15 = vpop.f32.mrf.mxu0  ;;  %v7627_v26 = vpop.f32.mrf.mxu1 }
 0x195   : > { %v7630_v9 = vadd.f32 %v5303_v53, %v7528_v28 }
 0x196   : > { %v5305_v50 = vpop.f32.mrf.mxu0  ;;  %v7632_v22 = vpop.f32.mrf.mxu1 }
 0x197   : > { %v5306_v1 = vadd.f32 %v5305_v50, %v5304_v15 }
 0x198   : > { %v7634_v43 = vpop.f32.mrf.mxu1  ;;  %v5307_v61 = vpop.f32.mrf.mxu0 }
 0x199   : > { %v7637_v45 = vadd.f32 %v5306_v1, %v7534_v63 }
 0x19a   : > { %v7639_v46 = vpop.f32.mrf.mxu1  ;;  %v5308_v27 = vpop.f32.mrf.mxu0 }
 0x19b   : > { %7912 = vst [vmem:[#allocation2_spill] sm:$0xff] %v7637_v45  ;;  %v5309_v10 = vadd.f32 %v5308_v27, %v5307_v61 }
 0x19c   : > { %v7641_v29 = vpop.f32.mrf.mxu1  ;;  %v5310_v51 = vpop.f32.mrf.mxu0 }
 0x19d   : > { %v7644_v28 = vadd.f32 %v5309_v10, %v7540_v6 }
 0x19e   : > { %v7646_v16 = vpop.f32.mrf.mxu1  ;;  %v5311_v56 = vpop.f32.mrf.mxu0 }
 0x19f   : > { %v5312_v62 = vadd.f32 %v5311_v56, %v5310_v51 }
 0x1a0   : > { %v7648_v49 = vpop.f32.mrf.mxu1 }
 0x1a1   : > { %v7651_v63 = vadd.f32 %v5312_v62, %v7546_v17 }
 0x1a2   : > { %v5313_v37 = vpop.f32.mrf.mxu0  ;;  %v7653_v21 = vpop.f32.mrf.mxu1 }
 0x1a3   : > { %7913 = vst [vmem:[#allocation7_spill] sm:$0xff] %v7651_v63 }
 0x1a4   : > { %v5314_v36 = vpop.f32.mrf.mxu0  ;;  %v7655_v25 = vpop.f32.mrf.mxu1 }
 0x1a5   : > { %v5315_v8 = vadd.f32 %v5314_v36, %v5313_v37 }
 0x1a6   : > { %v5316_v42 = vpop.f32.mrf.mxu0  ;;  %v7657_v38 = vpop.f32.mrf.mxu1 }
 0x1a7   : > { %v7660_v6 = vadd.f32 %v5315_v8, %v7552_v19 }
 0x1a8   : > { %v5317_v3 = vpop.f32.mrf.mxu0 }
 0x1a9   : > { %7914 = vst [vmem:[#allocation3_spill] sm:$0xff] %v7660_v6  ;;  %v5318_v5 = vadd.f32 %v5317_v3, %v5316_v42  ;;  %v7662_v11 = vpop.f32.mrf.mxu1 }
 0x1ab   : > { %v7665_v17 = vadd.f32 %v5318_v5, %v7558_v18  ;;  %v7667_v7 = vpop.f32.mrf.mxu1  ;;  %v5319_v53 = vpop.f32.mrf.mxu0 }
 0x1ad   : > { %7915 = vst [vmem:[#allocation8_spill] sm:$0xff] %v7665_v17  ;;  %v7669_v15 = vpop.f32.mrf.mxu1  ;;  %v5320_v50 = vpop.f32.mrf.mxu0 }
 0x1ae   : > { %v5321_v1 = vadd.f32 %v5320_v50, %v5319_v53 }
 0x1af   : > { %v7671_v61 = vpop.f32.mrf.mxu1  ;;  %v5322_v27 = vpop.f32.mrf.mxu0 }
 0x1b0   : > { %v7674_v19 = vadd.f32 %v5321_v1, %v7564_v4 }
 0x1b1   : > { %v5323_v10 = vpop.f32.mrf.mxu0 }
 0x1b2   : > { %7916 = vst [vmem:[#allocation4_spill] sm:$0xff] %v7674_v19  ;;  %v5324_v51 = vadd.f32 %v5323_v10, %v5322_v27 }
 0x1b4   : > { %v7676_v56 = vpop.f32.mrf.mxu1  ;;  %v5325_v62 = vpop.f32.mrf.mxu0  ;;  %v7679_v18 = vadd.f32 %v5324_v51, %v7570_v30 }
 0x1b6   : > { %7917 = vst [vmem:[#allocation5_spill] sm:$0xff] %v7679_v18  ;;  %v7681_v37 = vpop.f32.mrf.mxu1  ;;  %v5326_v36 = vpop.f32.mrf.mxu0 }
 0x1b7   : > { %v5327_v8 = vadd.f32 %v5326_v36, %v5325_v62 }
 0x1b8   : > { %v7683_v42 = vpop.f32.mrf.mxu1  ;;  %v5328_v3 = vpop.f32.mrf.mxu0 }
 0x1b9   : > { %v7686_v5 = vadd.f32 %v5327_v8, %v7576_v59 }
 0x1ba   : > { %v7688_v4 = vpop.f32.mrf.mxu1  ;;  %v5329_v53 = vpop.f32.mrf.mxu0 }
 0x1bb   : > { %7918 = vst [vmem:[#allocation6_spill] sm:$0xff] %v7686_v5  ;;  %v5330_v50 = vadd.f32 %v5329_v53, %v5328_v3 }
 0x1bd   : > { %v7691_v1 = vadd.f32 %v5330_v50, %v7582_v44 }
 0x1bf   : > { %7919 = vst [vmem:[#allocation9_spill] sm:$0xff] %v7691_v1 }
 0x1c0   : > { %v7693_v27 = vpop.f32.mrf.mxu1  ;;  %v5331_v30 = vpop.f32.mrf.mxu0 }
 0x1c2   : > { %v7695_v10 = vpop.f32.mrf.mxu1  ;;  %v5332_v51 = vpop.f32.mrf.mxu0 }
 0x1c3   : > { %v5333_v36 = vadd.f32 %v5332_v51, %v5331_v30 }
 0x1c4   : > { %v7697_v62 = vpop.f32.mrf.mxu1  ;;  %v5334_v17 = vpop.f32.mrf.mxu0 }
 0x1c5   : > { %v7702_v59 = vadd.f32 %v5333_v36, %v7588_v55 }
 0x1c6   : > { %v7699_v18 = vpop.f32.mrf.mxu1  ;;  %v5335_v8 = vpop.f32.mrf.mxu0 }
 0x1c7   : > { %7920 = vst [vmem:[#allocation10_spill] sm:$0xff] %v7702_v59  ;;  %v5336_v3 = vadd.f32 %v5335_v8, %v5334_v17 }
 0x1c9   : > { %v7704_v53 = vpop.f32.mrf.mxu1  ;;  %v7707_v44 = vadd.f32 %v5336_v3, %v7594_v47 }
 0x1ca   : > { %v5337_v50 = vpop.f32.mrf.mxu0 }
 0x1cb   : > { %7921 = vst [vmem:[#allocation11_spill] sm:$0xff] %v7707_v44  ;;  %v7709_v1 = vpop.f32.mrf.mxu1 }
 0x1cc   : > { %v5338_v5 = vpop.f32.mrf.mxu0 }
 0x1cd   : > { %v7711_v19 = vpop.f32.mrf.mxu1  ;;  %v5339_v30 = vadd.f32 %v5338_v5, %v5337_v50 }
 0x1ce   : > { %v5340_v51 = vpop.f32.mrf.mxu0 }
 0x1cf   : > { %v7714_v6 = vadd.f32 %v5339_v30, %v7600_v57  ;;  %v7716_v55 = vpop.f32.mrf.mxu1 }
 0x1d0   : > { %v5341_v36 = vpop.f32.mrf.mxu0 }
 0x1d1   : > { %7922 = vst [vmem:[#allocation12_spill] sm:$0xff] %v7714_v6  ;;  %v5342_v17 = vadd.f32 %v5341_v36, %v5340_v51  ;;  %v5373_v36 = vadd.f32 %v7639_v46, %v7634_v43 }
 0x1d3   : > { %v7719_v8 = vadd.f32 %v5342_v17, %v7606_v54  ;;  %v7721_v47 = vpop.f32.mrf.mxu1  ;;  %v5367_v54 = vadd.f32 %v7625_v12, %v7617_v31  ;;  %v5376_v17 = vadd.f32 %v7646_v16, %v7641_v29  ;;  %v3774_v31 = vadd.f32 %v5373_v36, %v7543_v32 }
 0x1d4   : > { %v5388_v32 = vadd.f32 %v7671_v61, %v7669_v15  ;;  %v5382_v36 = vadd.f32 %v7657_v38, %v7655_v25 }
 0x1d5   : > { %7923 = vst [vmem:[#allocation13_spill] sm:$0xff] %v7719_v8  ;;  %v5343_v3 = vpop.f32.mrf.mxu0  ;;  %v7723_v44 = vpop.f32.mrf.mxu1  ;;  %v3766_v12 = vadd.f32 %v5367_v54, %v7531_v34  ;;  %v3777_v43 = vadd.f32 %v5376_v17, %v7549_v41 }
 0x1d7   : > { %v5344_v59 = vpop.f32.mrf.mxu0  ;;  %v7725_v45 = vpop.f32.mrf.mxu1 }
 0x1d8   : > { %v5345_v5 = vadd.f32 %v5344_v59, %v5343_v3 }
 0x1d9   : > { %v5346_v50 = vpop.f32.mrf.mxu0  ;;  %v7727_v63 = vpop.f32.mrf.mxu1 }
 0x1da   : > { %v7730_v57 = vadd.f32 %v5345_v5, %v7612_v60  ;;  %v5370_v60 = vadd.f32 %v7632_v22, %v7627_v26  ;;  %v5385_v22 = vadd.f32 %v7667_v7, %v7662_v11 }
 0x1db   : > { %v5347_v30 = vpop.f32.mrf.mxu0  ;;  %v7732_v51 = vpop.f32.mrf.mxu1 }
 0x1dc   : > { %7924 = vst [vmem:[#allocation14_spill] sm:$0xff] %v7730_v57  ;;  %v5348_v59 = vadd.f32 %v5347_v30, %v5346_v50  ;;  %v3769_v26 = vadd.f32 %v5370_v60, %v7537_v13  ;;  %v3790_v17 = vadd.f32 %v5385_v22, %v7567_v2  ;;  %v3785_v22 = vadd.f32 %v5382_v36, %v7561_v20 }
 0x1dd   : > { %v5503_v3 = vpop.f32.mrf.mxu0  ;;  %v7740_v8 = vpop.f32.mrf.mxu1 }
 0x1de   : > { %v7745_v5 = vadd.f32 %v5348_v59, %v7620_v48  ;;  %v3935_v16 = vadd.f32 %v5503_v3, %v3774_v31  ;;  %v5379_v48 = vadd.f32 %v7653_v21, %v7648_v49 }
 0x1df   : > { %v3926_v57 = vpop.f32.mrf.mxu0  ;;  %v7747_v6 = vpop.f32.mrf.mxu1 }
 0x1e0   : > { %v3927_v50 = vadd.f32 %v3926_v57, %v3766_v12  ;;  %v3782_v15 = vadd.f32 %v5379_v48, %v7555_v40  ;;  %v4252_v3 = vmul.f32 %v3935_v16, %v3935_v16  ;;  %v3793_v12 = vadd.f32 %v5388_v32, %v7573_v23 }
 0x1e1   : > { %v5504_v46 = vpop.f32.mrf.mxu0  ;;  %v7753_v29 = vpop.f32.mrf.mxu1  ;;  %v5391_v40 = vadd.f32 %v7681_v37, %v7676_v56  ;;  %v5397_v48 = vadd.f32 %v7695_v10, %v7693_v27  ;;  %v5394_v56 = vadd.f32 %v7688_v4, %v7683_v42 }
 0x1e2   : > { %v3938_v30 = vadd.f32 %v5504_v46, %v3777_v43  ;;  %v4250_v49 = vmul.f32 %v3927_v50, %v3927_v50 }
 0x1e3   : > { %v3929_v34 = vpop.f32.mrf.mxu0  ;;  %v3798_v20 = vadd.f32 %v5391_v40, %v7579_v39  ;;  %v3801_v39 = vadd.f32 %v5394_v56, %v7585_v52  ;;  %v5412_v52 = vadd.f32 %v7727_v63, %v7725_v45 }
 0x1e4   : > { %v4926_v41 = vpack.c.bf16 %v3938_v30, %v3935_v16  ;;  %v3930_v57 = vadd.f32 %v3929_v34, %v3769_v26  ;;  %v7767_v13 = vpop.f32.mrf.mxu1  ;;  %v4253_v43 = vmul.f32 %v3938_v30, %v3938_v30 }
 0x1e5   : > { %v5507_v54 = vpop.f32.mrf.mxu0 }
 0x1e6   : > { %4998 = vst [vmem:[%s7763_s6 + $0x8] sm:$0xff] %v4926_v41   ;;  %v4921_v21 = vpack.c.bf16 %v3930_v57, %v3927_v50  ;;  %v4213_v11 = vadd.f32 %v3930_v57, %v3927_v50  ;;  %v4251_v7 = vmul.f32 %v3930_v57, %v3930_v57  ;;  %v7773_v59 = vpop.f32.mrf.mxu1  ;;  %v3951_v25 = vadd.f32 %v5507_v54, %v3790_v17 }
 0x1e7   : > { %v3942_v61 = vpop.f32.mrf.mxu0 }
 0x1e8   : > { %4922 = vst [vmem:[%s7763_s6] sm:$0xff] %v4921_v21   ;;  %v4214_v60 = vadd.f32 %v4213_v11, %v3935_v16  ;;  %v4282_v31 = vadd.f32 %v4251_v7, %v4250_v49  ;;  %v3943_v46 = vadd.f32 %v3942_v61, %v3782_v15  ;;  %v7778_v50 = vpop.f32.mrf.mxu1  ;;  %v5400_v16 = vadd.f32 %v7699_v18, %v7697_v62 }
 0x1e9   : > { %v5508_v26 = vpop.f32.mrf.mxu0  ;;  %v3806_v7 = vadd.f32 %v5397_v48, %v7591_v24  ;;  %v4256_v15 = vmul.f32 %v3951_v25, %v3951_v25 }
 0x1ea   : > { %v4283_v34 = vadd.f32 %v4282_v31, %v4252_v3  ;;  %v4215_v38 = vadd.f32 %v4214_v60, %v3938_v30  ;;  %v3954_v2 = vadd.f32 %v5508_v26, %v3793_v12  ;;  %v7786_v23 = vpop.f32.mrf.mxu1  ;;  %v4254_v57 = vmul.f32 %v3943_v46, %v3943_v46 }
 0x1eb   : > { %v3945_v32 = vpop.f32.mrf.mxu0  ;;  %v3809_v17 = vadd.f32 %v5400_v16, %v7597_v0  ;;  %v5403_v0 = vadd.f32 %v7709_v1, %v7704_v53 }
 0x1ec   : > { %v4216_v41 = vadd.f32 %v4215_v38, %v3943_v46  ;;  %v4284_v54 = vadd.f32 %v4283_v34, %v4253_v43  ;;  %v4936_v30 = vpack.c.bf16 %v3954_v2, %v3951_v25  ;;  %v3946_v49 = vadd.f32 %v3945_v32, %v3785_v22 }
 0x1ed   : > { %v5511_v21 = vpop.f32.mrf.mxu0  ;;  %v7792_v27 = vpop.f32.mrf.mxu1  ;;  %v4257_v43 = vmul.f32 %v3954_v2, %v3954_v2  ;;  %v5409_v22 = vadd.f32 %v7723_v44, %v7721_v47 }
 0x1ee   : > { %v4285_v37 = vadd.f32 %v4284_v54, %v4254_v57  ;;  %5000 = vst [vmem:[%s7763_s6 + $0x18] sm:$0xff] %v4936_v30   ;;  %v4931_v18 = vpack.c.bf16 %v3946_v49, %v3943_v46  ;;  %v4217_v10 = vadd.f32 %v4216_v41, %v3946_v49  ;;  %v4255_v62 = vmul.f32 %v3946_v49, %v3946_v49 }
 0x1ef   : > { %v3958_v11 = vpop.f32.mrf.mxu0  ;;  %v7796_v36 = vpop.f32.mrf.mxu1  ;;  %v3967_v60 = vadd.f32 %v5511_v21, %v3806_v7  ;;  %v5406_v54 = vadd.f32 %v7716_v55, %v7711_v19  ;;  %v3814_v30 = vadd.f32 %v5403_v0, %v7603_v35  ;;  %v3822_v45 = vadd.f32 %v5409_v22, %v7615_v58 }
 0x1f0   : > { %4999 = vst [vmem:[%s7763_s6 + $0x10] sm:$0xff] %v4931_v18   ;;  %v4218_v61 = vadd.f32 %v4217_v10, %v3951_v25  ;;  %v4286_v42 = vadd.f32 %v4285_v37, %v4255_v62  ;;  %v3959_v4 = vadd.f32 %v3958_v11, %v3798_v20  ;;  %v3825_v37 = vadd.f32 %v5412_v52, %v7623_v14 }
 0x1f1   : > { %v5512_v3 = vpop.f32.mrf.mxu0  ;;  %v7800_v31 = vpop.f32.mrf.mxu1  ;;  %v4260_v49 = vmul.f32 %v3967_v60, %v3967_v60  ;;  %v3817_v35 = vadd.f32 %v5406_v54, %v7609_v33  ;;  %v5415_v7 = vadd.f32 %v7740_v8, %v7732_v51  ;;  %v5418_v51 = vadd.f32 %v7753_v29, %v7747_v6 }
 0x1f2   : > { %v3970_v12 = vadd.f32 %v5512_v3, %v3809_v17  ;;  %v4287_v46 = vadd.f32 %v4286_v42, %v4256_v15  ;;  %v4219_v24 = vadd.f32 %v4218_v61, %v3954_v2  ;;  %v4258_v48 = vmul.f32 %v3959_v4, %v3959_v4 }
 0x1f3   : > { %v3961_v26 = vpop.f32.mrf.mxu0  ;;  %v7805_v25 = vpop.f32.mrf.mxu1  ;;  %v5421_v3 = vadd.f32 %v7773_v59, %v7767_v13 }
 0x1f4   : > { %v4946_v34 = vpack.c.bf16 %v3970_v12, %v3967_v60  ;;  %v3962_v38 = vadd.f32 %v3961_v26, %v3801_v39  ;;  %v4220_v40 = vadd.f32 %v4219_v24, %v3959_v4  ;;  %v4288_v16 = vadd.f32 %v4287_v46, %v4257_v43 }
 0x1f5   : > { %v4261_v18 = vmul.f32 %v3970_v12, %v3970_v12  ;;  %v3830_v24 = vadd.f32 %v5415_v7, %v7630_v9  ;;  %v3838_v59 = vadd.f32 %v5421_v3, %v7644_v28  ;;  %v7926_v9 = vld [vmem:[#allocation2_spill] sm:$0xff] }
 0x1f6   : > { %5002 = vst [vmem:[%s7763_s6 + $0x28] sm:$0xff] %v4946_v34   ;;  %v4941_v2 = vpack.c.bf16 %v3962_v38, %v3959_v4  ;;  %v4259_v32 = vmul.f32 %v3962_v38, %v3962_v38  ;;  %v4289_v41 = vadd.f32 %v4288_v16, %v4258_v48  ;;  %v4221_v57 = vadd.f32 %v4220_v40, %v3962_v38  ;;  %v7925_v38 = vld [vmem:[#allocation7_spill] sm:$0xff] }
 0x1f7   : > { %v7812_v1 = vpop.f32.mrf.mxu1 }
 0x1f8   : > { %v5515_v53 = vpop.f32.mrf.mxu0  ;;  %5001 = vst [vmem:[%s7763_s6 + $0x20] sm:$0xff] %v4941_v2   ;;  %v4222_v21 = vadd.f32 %v4221_v57, %v3967_v60  ;;  %v4290_v44 = vadd.f32 %v4289_v41, %v4259_v32  ;;  %v5424_v60 = vadd.f32 %v7786_v23, %v7778_v50  ;;  %v3833_v32 = vadd.f32 %v5418_v51, %v7926_v9 }
 0x1f9   : > { %v5432_v47 = vpop.f32.mrf.mxu1  ;;  %v3983_v19 = vadd.f32 %v5515_v53, %v3822_v45  ;;  %v5427_v41 = vadd.f32 %v7796_v36, %v7792_v27  ;;  %v5430_v27 = vadd.f32 %v7805_v25, %v7800_v31 }
 0x1fa   : > { %v3974_v56 = vpop.f32.mrf.mxu0  ;;  %v4291_v10 = vadd.f32 %v4290_v44, %v4260_v49  ;;  %v4223_v62 = vadd.f32 %v4222_v21, %v3970_v12  ;;  %v3841_v40 = vadd.f32 %v5424_v60, %v7925_v38  ;;  %v5433_v44 = vadd.f32 %v5432_v47, %v7812_v1  ;;  %v7930_v60 = vld [vmem:[#allocation8_spill] sm:$0xff] }
 0x1fb   : > { %v3975_v63 = vadd.f32 %v3974_v56, %v3814_v30  ;;  %v5434_v20 = vpop.f32.mrf.mxu1  ;;  %v4264_v26 = vmul.f32 %v3983_v19, %v3983_v19 }
 0x1fc   : > { %v5516_v11 = vpop.f32.mrf.mxu0  ;;  %v4292_v61 = vadd.f32 %v4291_v10, %v4261_v18 }
 0x1fd   : > { %v3986_v55 = vadd.f32 %v5516_v11, %v3825_v37  ;;  %v4224_v17 = vadd.f32 %v4223_v62, %v3975_v63  ;;  %v4262_v15 = vmul.f32 %v3975_v63, %v3975_v63  ;;  %v5435_v58 = vpop.f32.mrf.mxu1  ;;  %v7927_v62 = vld [vmem:[#allocation3_spill] sm:$0xff] }
 0x1fe   : > { %v3977_v42 = vpop.f32.mrf.mxu0  ;;  %v5436_v56 = vadd.f32 %v5435_v58, %v5434_v20  ;;  %v3846_v11 = vadd.f32 %v5427_v41, %v7927_v62 }
 0x1ff   : > { %v4956_v14 = vpack.c.bf16 %v3986_v55, %v3983_v19  ;;  %v3978_v4 = vadd.f32 %v3977_v42, %v3817_v35  ;;  %v4293_v12 = vadd.f32 %v4292_v61, %v4262_v15  ;;  %v4265_v48 = vmul.f32 %v3986_v55, %v3986_v55  ;;  %v7929_v15 = vld [vmem:[#allocation5_spill] sm:$0xff] }
 0x200   : > { %v3857_v61 = vadd.f32 %v5436_v56, %v7929_v15 }
 0x201   : > { %5004 = vst [vmem:[%s7763_s6 + $0x38] sm:$0xff] %v4956_v14   ;;  %v4951_v33 = vpack.c.bf16 %v3978_v4, %v3975_v63  ;;  %v4225_v39 = vadd.f32 %v4224_v17, %v3978_v4  ;;  %v4263_v43 = vmul.f32 %v3978_v4, %v3978_v4  ;;  %v5437_v46 = vpop.f32.mrf.mxu1  ;;  %v7928_v17 = vld [vmem:[#allocation4_spill] sm:$0xff] }
 0x202   : > { %v5519_v8 = vpop.f32.mrf.mxu0  ;;  %v3854_v1 = vadd.f32 %v5433_v44, %v7928_v17 }
 0x203   : > { %5003 = vst [vmem:[%s7763_s6 + $0x30] sm:$0xff] %v4951_v33   ;;  %v4226_v0 = vadd.f32 %v4225_v39, %v3983_v19  ;;  %v4294_v34 = vadd.f32 %v4293_v12, %v4263_v43  ;;  %v5438_v50 = vpop.f32.mrf.mxu1  ;;  %v3999_v6 = vadd.f32 %v5519_v8, %v3838_v59  ;;  %v3849_v12 = vadd.f32 %v5430_v27, %v7930_v60 }
 0x204   : > { %v3990_v13 = vpop.f32.mrf.mxu0  ;;  %v5439_v33 = vadd.f32 %v5438_v50, %v5437_v46 }
 0x205   : > { %v3991_v23 = vadd.f32 %v3990_v13, %v3830_v24  ;;  %v4295_v16 = vadd.f32 %v4294_v34, %v4264_v26  ;;  %v4227_v22 = vadd.f32 %v4226_v0, %v3986_v55  ;;  %v5440_v29 = vpop.f32.mrf.mxu1  ;;  %v4268_v19 = vmul.f32 %v3999_v6, %v3999_v6 }
 0x206   : > { %v5520_v52 = vpop.f32.mrf.mxu0 }
 0x207   : > { %v4002_v2 = vadd.f32 %v5520_v52, %v3841_v40  ;;  %v4228_v57 = vadd.f32 %v4227_v22, %v3991_v23  ;;  %v4266_v53 = vmul.f32 %v3991_v23, %v3991_v23  ;;  %v4296_v28 = vadd.f32 %v4295_v16, %v4265_v48  ;;  %v5441_v49 = vpop.f32.mrf.mxu1  ;;  %v7931_v22 = vld [vmem:[#allocation6_spill] sm:$0xff] }
 0x208   : > { %v3993_v54 = vpop.f32.mrf.mxu0  ;;  %v5442_v16 = vadd.f32 %v5441_v49, %v5440_v29  ;;  %v3862_v52 = vadd.f32 %v5439_v33, %v7931_v22 }
 0x209   : > { %v4966_v30 = vpack.c.bf16 %v4002_v2, %v3999_v6  ;;  %v3994_v21 = vadd.f32 %v3993_v54, %v3833_v32  ;;  %v4297_v45 = vadd.f32 %v4296_v28, %v4266_v53  ;;  %v4269_v58 = vmul.f32 %v4002_v2, %v4002_v2  ;;  %v7932_v32 = vld [vmem:[#allocation10_spill] sm:$0xff]  ;;  %v7933_v53 = vld [vmem:[#allocation11_spill] sm:$0xff] }
 0x20a   : > { %v5443_v36 = vpop.f32.mrf.mxu1 }
 0x20b   : > { %5006 = vst [vmem:[%s7763_s6 + $0x48] sm:$0xff] %v4966_v30   ;;  %v4961_v63 = vpack.c.bf16 %v3994_v21, %v3991_v23  ;;  %v4229_v37 = vadd.f32 %v4228_v57, %v3994_v21  ;;  %v4267_v18 = vmul.f32 %v3994_v21, %v3994_v21  ;;  %v5523_v10 = vpop.f32.mrf.mxu0 }
 0x20c   : > { %v5444_v47 = vpop.f32.mrf.mxu1  ;;  %v4015_v31 = vadd.f32 %v5523_v10, %v3854_v1 }
 0x20d   : > { %5005 = vst [vmem:[%s7763_s6 + $0x40] sm:$0xff] %v4961_v63   ;;  %v4230_v55 = vadd.f32 %v4229_v37, %v3999_v6  ;;  %v4298_v35 = vadd.f32 %v4297_v45, %v4267_v18  ;;  %v4006_v7 = vpop.f32.mrf.mxu0  ;;  %v5445_v34 = vadd.f32 %v5444_v47, %v5443_v36  ;;  %v7934_v45 = vld [vmem:[#allocation9_spill] sm:$0xff] }
 0x20e   : > { %v4007_v20 = vadd.f32 %v4006_v7, %v3846_v11  ;;  %v5446_v25 = vpop.f32.mrf.mxu1  ;;  %v4272_v46 = vmul.f32 %v4015_v31, %v4015_v31  ;;  %v3865_v63 = vadd.f32 %v5442_v16, %v7934_v45 }
 0x20f   : > { %v4299_v42 = vadd.f32 %v4298_v35, %v4268_v19  ;;  %v4231_v14 = vadd.f32 %v4230_v55, %v4002_v2  ;;  %v5524_v4 = vpop.f32.mrf.mxu0  ;;  %v3870_v41 = vadd.f32 %v5445_v34, %v7932_v32 }
 0x210   : > { %v4018_v3 = vadd.f32 %v5524_v4, %v3857_v61  ;;  %v4270_v43 = vmul.f32 %v4007_v20, %v4007_v20  ;;  %v5447_v26 = vpop.f32.mrf.mxu1 }
 0x211   : > { %v4232_v39 = vadd.f32 %v4231_v14, %v4007_v20  ;;  %v4300_v8 = vadd.f32 %v4299_v42, %v4269_v58  ;;  %v4009_v51 = vpop.f32.mrf.mxu0  ;;  %v5448_v59 = vadd.f32 %v5447_v26, %v5446_v25  ;;  %v7935_v14 = vld [vmem:[#allocation12_spill] sm:$0xff]  ;;  %v7937_v26 = vld [vmem:[#allocation14_spill] sm:$0xff] }
 0x212   : > { %v4976_v24 = vpack.c.bf16 %v4018_v3, %v4015_v31  ;;  %v4010_v0 = vadd.f32 %v4009_v51, %v3849_v12  ;;  %v4273_v54 = vmul.f32 %v4018_v3, %v4018_v3  ;;  %v7936_v51 = vld [vmem:[#allocation13_spill] sm:$0xff] }
 0x213   : > { %v4301_v13 = vadd.f32 %v4300_v8, %v4270_v43  ;;  %v5527_v48 = vpop.f32.mrf.mxu0  ;;  %v3873_v28 = vadd.f32 %v5448_v59, %v7933_v53 }
 0x214   : > { %5008 = vst [vmem:[%s7763_s6 + $0x58] sm:$0xff] %v4976_v24   ;;  %v4971_v23 = vpack.c.bf16 %v4010_v0, %v4007_v20  ;;  %v4233_v38 = vadd.f32 %v4232_v39, %v4010_v0  ;;  %v4271_v40 = vmul.f32 %v4010_v0, %v4010_v0  ;;  %v5449_v2 = vpop.f32.mrf.mxu1  ;;  %v4031_v29 = vadd.f32 %v5527_v48, %v3870_v41 }
 0x215   : > { %v4022_v9 = vpop.f32.mrf.mxu0 }
 0x216   : > { %5007 = vst [vmem:[%s7763_s6 + $0x50] sm:$0xff] %v4971_v23   ;;  %v4234_v50 = vadd.f32 %v4233_v38, %v4015_v31  ;;  %v4302_v6 = vadd.f32 %v4301_v13, %v4271_v40  ;;  %v4023_v57 = vadd.f32 %v4022_v9, %v3862_v52  ;;  %v5450_v21 = vpop.f32.mrf.mxu1  ;;  %v4276_v61 = vmul.f32 %v4031_v29, %v4031_v29 }
 0x217   : > { %v5528_v56 = vpop.f32.mrf.mxu0  ;;  %v5451_v62 = vadd.f32 %v5450_v21, %v5449_v2 }
 0x218   : > { %v4303_v30 = vadd.f32 %v4302_v6, %v4272_v46  ;;  %v4235_v44 = vadd.f32 %v4234_v50, %v4018_v3  ;;  %v4034_v49 = vadd.f32 %v5528_v56, %v3873_v28  ;;  %v4274_v18 = vmul.f32 %v4023_v57, %v4023_v57  ;;  %v5452_v27 = vpop.f32.mrf.mxu1 }
 0x219   : > { %v4025_v36 = vpop.f32.mrf.mxu0  ;;  %v3878_v4 = vadd.f32 %v5451_v62, %v7935_v14 }
 0x21a   : > { %v4236_v37 = vadd.f32 %v4235_v44, %v4023_v57  ;;  %v4304_v10 = vadd.f32 %v4303_v30, %v4273_v54  ;;  %v4986_v11 = vpack.c.bf16 %v4034_v49, %v4031_v29  ;;  %v4026_v19 = vadd.f32 %v4025_v36, %v3865_v63  ;;  %v5453_v35 = vpop.f32.mrf.mxu1 }
 0x21b   : > { %v5454_v47 = vadd.f32 %v5453_v35, %v5452_v27  ;;  %v4277_v31 = vmul.f32 %v4034_v49, %v4034_v49 }
 0x21c   : > { %v4305_v55 = vadd.f32 %v4304_v10, %v4274_v18  ;;  %5010 = vst [vmem:[%s7763_s6 + $0x68] sm:$0xff] %v4986_v11   ;;  %v4981_v7 = vpack.c.bf16 %v4026_v19, %v4023_v57  ;;  %v4237_v17 = vadd.f32 %v4236_v37, %v4026_v19  ;;  %v4275_v1 = vmul.f32 %v4026_v19, %v4026_v19 }
 0x21d   : > { %v5455_v20 = vpop.f32.mrf.mxu1  ;;  %v5531_v15 = vpop.f32.mrf.mxu0  ;;  %v3881_v24 = vadd.f32 %v5454_v47, %v7936_v51 }
 0x21e   : > { %5009 = vst [vmem:[%s7763_s6 + $0x60] sm:$0xff] %v4981_v7   ;;  %v4238_v58 = vadd.f32 %v4237_v17, %v4031_v29  ;;  %v4306_v42 = vadd.f32 %v4305_v55, %v4275_v1 }
 0x21f   : > { %v5456_v25 = vpop.f32.mrf.mxu1  ;;  %v4038_v3 = vpop.f32.mrf.mxu0 }
 0x220   : > { %v4307_v60 = vadd.f32 %v4306_v42, %v4276_v61  ;;  %v5457_v12 = vadd.f32 %v5456_v25, %v5455_v20  ;;  %v4039_v33 = vadd.f32 %v4038_v3, %v3878_v4  ;;  %v4239_v39 = vadd.f32 %v4238_v58, %v4034_v49 }
 0x221   : > { %v5458_v43 = vpop.f32.mrf.mxu1  ;;  %v5532_v8 = vpop.f32.mrf.mxu0 }
 0x222   : > { %v3886_v0 = vadd.f32 %v5457_v12, %v7937_v26  ;;  %v4240_v34 = vadd.f32 %v4239_v39, %v4039_v33  ;;  %v4278_v13 = vmul.f32 %v4039_v33, %v4039_v33  ;;  %v4308_v59 = vadd.f32 %v4307_v60, %v4277_v31 }
 0x223   : > { %v5459_v23 = vpop.f32.mrf.mxu1  ;;  %v4041_v38 = vpop.f32.mrf.mxu0 }
 0x224   : > { %v4309_v40 = vadd.f32 %v4308_v59, %v4278_v13  ;;  %v5460_v48 = vadd.f32 %v5459_v23, %v5458_v43  ;;  %v4042_v16 = vadd.f32 %v4041_v38, %v3881_v24  ;;  %v4047_v22 = vadd.f32 %v5531_v15, %v3886_v0 }
 0x226   : > { %v3889_v52 = vadd.f32 %v5460_v48, %v7745_v5  ;;  %v4991_v46 = vpack.c.bf16 %v4042_v16, %v4039_v33  ;;  %v4241_v50 = vadd.f32 %v4240_v34, %v4042_v16  ;;  %v4279_v6 = vmul.f32 %v4042_v16, %v4042_v16 }
 0x227   : > { %v4280_v32 = vmul.f32 %v4047_v22, %v4047_v22 }
 0x228   : > { %v4050_v2 = vadd.f32 %v5532_v8, %v3889_v52  ;;  %5011 = vst [vmem:[%s7763_s6 + $0x70] sm:$0xff] %v4991_v46   ;;  %v4242_v9 = vadd.f32 %v4241_v50, %v4047_v22  ;;  %v4310_v41 = vadd.f32 %v4309_v40, %v4279_v6 }
 0x22a   : > { %v4996_v57 = vpack.c.bf16 %v4050_v2, %v4047_v22  ;;  %v4281_v53 = vmul.f32 %v4050_v2, %v4050_v2  ;;  %v4243_v28 = vadd.f32 %v4242_v9, %v4050_v2  ;;  %v4311_v54 = vadd.f32 %v4310_v41, %v4280_v32 }
 0x22c   : > { %5012 = vst [vmem:[%s7763_s6 + $0x78] sm:$0xff] %v4996_v57   ;;  %v4244_v30 = vrot.slane %v4243_v28, 4  ;;  %v4312_v21 = vadd.f32 %v4311_v54, %v4281_v53 }
 0x22e   : > { %v4245_v44 = vadd.f32 %v4244_v30, %v4243_v28  ;;  %v4313_v56 = vrot.slane %v4312_v21, 4 }
 0x230   : > { %v4246_v29 = vrot.slane %v4245_v44, 2  ;;  %v4314_v5 = vadd.f32 %v4313_v56, %v4312_v21 }
 0x232   : > { %v4247_v49 = vadd.f32 %v4246_v29, %v4245_v44  ;;  %v4315_v45 = vrot.slane %v4314_v5, 2 }
 0x234   : > { %v4248_v63 = vrot.slane %v4247_v49, 1  ;;  %v4316_v37 = vadd.f32 %v4315_v45, %v4314_v5 }
 0x236   : > { %v4317_v18 = vrot.slane %v4316_v37, 1  ;;  %v4249_v10 = vadd.f32 %v4248_v63, %v4247_v49 }
 0x238   : > { %v4318_v27 = vadd.f32 %v4317_v18, %v4316_v37 }
 0x23a   : > { %v4320_v36 = vsel %vm4319_vm6, %v4249_v10, %v4318_v27 }
 0x23b   : > { %4321 = vst [vmem:[%s214_s11] sm:$0x3] %v4320_v36 }
 0x23c PF: > { %s14_s14 = sadd.s32 1, %s5723_s14   ;;  %s7938_s12 = smov %s5719_s13 }
 0x23d   : > { %p11_p5 = scmp.ge.s32.totalorder %s14_s14, 4   ;;  %s7939_s13 = smov %s7941_s15 }
 0x23f   :  { %13 = sbr.rel (!%p11_p5) target bundleno = 2 (0x2), region = 72 }

</bundles_post_ra>
